<compile_context>
chip_gen: v5e
topology: v5e:2x2
jax: 0.10.0
libtpu: 0.0.40
codegen_flags: <defaults>
</compile_context>

<pallas_src>
from functools import partial

import numpy as np
import jax
import jax.numpy as jnp
from jax import lax
from jax.experimental import pallas as pl
from jax.experimental.pallas import tpu as pltpu  # noqa: F401  (kept for TPU backend import)

GATE_W = 128  # gate axis 3H=96 padded to one full 128-lane vreg row


def _align8(n):
    return (n + 7) // 8 * 8


def _blob_layout(in_ch, hidden):
    """Row offsets of the packed (rows, 128) parameter blob (8-aligned sections)."""
    C, H = in_ch, hidden
    lay = {}
    off = 0
    lay["gb"] = off;   off = _align8(off + 2)        # gamma, beta (cols 0:C)
    lay["w0i"] = off;  off = _align8(off + C)        # layer0 wihT  [rz | n | 0]
    lay["w0h"] = off;  off = _align8(off + H)        # layer0 whhT  [rz | 0 | n]
    lay["b0"] = off;   off = _align8(off + 1)        # layer0 fused bias
    lay["w1"] = off;   off = _align8(off + 2 * H)    # layer1 fused [wihT; whhT]
    lay["b1"] = off;   off = _align8(off + 1)        # layer1 fused bias
    lay["fc"] = off;   off = _align8(off + H)        # head weight (cols >= OUT zero)
    lay["fcb"] = off;  off = _align8(off + 1)        # head bias
    lay["rows"] = off
    return lay


# -------------------------- init-time parameter packing ----------------------
def pack_params(params, *, in_ch, hidden, outputs):
    """Pack all module parameters into one (rows, 128) f32 blob with numpy, once.

    Gate lane layout per 128-lane row: [r|z (0:2H)] [n-input (2H:3H)] [n-hidden (3H:4H)].
    The r/z parts of the input and hidden biases are pre-summed; the hidden n-bias
    lives in the n-hidden slot so it stays under the r* multiply.
    """
    C, H, OUT = in_ch, hidden, outputs
    H2, H3 = 2 * H, 3 * H
    lay = _blob_layout(C, H)
    blob = np.zeros((lay["rows"], GATE_W), np.float32)

    blob[lay["gb"] + 0, :C] = np.asarray(params["gamma"], np.float32).reshape(-1)
    blob[lay["gb"] + 1, :C] = np.asarray(params["beta"], np.float32).reshape(-1)

    (wih0T, whh0T, bih0, bhh0) = [np.asarray(a, np.float32) for a in params["gru"][0]]
    (wih1T, whh1T, bih1, bhh1) = [np.asarray(a, np.float32) for a in params["gru"][1]]
    bih0, bhh0 = bih0.reshape(-1), bhh0.reshape(-1)
    bih1, bhh1 = bih1.reshape(-1), bhh1.reshape(-1)

    # ---- layer 0 ----
    r = lay["w0i"]                                  # input proj: [wih_rz | wih_n | 0]
    blob[r:r + C, :H2] = wih0T[:, :H2]
    blob[r:r + C, H2:H3] = wih0T[:, H2:H3]
    r = lay["b0"]                                   # hoisted bias: [bih_rz+bhh_rz | bih_n | bhh_n]
    blob[r, :H2] = bih0[:H2] + bhh0[:H2]
    blob[r, H2:H3] = bih0[H2:H3]
    blob[r, H3:H3 + H] = bhh0[H2:H3]
    r = lay["w0h"]                                  # recurrent: [whh_rz | 0 | whh_n]
    blob[r:r + H, :H2] = whh0T[:, :H2]
    blob[r:r + H, H3:H3 + H] = whh0T[:, H2:H3]

    # ---- layer 1 (fused [wih; whh] -> one (2H,128) matmul per step) ----
    r = lay["w1"]
    blob[r:r + H, :H2] = wih1T[:, :H2]
    blob[r:r + H, H2:H3] = wih1T[:, H2:H3]
    blob[r + H:r + 2 * H, :H2] = whh1T[:, :H2]
    blob[r + H:r + 2 * H, H3:H3 + H] = whh1T[:, H2:H3]
    r = lay["b1"]
    blob[r, :H2] = bih1[:H2] + bhh1[:H2]
    blob[r, H2:H3] = bih1[H2:H3]
    blob[r, H3:H3 + H] = bhh1[H2:H3]

    # ---- head ----
    r = lay["fc"]
    blob[r:r + H, :OUT] = np.asarray(params["fc_wT"], np.float32)
    blob[lay["fcb"], :OUT] = np.asarray(params["fc_b"], np.float32).reshape(-1)

    return jnp.asarray(blob)


# ----------------------------- Pallas kernel --------------------------------
def make_gru_kernel(*, layers, hidden, in_ch, batch, seq_len, outputs, eps=1e-5):
    assert layers == 2, "interleaved pipeline is specialized to the module's layers=2"
    H, C, B, L, OUT = hidden, in_ch, batch, seq_len, outputs
    H2, H3 = 2 * H, 3 * H
    assert H3 + H <= GATE_W
    lay = _blob_layout(C, H)

    def kernel(x_ref, w_ref, out_ref):
        # x_ref  : (L*B, C)     time-major-flat input (row = t*B + b)
        # w_ref  : (rows, 128)  packed parameters (see pack_params / _blob_layout)
        # out_ref: (B, OUT)

        # ---- BatchNorm1d (training-mode batch stats), two-pass ---------------
        x = x_ref[...]                                         # (L*B, C)
        inv_n = 1.0 / float(L * B)
        mean = jnp.sum(x, axis=0, keepdims=True) * inv_n       # (1, C)
        xc = x - mean
        var = jnp.sum(xc * xc, axis=0, keepdims=True) * inv_n  # (1, C)
        gamma = w_ref[lay["gb"]:lay["gb"] + 1, :C]
        beta = w_ref[lay["gb"] + 1:lay["gb"] + 2, :C]
        xn = xc * (gamma * lax.rsqrt(var + eps)) + beta        # (L*B, C)

        # ---- hoisted layer-0 input projection for the whole sequence ---------
        # per-row lane layout: [rz(+bih_rz+bhh_rz) | gi_n(+bih_n) | bhh_n]
        w0i = w_ref[lay["w0i"]:lay["w0i"] + C, :]              # (C, 128)
        b0 = w_ref[lay["b0"]:lay["b0"] + 1, :]                 # (1, 128)
        gi0 = jnp.dot(xn, w0i, preferred_element_type=jnp.float32) + b0   # (L*B,128)

        w0h = w_ref[lay["w0h"]:lay["w0h"] + H, :]              # (H, 128) [whh_rz|0|whh_n]
        w1 = w_ref[lay["w1"]:lay["w1"] + 2 * H, :]             # (2H,128) fused layer-1
        b1 = w_ref[lay["b1"]:lay["b1"] + 1, :]                 # (1, 128)

        def gru_gates(g, h_prev):
            # g: (B,128) = [rz_pre | gi_n | gh_n], all biases already folded in.
            rz = jax.nn.sigmoid(g[:, :H2])
            r = rz[:, :H]
            z = rz[:, H:H2]
            n = jnp.tanh(g[:, H2:H3] + r * g[:, H3:H3 + H])
            return n + z * (h_prev - n)                        # == (1-z)*n + z*h

        def l0_step(gi_t, h0):
            gh = jnp.dot(h0, w0h, preferred_element_type=jnp.float32)
            return gru_gates(gi_t + gh, h0)

        def l1_step(x1, h1):
            xin = jnp.concatenate([x1, h1], axis=1)            # (B, 2H)
            g = jnp.dot(xin, w1, preferred_element_type=jnp.float32) + b1
            return gru_gates(g, h1)

        # ---- interleaved two-layer recurrence (software-pipelined over t) ----
        # At iteration t both steps read h0_{t-1}; they are independent, so the
        # scheduler overlaps layer-1 step t-1 with layer-0 step t.
        h0 = jnp.zeros((B, H), jnp.float32)
        h1 = jnp.zeros((B, H), jnp.float32)
        for t in range(L):                                     # fully unrolled
            gi_t = gi0[t * B:(t + 1) * B, :]                   # static in-register slice
            if t >= 1:
                h1 = l1_step(h0, h1)                           # layer-1 step t-1
            h0 = l0_step(gi_t, h0)                             # layer-0 step t
        h1 = l1_step(h0, h1)                                   # epilogue: layer-1 step L-1

        # ---- head: Linear(H, OUT), computed at 128-lane width ----------------
        fc_w = w_ref[lay["fc"]:lay["fc"] + H, :]               # (H,128), cols>=OUT zero
        fc_b = w_ref[lay["fcb"]:lay["fcb"] + 1, :]
        out = jnp.dot(h1, fc_w, preferred_element_type=jnp.float32) + fc_b
        out_ref[...] = out[:, :OUT]

    return kernel


# ------------------------------ wrapper --------------------------------------
@partial(jax.jit, static_argnames=("hidden", "outputs"))
def gru_forward(x_bcl, blob, *, hidden, outputs):
    B, C, L = x_bcl.shape
    # time-major, batch-flattened input: row index = t*B + b
    x_flat = jnp.transpose(x_bcl, (2, 0, 1)).reshape(L * B, C).astype(jnp.float32)
    kernel = make_gru_kernel(layers=2, hidden=hidden, in_ch=C, batch=B,
                             seq_len=L, outputs=outputs)
    return pl.pallas_call(
        kernel,
        out_shape=jax.ShapeDtypeStruct((B, outputs), jnp.float32),
    )(x_flat, blob)


# --------------------------- pure-JAX reference ------------------------------
def ref_forward(x_bcl, params, *, layers, hidden, eps=1e-5):
    H = hidden
    x = x_bcl.astype(jnp.float32)                              # (B, C, L)
    mean = jnp.mean(x, axis=(0, 2), keepdims=True)
    var = jnp.mean((x - mean) ** 2, axis=(0, 2), keepdims=True)
    xn = ((x - mean) / jnp.sqrt(var + eps)
          * params["gamma"].reshape(1, -1, 1) + params["beta"].reshape(1, -1, 1))
    seq = jnp.transpose(xn, (0, 2, 1))                         # (B, L, C)
    for (wihT, whhT, bih, bhh) in params["gru"]:
        B, L, _ = seq.shape
        h = jnp.zeros((B, H), jnp.float32)
        outs = []
        for t in range(L):
            gi = seq[:, t, :] @ wihT + bih
            gh = h @ whhT + bhh
            r = jax.nn.sigmoid(gi[:, :H] + gh[:, :H])
            z = jax.nn.sigmoid(gi[:, H:2 * H] + gh[:, H:2 * H])
            n = jnp.tanh(gi[:, 2 * H:] + r * gh[:, 2 * H:])
            h = (1.0 - z) * n + z * h
            outs.append(h)
        seq = jnp.stack(outs, axis=1)
    out = seq[:, -1, :]
    return out @ params["fc_wT"] + params["fc_b"]


# ------------------------------- main -----------------------------------------
if __name__ == "__main__":
    B, C, L = 2, 4, 16          # batch, in_channels, seq_len
    H, LAYERS, OUT = 32, 2, 3   # hidden_size, layers, outputs

    key = jax.random.PRNGKey(0)

    def uinit(k, shape, bound):
        return jax.random.uniform(k, shape, jnp.float32, -bound, bound)

    keys = jax.random.split(key, 4 * LAYERS + 5)
    bound = 1.0 / np.sqrt(H)

    gru_params = []
    ki = 0
    for l in range(LAYERS):
        in_dim = C if l == 0 else H
        wihT = uinit(keys[ki], (in_dim, 3 * H), bound); ki += 1
        whhT = uinit(keys[ki], (H, 3 * H), bound);      ki += 1
        bih = uinit(keys[ki], (1, 3 * H), bound);       ki += 1
        bhh = uinit(keys[ki], (1, 3 * H), bound);       ki += 1
        gru_params.append((wihT, whhT, bih, bhh))

    params = {
        # non-trivial BN affine to exercise the gamma/beta packing path
        "gamma": uinit(keys[ki], (1, C), 0.5) + 1.0,
        "beta": uinit(keys[ki + 1], (1, C), 0.5),
        "gru": gru_params,
        "fc_wT": uinit(keys[ki + 2], (H, OUT), bound),
        "fc_b": uinit(keys[ki + 3], (1, OUT), bound),
    }

    x = jax.random.normal(keys[ki + 4], (B, C, L), jnp.float32)   # NCL input

    # parameter blob is built exactly once at init (numpy) -> no per-call packing
    blob = pack_params(params, in_ch=C, hidden=H, outputs=OUT)

    out = gru_forward(x, blob, hidden=H, outputs=OUT)
    out = jax.block_until_ready(out)

    ref = ref_forward(x, params, layers=LAYERS, hidden=H)
    np.testing.assert_allclose(np.asarray(out), np.asarray(ref),
                               rtol=2e-3, atol=2e-3)

    print("KERNEL_OK")
</pallas_src>

<mosaic_0001>
module attributes {stable_mosaic.version = 11 : i64} {
  func.func @kernel(%arg0: memref<32x4xf32, #tpu.memory_space<vmem>>, %arg1: memref<168x128xf32, #tpu.memory_space<vmem>>, %arg2: memref<2x3xf32, #tpu.memory_space<vmem>>) attributes {dimension_semantics = [], scalar_prefetch = 0 : i64, scratch_operands = 0 : i64, tpu.core_type = #tpu.core_type<tc>} {
    %c0 = arith.constant 0 : index
    %c0_0 = arith.constant 0 : index
    %0 = vector.load %arg0[%c0, %c0_0] : memref<32x4xf32, #tpu.memory_space<vmem>>, vector<32x4xf32>
    %cst = arith.constant dense<0.000000e+00> : vector<4xf32>
    %1 = vector.multi_reduction <add>, %0, %cst [0] : vector<32x4xf32> to vector<4xf32>
    %2 = vector.shape_cast %1 : vector<4xf32> to vector<1x4xf32>
    %cst_1 = arith.constant 3.125000e-02 : f32
    %3 = vector.broadcast %cst_1 : f32 to vector<1x4xf32>
    %4 = arith.mulf %2, %3 : vector<1x4xf32>
    %5 = vector.broadcast %4 : vector<1x4xf32> to vector<32x4xf32>
    %6 = arith.subf %0, %5 : vector<32x4xf32>
    %7 = arith.mulf %6, %6 : vector<32x4xf32>
    %cst_2 = arith.constant dense<0.000000e+00> : vector<4xf32>
    %8 = vector.multi_reduction <add>, %7, %cst_2 [0] : vector<32x4xf32> to vector<4xf32>
    %9 = vector.shape_cast %8 : vector<4xf32> to vector<1x4xf32>
    %cst_3 = arith.constant 3.125000e-02 : f32
    %10 = vector.broadcast %cst_3 : f32 to vector<1x4xf32>
    %11 = arith.mulf %9, %10 : vector<1x4xf32>
    %c0_4 = arith.constant 0 : index
    %c0_5 = arith.constant 0 : index
    %12 = vector.load %arg1[%c0_4, %c0_5] : memref<168x128xf32, #tpu.memory_space<vmem>>, vector<1x4xf32>
    %c1 = arith.constant 1 : index
    %c0_6 = arith.constant 0 : index
    %13 = vector.load %arg1[%c1, %c0_6] : memref<168x128xf32, #tpu.memory_space<vmem>>, vector<1x4xf32>
    %cst_7 = arith.constant 9.99999974E-6 : f32
    %14 = vector.broadcast %cst_7 : f32 to vector<1x4xf32>
    %15 = arith.addf %11, %14 : vector<1x4xf32>
    %16 = math.rsqrt %15 : vector<1x4xf32>
    %17 = arith.mulf %12, %16 : vector<1x4xf32>
    %18 = vector.broadcast %17 : vector<1x4xf32> to vector<32x4xf32>
    %19 = arith.mulf %6, %18 : vector<32x4xf32>
    %20 = vector.broadcast %13 : vector<1x4xf32> to vector<32x4xf32>
    %21 = arith.addf %19, %20 : vector<32x4xf32>
    %c8 = arith.constant 8 : index
    %c0_8 = arith.constant 0 : index
    %22 = vector.load %arg1[%c8, %c0_8] : memref<168x128xf32, #tpu.memory_space<vmem>>, vector<4x128xf32>
    %c48 = arith.constant 48 : index
    %c0_9 = arith.constant 0 : index
    %23 = vector.load %arg1[%c48, %c0_9] : memref<168x128xf32, #tpu.memory_space<vmem>>, vector<1x128xf32>
    %cst_10 = arith.constant dense<0.000000e+00> : vector<32x128xf32>
    %24 = tpu.matmul %21, %22, %cst_10 {dimension_numbers = #tpu.dot_dimension_numbers<[1], [0], [0], [1], [0, 0, 1, 1], [], []>} : vector<32x4xf32>, vector<4x128xf32>, vector<32x128xf32> -> vector<32x128xf32>
    %25 = vector.broadcast %23 : vector<1x128xf32> to vector<32x128xf32>
    %26 = arith.addf %24, %25 : vector<32x128xf32>
    %c16 = arith.constant 16 : index
    %c0_11 = arith.constant 0 : index
    %27 = vector.load %arg1[%c16, %c0_11] : memref<168x128xf32, #tpu.memory_space<vmem>>, vector<32x128xf32>
    %c56 = arith.constant 56 : index
    %c0_12 = arith.constant 0 : index
    %28 = vector.load %arg1[%c56, %c0_12] : memref<168x128xf32, #tpu.memory_space<vmem>>, vector<64x128xf32>
    %c120 = arith.constant 120 : index
    %c0_13 = arith.constant 0 : index
    %29 = vector.load %arg1[%c120, %c0_13] : memref<168x128xf32, #tpu.memory_space<vmem>>, vector<1x128xf32>
    %cst_14 = arith.constant 0.000000e+00 : f32
    %30 = vector.broadcast %cst_14 : f32 to vector<2x32xf32>
    %cst_15 = arith.constant 0.000000e+00 : f32
    %31 = vector.broadcast %cst_15 : f32 to vector<2x32xf32>
    %32 = vector.extract_strided_slice %26 {offsets = [0, 0], sizes = [2, 128], strides = [1, 1]} : vector<32x128xf32> to vector<2x128xf32>
    %cst_16 = arith.constant dense<0.000000e+00> : vector<2x128xf32>
    %33 = tpu.matmul %30, %27, %cst_16 {dimension_numbers = #tpu.dot_dimension_numbers<[1], [0], [0], [1], [0, 0, 1, 1], [], []>} : vector<2x32xf32>, vector<32x128xf32>, vector<2x128xf32> -> vector<2x128xf32>
    %34 = arith.addf %32, %33 : vector<2x128xf32>
    %35 = vector.extract_strided_slice %34 {offsets = [0, 0], sizes = [2, 64], strides = [1, 1]} : vector<2x128xf32> to vector<2x64xf32>
    %36 = arith.negf %35 : vector<2x64xf32>
    %37 = math.exp %36 : vector<2x64xf32>
    %cst_17 = arith.constant 1.000000e+00 : f32
    %38 = vector.broadcast %cst_17 : f32 to vector<2x64xf32>
    %39 = arith.addf %38, %37 : vector<2x64xf32>
    %40 = arith.divf %38, %39 : vector<2x64xf32>
    %41 = vector.extract_strided_slice %40 {offsets = [0, 0], sizes = [2, 32], strides = [1, 1]} : vector<2x64xf32> to vector<2x32xf32>
    %42 = vector.extract_strided_slice %40 {offsets = [0, 32], sizes = [2, 32], strides = [1, 1]} : vector<2x64xf32> to vector<2x32xf32>
    %43 = vector.extract_strided_slice %34 {offsets = [0, 64], sizes = [2, 32], strides = [1, 1]} : vector<2x128xf32> to vector<2x32xf32>
    %44 = vector.extract_strided_slice %34 {offsets = [0, 96], sizes = [2, 32], strides = [1, 1]} : vector<2x128xf32> to vector<2x32xf32>
    %45 = arith.mulf %41, %44 : vector<2x32xf32>
    %46 = arith.addf %43, %45 : vector<2x32xf32>
    %47 = math.tanh %46 : vector<2x32xf32>
    %48 = arith.subf %30, %47 : vector<2x32xf32>
    %49 = arith.mulf %42, %48 : vector<2x32xf32>
    %50 = arith.addf %47, %49 : vector<2x32xf32>
    %51 = vector.extract_strided_slice %26 {offsets = [2, 0], sizes = [2, 128], strides = [1, 1]} : vector<32x128xf32> to vector<2x128xf32>
    %52 = tpu.concatenate %50, %31 in 1 : vector<2x32xf32>, vector<2x32xf32> -> vector<2x64xf32>
    %cst_18 = arith.constant dense<0.000000e+00> : vector<2x128xf32>
    %53 = tpu.matmul %52, %28, %cst_18 {dimension_numbers = #tpu.dot_dimension_numbers<[1], [0], [0], [1], [0, 0, 1, 1], [], []>} : vector<2x64xf32>, vector<64x128xf32>, vector<2x128xf32> -> vector<2x128xf32>
    %54 = vector.broadcast %29 : vector<1x128xf32> to vector<2x128xf32>
    %55 = arith.addf %53, %54 : vector<2x128xf32>
    %56 = vector.extract_strided_slice %55 {offsets = [0, 0], sizes = [2, 64], strides = [1, 1]} : vector<2x128xf32> to vector<2x64xf32>
    %57 = arith.negf %56 : vector<2x64xf32>
    %58 = math.exp %57 : vector<2x64xf32>
    %cst_19 = arith.constant 1.000000e+00 : f32
    %59 = vector.broadcast %cst_19 : f32 to vector<2x64xf32>
    %60 = arith.addf %59, %58 : vector<2x64xf32>
    %61 = arith.divf %59, %60 : vector<2x64xf32>
    %62 = vector.extract_strided_slice %61 {offsets = [0, 0], sizes = [2, 32], strides = [1, 1]} : vector<2x64xf32> to vector<2x32xf32>
    %63 = vector.extract_strided_slice %61 {offsets = [0, 32], sizes = [2, 32], strides = [1, 1]} : vector<2x64xf32> to vector<2x32xf32>
    %64 = vector.extract_strided_slice %55 {offsets = [0, 64], sizes = [2, 32], strides = [1, 1]} : vector<2x128xf32> to vector<2x32xf32>
    %65 = vector.extract_strided_slice %55 {offsets = [0, 96], sizes = [2, 32], strides = [1, 1]} : vector<2x128xf32> to vector<2x32xf32>
    %66 = arith.mulf %62, %65 : vector<2x32xf32>
    %67 = arith.addf %64, %66 : vector<2x32xf32>
    %68 = math.tanh %67 : vector<2x32xf32>
    %69 = arith.subf %31, %68 : vector<2x32xf32>
    %70 = arith.mulf %63, %69 : vector<2x32xf32>
    %71 = arith.addf %68, %70 : vector<2x32xf32>
    %cst_20 = arith.constant dense<0.000000e+00> : vector<2x128xf32>
    %72 = tpu.matmul %50, %27, %cst_20 {dimension_numbers = #tpu.dot_dimension_numbers<[1], [0], [0], [1], [0, 0, 1, 1], [], []>} : vector<2x32xf32>, vector<32x128xf32>, vector<2x128xf32> -> vector<2x128xf32>
    %73 = arith.addf %51, %72 : vector<2x128xf32>
    %74 = vector.extract_strided_slice %73 {offsets = [0, 0], sizes = [2, 64], strides = [1, 1]} : vector<2x128xf32> to vector<2x64xf32>
    %75 = arith.negf %74 : vector<2x64xf32>
    %76 = math.exp %75 : vector<2x64xf32>
    %cst_21 = arith.constant 1.000000e+00 : f32
    %77 = vector.broadcast %cst_21 : f32 to vector<2x64xf32>
    %78 = arith.addf %77, %76 : vector<2x64xf32>
    %79 = arith.divf %77, %78 : vector<2x64xf32>
    %80 = vector.extract_strided_slice %79 {offsets = [0, 0], sizes = [2, 32], strides = [1, 1]} : vector<2x64xf32> to vector<2x32xf32>
    %81 = vector.extract_strided_slice %79 {offsets = [0, 32], sizes = [2, 32], strides = [1, 1]} : vector<2x64xf32> to vector<2x32xf32>
    %82 = vector.extract_strided_slice %73 {offsets = [0, 64], sizes = [2, 32], strides = [1, 1]} : vector<2x128xf32> to vector<2x32xf32>
    %83 = vector.extract_strided_slice %73 {offsets = [0, 96], sizes = [2, 32], strides = [1, 1]} : vector<2x128xf32> to vector<2x32xf32>
    %84 = arith.mulf %80, %83 : vector<2x32xf32>
    %85 = arith.addf %82, %84 : vector<2x32xf32>
    %86 = math.tanh %85 : vector<2x32xf32>
    %87 = arith.subf %50, %86 : vector<2x32xf32>
    %88 = arith.mulf %81, %87 : vector<2x32xf32>
    %89 = arith.addf %86, %88 : vector<2x32xf32>
    %90 = vector.extract_strided_slice %26 {offsets = [4, 0], sizes = [2, 128], strides = [1, 1]} : vector<32x128xf32> to vector<2x128xf32>
    %91 = tpu.concatenate %89, %71 in 1 : vector<2x32xf32>, vector<2x32xf32> -> vector<2x64xf32>
    %cst_22 = arith.constant dense<0.000000e+00> : vector<2x128xf32>
    %92 = tpu.matmul %91, %28, %cst_22 {dimension_numbers = #tpu.dot_dimension_numbers<[1], [0], [0], [1], [0, 0, 1, 1], [], []>} : vector<2x64xf32>, vector<64x128xf32>, vector<2x128xf32> -> vector<2x128xf32>
    %93 = vector.broadcast %29 : vector<1x128xf32> to vector<2x128xf32>
    %94 = arith.addf %92, %93 : vector<2x128xf32>
    %95 = vector.extract_strided_slice %94 {offsets = [0, 0], sizes = [2, 64], strides = [1, 1]} : vector<2x128xf32> to vector<2x64xf32>
    %96 = arith.negf %95 : vector<2x64xf32>
    %97 = math.exp %96 : vector<2x64xf32>
    %cst_23 = arith.constant 1.000000e+00 : f32
    %98 = vector.broadcast %cst_23 : f32 to vector<2x64xf32>
    %99 = arith.addf %98, %97 : vector<2x64xf32>
    %100 = arith.divf %98, %99 : vector<2x64xf32>
    %101 = vector.extract_strided_slice %100 {offsets = [0, 0], sizes = [2, 32], strides = [1, 1]} : vector<2x64xf32> to vector<2x32xf32>
    %102 = vector.extract_strided_slice %100 {offsets = [0, 32], sizes = [2, 32], strides = [1, 1]} : vector<2x64xf32> to vector<2x32xf32>
    %103 = vector.extract_strided_slice %94 {offsets = [0, 64], sizes = [2, 32], strides = [1, 1]} : vector<2x128xf32> to vector<2x32xf32>
    %104 = vector.extract_strided_slice %94 {offsets = [0, 96], sizes = [2, 32], strides = [1, 1]} : vector<2x128xf32> to vector<2x32xf32>
    %105 = arith.mulf %101, %104 : vector<2x32xf32>
    %106 = arith.addf %103, %105 : vector<2x32xf32>
    %107 = math.tanh %106 : vector<2x32xf32>
    %108 = arith.subf %71, %107 : vector<2x32xf32>
    %109 = arith.mulf %102, %108 : vector<2x32xf32>
    %110 = arith.addf %107, %109 : vector<2x32xf32>
    %cst_24 = arith.constant dense<0.000000e+00> : vector<2x128xf32>
    %111 = tpu.matmul %89, %27, %cst_24 {dimension_numbers = #tpu.dot_dimension_numbers<[1], [0], [0], [1], [0, 0, 1, 1], [], []>} : vector<2x32xf32>, vector<32x128xf32>, vector<2x128xf32> -> vector<2x128xf32>
    %112 = arith.addf %90, %111 : vector<2x128xf32>
    %113 = vector.extract_strided_slice %112 {offsets = [0, 0], sizes = [2, 64], strides = [1, 1]} : vector<2x128xf32> to vector<2x64xf32>
    %114 = arith.negf %113 : vector<2x64xf32>
    %115 = math.exp %114 : vector<2x64xf32>
    %cst_25 = arith.constant 1.000000e+00 : f32
    %116 = vector.broadcast %cst_25 : f32 to vector<2x64xf32>
    %117 = arith.addf %116, %115 : vector<2x64xf32>
    %118 = arith.divf %116, %117 : vector<2x64xf32>
    %119 = vector.extract_strided_slice %118 {offsets = [0, 0], sizes = [2, 32], strides = [1, 1]} : vector<2x64xf32> to vector<2x32xf32>
    %120 = vector.extract_strided_slice %118 {offsets = [0, 32], sizes = [2, 32], strides = [1, 1]} : vector<2x64xf32> to vector<2x32xf32>
    %121 = vector.extract_strided_slice %112 {offsets = [0, 64], sizes = [2, 32], strides = [1, 1]} : vector<2x128xf32> to vector<2x32xf32>
    %122 = vector.extract_strided_slice %112 {offsets = [0, 96], sizes = [2, 32], strides = [1, 1]} : vector<2x128xf32> to vector<2x32xf32>
    %123 = arith.mulf %119, %122 : vector<2x32xf32>
    %124 = arith.addf %121, %123 : vector<2x32xf32>
    %125 = math.tanh %124 : vector<2x32xf32>
    %126 = arith.subf %89, %125 : vector<2x32xf32>
    %127 = arith.mulf %120, %126 : vector<2x32xf32>
    %128 = arith.addf %125, %127 : vector<2x32xf32>
    %129 = vector.extract_strided_slice %26 {offsets = [6, 0], sizes = [2, 128], strides = [1, 1]} : vector<32x128xf32> to vector<2x128xf32>
    %130 = tpu.concatenate %128, %110 in 1 : vector<2x32xf32>, vector<2x32xf32> -> vector<2x64xf32>
    %cst_26 = arith.constant dense<0.000000e+00> : vector<2x128xf32>
    %131 = tpu.matmul %130, %28, %cst_26 {dimension_numbers = #tpu.dot_dimension_numbers<[1], [0], [0], [1], [0, 0, 1, 1], [], []>} : vector<2x64xf32>, vector<64x128xf32>, vector<2x128xf32> -> vector<2x128xf32>
    %132 = vector.broadcast %29 : vector<1x128xf32> to vector<2x128xf32>
    %133 = arith.addf %131, %132 : vector<2x128xf32>
    %134 = vector.extract_strided_slice %133 {offsets = [0, 0], sizes = [2, 64], strides = [1, 1]} : vector<2x128xf32> to vector<2x64xf32>
    %135 = arith.negf %134 : vector<2x64xf32>
    %136 = math.exp %135 : vector<2x64xf32>
    %cst_27 = arith.constant 1.000000e+00 : f32
    %137 = vector.broadcast %cst_27 : f32 to vector<2x64xf32>
    %138 = arith.addf %137, %136 : vector<2x64xf32>
    %139 = arith.divf %137, %138 : vector<2x64xf32>
    %140 = vector.extract_strided_slice %139 {offsets = [0, 0], sizes = [2, 32], strides = [1, 1]} : vector<2x64xf32> to vector<2x32xf32>
    %141 = vector.extract_strided_slice %139 {offsets = [0, 32], sizes = [2, 32], strides = [1, 1]} : vector<2x64xf32> to vector<2x32xf32>
    %142 = vector.extract_strided_slice %133 {offsets = [0, 64], sizes = [2, 32], strides = [1, 1]} : vector<2x128xf32> to vector<2x32xf32>
    %143 = vector.extract_strided_slice %133 {offsets = [0, 96], sizes = [2, 32], strides = [1, 1]} : vector<2x128xf32> to vector<2x32xf32>
    %144 = arith.mulf %140, %143 : vector<2x32xf32>
    %145 = arith.addf %142, %144 : vector<2x32xf32>
    %146 = math.tanh %145 : vector<2x32xf32>
    %147 = arith.subf %110, %146 : vector<2x32xf32>
    %148 = arith.mulf %141, %147 : vector<2x32xf32>
    %149 = arith.addf %146, %148 : vector<2x32xf32>
    %cst_28 = arith.constant dense<0.000000e+00> : vector<2x128xf32>
    %150 = tpu.matmul %128, %27, %cst_28 {dimension_numbers = #tpu.dot_dimension_numbers<[1], [0], [0], [1], [0, 0, 1, 1], [], []>} : vector<2x32xf32>, vector<32x128xf32>, vector<2x128xf32> -> vector<2x128xf32>
    %151 = arith.addf %129, %150 : vector<2x128xf32>
    %152 = vector.extract_strided_slice %151 {offsets = [0, 0], sizes = [2, 64], strides = [1, 1]} : vector<2x128xf32> to vector<2x64xf32>
    %153 = arith.negf %152 : vector<2x64xf32>
    %154 = math.exp %153 : vector<2x64xf32>
    %cst_29 = arith.constant 1.000000e+00 : f32
    %155 = vector.broadcast %cst_29 : f32 to vector<2x64xf32>
    %156 = arith.addf %155, %154 : vector<2x64xf32>
    %157 = arith.divf %155, %156 : vector<2x64xf32>
    %158 = vector.extract_strided_slice %157 {offsets = [0, 0], sizes = [2, 32], strides = [1, 1]} : vector<2x64xf32> to vector<2x32xf32>
    %159 = vector.extract_strided_slice %157 {offsets = [0, 32], sizes = [2, 32], strides = [1, 1]} : vector<2x64xf32> to vector<2x32xf32>
    %160 = vector.extract_strided_slice %151 {offsets = [0, 64], sizes = [2, 32], strides = [1, 1]} : vector<2x128xf32> to vector<2x32xf32>
    %161 = vector.extract_strided_slice %151 {offsets = [0, 96], sizes = [2, 32], strides = [1, 1]} : vector<2x128xf32> to vector<2x32xf32>
    %162 = arith.mulf %158, %161 : vector<2x32xf32>
    %163 = arith.addf %160, %162 : vector<2x32xf32>
    %164 = math.tanh %163 : vector<2x32xf32>
    %165 = arith.subf %128, %164 : vector<2x32xf32>
    %166 = arith.mulf %159, %165 : vector<2x32xf32>
    %167 = arith.addf %164, %166 : vector<2x32xf32>
    %168 = vector.extract_strided_slice %26 {offsets = [8, 0], sizes = [2, 128], strides = [1, 1]} : vector<32x128xf32> to vector<2x128xf32>
    %169 = tpu.concatenate %167, %149 in 1 : vector<2x32xf32>, vector<2x32xf32> -> vector<2x64xf32>
    %cst_30 = arith.constant dense<0.000000e+00> : vector<2x128xf32>
    %170 = tpu.matmul %169, %28, %cst_30 {dimension_numbers = #tpu.dot_dimension_numbers<[1], [0], [0], [1], [0, 0, 1, 1], [], []>} : vector<2x64xf32>, vector<64x128xf32>, vector<2x128xf32> -> vector<2x128xf32>
    %171 = vector.broadcast %29 : vector<1x128xf32> to vector<2x128xf32>
    %172 = arith.addf %170, %171 : vector<2x128xf32>
    %173 = vector.extract_strided_slice %172 {offsets = [0, 0], sizes = [2, 64], strides = [1, 1]} : vector<2x128xf32> to vector<2x64xf32>
    %174 = arith.negf %173 : vector<2x64xf32>
    %175 = math.exp %174 : vector<2x64xf32>
    %cst_31 = arith.constant 1.000000e+00 : f32
    %176 = vector.broadcast %cst_31 : f32 to vector<2x64xf32>
    %177 = arith.addf %176, %175 : vector<2x64xf32>
    %178 = arith.divf %176, %177 : vector<2x64xf32>
    %179 = vector.extract_strided_slice %178 {offsets = [0, 0], sizes = [2, 32], strides = [1, 1]} : vector<2x64xf32> to vector<2x32xf32>
    %180 = vector.extract_strided_slice %178 {offsets = [0, 32], sizes = [2, 32], strides = [1, 1]} : vector<2x64xf32> to vector<2x32xf32>
    %181 = vector.extract_strided_slice %172 {offsets = [0, 64], sizes = [2, 32], strides = [1, 1]} : vector<2x128xf32> to vector<2x32xf32>
    %182 = vector.extract_strided_slice %172 {offsets = [0, 96], sizes = [2, 32], strides = [1, 1]} : vector<2x128xf32> to vector<2x32xf32>
    %183 = arith.mulf %179, %182 : vector<2x32xf32>
    %184 = arith.addf %181, %183 : vector<2x32xf32>
    %185 = math.tanh %184 : vector<2x32xf32>
    %186 = arith.subf %149, %185 : vector<2x32xf32>
    %187 = arith.mulf %180, %186 : vector<2x32xf32>
    %188 = arith.addf %185, %187 : vector<2x32xf32>
    %cst_32 = arith.constant dense<0.000000e+00> : vector<2x128xf32>
    %189 = tpu.matmul %167, %27, %cst_32 {dimension_numbers = #tpu.dot_dimension_numbers<[1], [0], [0], [1], [0, 0, 1, 1], [], []>} : vector<2x32xf32>, vector<32x128xf32>, vector<2x128xf32> -> vector<2x128xf32>
    %190 = arith.addf %168, %189 : vector<2x128xf32>
    %191 = vector.extract_strided_slice %190 {offsets = [0, 0], sizes = [2, 64], strides = [1, 1]} : vector<2x128xf32> to vector<2x64xf32>
    %192 = arith.negf %191 : vector<2x64xf32>
    %193 = math.exp %192 : vector<2x64xf32>
    %cst_33 = arith.constant 1.000000e+00 : f32
    %194 = vector.broadcast %cst_33 : f32 to vector<2x64xf32>
    %195 = arith.addf %194, %193 : vector<2x64xf32>
    %196 = arith.divf %194, %195 : vector<2x64xf32>
    %197 = vector.extract_strided_slice %196 {offsets = [0, 0], sizes = [2, 32], strides = [1, 1]} : vector<2x64xf32> to vector<2x32xf32>
    %198 = vector.extract_strided_slice %196 {offsets = [0, 32], sizes = [2, 32], strides = [1, 1]} : vector<2x64xf32> to vector<2x32xf32>
    %199 = vector.extract_strided_slice %190 {offsets = [0, 64], sizes = [2, 32], strides = [1, 1]} : vector<2x128xf32> to vector<2x32xf32>
    %200 = vector.extract_strided_slice %190 {offsets = [0, 96], sizes = [2, 32], strides = [1, 1]} : vector<2x128xf32> to vector<2x32xf32>
    %201 = arith.mulf %197, %200 : vector<2x32xf32>
    %202 = arith.addf %199, %201 : vector<2x32xf32>
    %203 = math.tanh %202 : vector<2x32xf32>
    %204 = arith.subf %167, %203 : vector<2x32xf32>
    %205 = arith.mulf %198, %204 : vector<2x32xf32>
    %206 = arith.addf %203, %205 : vector<2x32xf32>
    %207 = vector.extract_strided_slice %26 {offsets = [10, 0], sizes = [2, 128], strides = [1, 1]} : vector<32x128xf32> to vector<2x128xf32>
    %208 = tpu.concatenate %206, %188 in 1 : vector<2x32xf32>, vector<2x32xf32> -> vector<2x64xf32>
    %cst_34 = arith.constant dense<0.000000e+00> : vector<2x128xf32>
    %209 = tpu.matmul %208, %28, %cst_34 {dimension_numbers = #tpu.dot_dimension_numbers<[1], [0], [0], [1], [0, 0, 1, 1], [], []>} : vector<2x64xf32>, vector<64x128xf32>, vector<2x128xf32> -> vector<2x128xf32>
    %210 = vector.broadcast %29 : vector<1x128xf32> to vector<2x128xf32>
    %211 = arith.addf %209, %210 : vector<2x128xf32>
    %212 = vector.extract_strided_slice %211 {offsets = [0, 0], sizes = [2, 64], strides = [1, 1]} : vector<2x128xf32> to vector<2x64xf32>
    %213 = arith.negf %212 : vector<2x64xf32>
    %214 = math.exp %213 : vector<2x64xf32>
    %cst_35 = arith.constant 1.000000e+00 : f32
    %215 = vector.broadcast %cst_35 : f32 to vector<2x64xf32>
    %216 = arith.addf %215, %214 : vector<2x64xf32>
    %217 = arith.divf %215, %216 : vector<2x64xf32>
    %218 = vector.extract_strided_slice %217 {offsets = [0, 0], sizes = [2, 32], strides = [1, 1]} : vector<2x64xf32> to vector<2x32xf32>
    %219 = vector.extract_strided_slice %217 {offsets = [0, 32], sizes = [2, 32], strides = [1, 1]} : vector<2x64xf32> to vector<2x32xf32>
    %220 = vector.extract_strided_slice %211 {offsets = [0, 64], sizes = [2, 32], strides = [1, 1]} : vector<2x128xf32> to vector<2x32xf32>
    %221 = vector.extract_strided_slice %211 {offsets = [0, 96], sizes = [2, 32], strides = [1, 1]} : vector<2x128xf32> to vector<2x32xf32>
    %222 = arith.mulf %218, %221 : vector<2x32xf32>
    %223 = arith.addf %220, %222 : vector<2x32xf32>
    %224 = math.tanh %223 : vector<2x32xf32>
    %225 = arith.subf %188, %224 : vector<2x32xf32>
    %226 = arith.mulf %219, %225 : vector<2x32xf32>
    %227 = arith.addf %224, %226 : vector<2x32xf32>
    %cst_36 = arith.constant dense<0.000000e+00> : vector<2x128xf32>
    %228 = tpu.matmul %206, %27, %cst_36 {dimension_numbers = #tpu.dot_dimension_numbers<[1], [0], [0], [1], [0, 0, 1, 1], [], []>} : vector<2x32xf32>, vector<32x128xf32>, vector<2x128xf32> -> vector<2x128xf32>
    %229 = arith.addf %207, %228 : vector<2x128xf32>
    %230 = vector.extract_strided_slice %229 {offsets = [0, 0], sizes = [2, 64], strides = [1, 1]} : vector<2x128xf32> to vector<2x64xf32>
    %231 = arith.negf %230 : vector<2x64xf32>
    %232 = math.exp %231 : vector<2x64xf32>
    %cst_37 = arith.constant 1.000000e+00 : f32
    %233 = vector.broadcast %cst_37 : f32 to vector<2x64xf32>
    %234 = arith.addf %233, %232 : vector<2x64xf32>
    %235 = arith.divf %233, %234 : vector<2x64xf32>
    %236 = vector.extract_strided_slice %235 {offsets = [0, 0], sizes = [2, 32], strides = [1, 1]} : vector<2x64xf32> to vector<2x32xf32>
    %237 = vector.extract_strided_slice %235 {offsets = [0, 32], sizes = [2, 32], strides = [1, 1]} : vector<2x64xf32> to vector<2x32xf32>
    %238 = vector.extract_strided_slice %229 {offsets = [0, 64], sizes = [2, 32], strides = [1, 1]} : vector<2x128xf32> to vector<2x32xf32>
    %239 = vector.extract_strided_slice %229 {offsets = [0, 96], sizes = [2, 32], strides = [1, 1]} : vector<2x128xf32> to vector<2x32xf32>
    %240 = arith.mulf %236, %239 : vector<2x32xf32>
    %241 = arith.addf %238, %240 : vector<2x32xf32>
    %242 = math.tanh %241 : vector<2x32xf32>
    %243 = arith.subf %206, %242 : vector<2x32xf32>
    %244 = arith.mulf %237, %243 : vector<2x32xf32>
    %245 = arith.addf %242, %244 : vector<2x32xf32>
    %246 = vector.extract_strided_slice %26 {offsets = [12, 0], sizes = [2, 128], strides = [1, 1]} : vector<32x128xf32> to vector<2x128xf32>
    %247 = tpu.concatenate %245, %227 in 1 : vector<2x32xf32>, vector<2x32xf32> -> vector<2x64xf32>
    %cst_38 = arith.constant dense<0.000000e+00> : vector<2x128xf32>
    %248 = tpu.matmul %247, %28, %cst_38 {dimension_numbers = #tpu.dot_dimension_numbers<[1], [0], [0], [1], [0, 0, 1, 1], [], []>} : vector<2x64xf32>, vector<64x128xf32>, vector<2x128xf32> -> vector<2x128xf32>
    %249 = vector.broadcast %29 : vector<1x128xf32> to vector<2x128xf32>
    %250 = arith.addf %248, %249 : vector<2x128xf32>
    %251 = vector.extract_strided_slice %250 {offsets = [0, 0], sizes = [2, 64], strides = [1, 1]} : vector<2x128xf32> to vector<2x64xf32>
    %252 = arith.negf %251 : vector<2x64xf32>
    %253 = math.exp %252 : vector<2x64xf32>
    %cst_39 = arith.constant 1.000000e+00 : f32
    %254 = vector.broadcast %cst_39 : f32 to vector<2x64xf32>
    %255 = arith.addf %254, %253 : vector<2x64xf32>
    %256 = arith.divf %254, %255 : vector<2x64xf32>
    %257 = vector.extract_strided_slice %256 {offsets = [0, 0], sizes = [2, 32], strides = [1, 1]} : vector<2x64xf32> to vector<2x32xf32>
    %258 = vector.extract_strided_slice %256 {offsets = [0, 32], sizes = [2, 32], strides = [1, 1]} : vector<2x64xf32> to vector<2x32xf32>
    %259 = vector.extract_strided_slice %250 {offsets = [0, 64], sizes = [2, 32], strides = [1, 1]} : vector<2x128xf32> to vector<2x32xf32>
    %260 = vector.extract_strided_slice %250 {offsets = [0, 96], sizes = [2, 32], strides = [1, 1]} : vector<2x128xf32> to vector<2x32xf32>
    %261 = arith.mulf %257, %260 : vector<2x32xf32>
    %262 = arith.addf %259, %261 : vector<2x32xf32>
    %263 = math.tanh %262 : vector<2x32xf32>
    %264 = arith.subf %227, %263 : vector<2x32xf32>
    %265 = arith.mulf %258, %264 : vector<2x32xf32>
    %266 = arith.addf %263, %265 : vector<2x32xf32>
    %cst_40 = arith.constant dense<0.000000e+00> : vector<2x128xf32>
    %267 = tpu.matmul %245, %27, %cst_40 {dimension_numbers = #tpu.dot_dimension_numbers<[1], [0], [0], [1], [0, 0, 1, 1], [], []>} : vector<2x32xf32>, vector<32x128xf32>, vector<2x128xf32> -> vector<2x128xf32>
    %268 = arith.addf %246, %267 : vector<2x128xf32>
    %269 = vector.extract_strided_slice %268 {offsets = [0, 0], sizes = [2, 64], strides = [1, 1]} : vector<2x128xf32> to vector<2x64xf32>
    %270 = arith.negf %269 : vector<2x64xf32>
    %271 = math.exp %270 : vector<2x64xf32>
    %cst_41 = arith.constant 1.000000e+00 : f32
    %272 = vector.broadcast %cst_41 : f32 to vector<2x64xf32>
    %273 = arith.addf %272, %271 : vector<2x64xf32>
    %274 = arith.divf %272, %273 : vector<2x64xf32>
    %275 = vector.extract_strided_slice %274 {offsets = [0, 0], sizes = [2, 32], strides = [1, 1]} : vector<2x64xf32> to vector<2x32xf32>
    %276 = vector.extract_strided_slice %274 {offsets = [0, 32], sizes = [2, 32], strides = [1, 1]} : vector<2x64xf32> to vector<2x32xf32>
    %277 = vector.extract_strided_slice %268 {offsets = [0, 64], sizes = [2, 32], strides = [1, 1]} : vector<2x128xf32> to vector<2x32xf32>
    %278 = vector.extract_strided_slice %268 {offsets = [0, 96], sizes = [2, 32], strides = [1, 1]} : vector<2x128xf32> to vector<2x32xf32>
    %279 = arith.mulf %275, %278 : vector<2x32xf32>
    %280 = arith.addf %277, %279 : vector<2x32xf32>
    %281 = math.tanh %280 : vector<2x32xf32>
    %282 = arith.subf %245, %281 : vector<2x32xf32>
    %283 = arith.mulf %276, %282 : vector<2x32xf32>
    %284 = arith.addf %281, %283 : vector<2x32xf32>
    %285 = vector.extract_strided_slice %26 {offsets = [14, 0], sizes = [2, 128], strides = [1, 1]} : vector<32x128xf32> to vector<2x128xf32>
    %286 = tpu.concatenate %284, %266 in 1 : vector<2x32xf32>, vector<2x32xf32> -> vector<2x64xf32>
    %cst_42 = arith.constant dense<0.000000e+00> : vector<2x128xf32>
    %287 = tpu.matmul %286, %28, %cst_42 {dimension_numbers = #tpu.dot_dimension_numbers<[1], [0], [0], [1], [0, 0, 1, 1], [], []>} : vector<2x64xf32>, vector<64x128xf32>, vector<2x128xf32> -> vector<2x128xf32>
    %288 = vector.broadcast %29 : vector<1x128xf32> to vector<2x128xf32>
    %289 = arith.addf %287, %288 : vector<2x128xf32>
    %290 = vector.extract_strided_slice %289 {offsets = [0, 0], sizes = [2, 64], strides = [1, 1]} : vector<2x128xf32> to vector<2x64xf32>
    %291 = arith.negf %290 : vector<2x64xf32>
    %292 = math.exp %291 : vector<2x64xf32>
    %cst_43 = arith.constant 1.000000e+00 : f32
    %293 = vector.broadcast %cst_43 : f32 to vector<2x64xf32>
    %294 = arith.addf %293, %292 : vector<2x64xf32>
    %295 = arith.divf %293, %294 : vector<2x64xf32>
    %296 = vector.extract_strided_slice %295 {offsets = [0, 0], sizes = [2, 32], strides = [1, 1]} : vector<2x64xf32> to vector<2x32xf32>
    %297 = vector.extract_strided_slice %295 {offsets = [0, 32], sizes = [2, 32], strides = [1, 1]} : vector<2x64xf32> to vector<2x32xf32>
    %298 = vector.extract_strided_slice %289 {offsets = [0, 64], sizes = [2, 32], strides = [1, 1]} : vector<2x128xf32> to vector<2x32xf32>
    %299 = vector.extract_strided_slice %289 {offsets = [0, 96], sizes = [2, 32], strides = [1, 1]} : vector<2x128xf32> to vector<2x32xf32>
    %300 = arith.mulf %296, %299 : vector<2x32xf32>
    %301 = arith.addf %298, %300 : vector<2x32xf32>
    %302 = math.tanh %301 : vector<2x32xf32>
    %303 = arith.subf %266, %302 : vector<2x32xf32>
    %304 = arith.mulf %297, %303 : vector<2x32xf32>
    %305 = arith.addf %302, %304 : vector<2x32xf32>
    %cst_44 = arith.constant dense<0.000000e+00> : vector<2x128xf32>
    %306 = tpu.matmul %284, %27, %cst_44 {dimension_numbers = #tpu.dot_dimension_numbers<[1], [0], [0], [1], [0, 0, 1, 1], [], []>} : vector<2x32xf32>, vector<32x128xf32>, vector<2x128xf32> -> vector<2x128xf32>
    %307 = arith.addf %285, %306 : vector<2x128xf32>
    %308 = vector.extract_strided_slice %307 {offsets = [0, 0], sizes = [2, 64], strides = [1, 1]} : vector<2x128xf32> to vector<2x64xf32>
    %309 = arith.negf %308 : vector<2x64xf32>
    %310 = math.exp %309 : vector<2x64xf32>
    %cst_45 = arith.constant 1.000000e+00 : f32
    %311 = vector.broadcast %cst_45 : f32 to vector<2x64xf32>
    %312 = arith.addf %311, %310 : vector<2x64xf32>
    %313 = arith.divf %311, %312 : vector<2x64xf32>
    %314 = vector.extract_strided_slice %313 {offsets = [0, 0], sizes = [2, 32], strides = [1, 1]} : vector<2x64xf32> to vector<2x32xf32>
    %315 = vector.extract_strided_slice %313 {offsets = [0, 32], sizes = [2, 32], strides = [1, 1]} : vector<2x64xf32> to vector<2x32xf32>
    %316 = vector.extract_strided_slice %307 {offsets = [0, 64], sizes = [2, 32], strides = [1, 1]} : vector<2x128xf32> to vector<2x32xf32>
    %317 = vector.extract_strided_slice %307 {offsets = [0, 96], sizes = [2, 32], strides = [1, 1]} : vector<2x128xf32> to vector<2x32xf32>
    %318 = arith.mulf %314, %317 : vector<2x32xf32>
    %319 = arith.addf %316, %318 : vector<2x32xf32>
    %320 = math.tanh %319 : vector<2x32xf32>
    %321 = arith.subf %284, %320 : vector<2x32xf32>
    %322 = arith.mulf %315, %321 : vector<2x32xf32>
    %323 = arith.addf %320, %322 : vector<2x32xf32>
    %324 = vector.extract_strided_slice %26 {offsets = [16, 0], sizes = [2, 128], strides = [1, 1]} : vector<32x128xf32> to vector<2x128xf32>
    %325 = tpu.concatenate %323, %305 in 1 : vector<2x32xf32>, vector<2x32xf32> -> vector<2x64xf32>
    %cst_46 = arith.constant dense<0.000000e+00> : vector<2x128xf32>
    %326 = tpu.matmul %325, %28, %cst_46 {dimension_numbers = #tpu.dot_dimension_numbers<[1], [0], [0], [1], [0, 0, 1, 1], [], []>} : vector<2x64xf32>, vector<64x128xf32>, vector<2x128xf32> -> vector<2x128xf32>
    %327 = vector.broadcast %29 : vector<1x128xf32> to vector<2x128xf32>
    %328 = arith.addf %326, %327 : vector<2x128xf32>
    %329 = vector.extract_strided_slice %328 {offsets = [0, 0], sizes = [2, 64], strides = [1, 1]} : vector<2x128xf32> to vector<2x64xf32>
    %330 = arith.negf %329 : vector<2x64xf32>
    %331 = math.exp %330 : vector<2x64xf32>
    %cst_47 = arith.constant 1.000000e+00 : f32
    %332 = vector.broadcast %cst_47 : f32 to vector<2x64xf32>
    %333 = arith.addf %332, %331 : vector<2x64xf32>
    %334 = arith.divf %332, %333 : vector<2x64xf32>
    %335 = vector.extract_strided_slice %334 {offsets = [0, 0], sizes = [2, 32], strides = [1, 1]} : vector<2x64xf32> to vector<2x32xf32>
    %336 = vector.extract_strided_slice %334 {offsets = [0, 32], sizes = [2, 32], strides = [1, 1]} : vector<2x64xf32> to vector<2x32xf32>
    %337 = vector.extract_strided_slice %328 {offsets = [0, 64], sizes = [2, 32], strides = [1, 1]} : vector<2x128xf32> to vector<2x32xf32>
    %338 = vector.extract_strided_slice %328 {offsets = [0, 96], sizes = [2, 32], strides = [1, 1]} : vector<2x128xf32> to vector<2x32xf32>
    %339 = arith.mulf %335, %338 : vector<2x32xf32>
    %340 = arith.addf %337, %339 : vector<2x32xf32>
    %341 = math.tanh %340 : vector<2x32xf32>
    %342 = arith.subf %305, %341 : vector<2x32xf32>
    %343 = arith.mulf %336, %342 : vector<2x32xf32>
    %344 = arith.addf %341, %343 : vector<2x32xf32>
    %cst_48 = arith.constant dense<0.000000e+00> : vector<2x128xf32>
    %345 = tpu.matmul %323, %27, %cst_48 {dimension_numbers = #tpu.dot_dimension_numbers<[1], [0], [0], [1], [0, 0, 1, 1], [], []>} : vector<2x32xf32>, vector<32x128xf32>, vector<2x128xf32> -> vector<2x128xf32>
    %346 = arith.addf %324, %345 : vector<2x128xf32>
    %347 = vector.extract_strided_slice %346 {offsets = [0, 0], sizes = [2, 64], strides = [1, 1]} : vector<2x128xf32> to vector<2x64xf32>
    %348 = arith.negf %347 : vector<2x64xf32>
    %349 = math.exp %348 : vector<2x64xf32>
    %cst_49 = arith.constant 1.000000e+00 : f32
    %350 = vector.broadcast %cst_49 : f32 to vector<2x64xf32>
    %351 = arith.addf %350, %349 : vector<2x64xf32>
    %352 = arith.divf %350, %351 : vector<2x64xf32>
    %353 = vector.extract_strided_slice %352 {offsets = [0, 0], sizes = [2, 32], strides = [1, 1]} : vector<2x64xf32> to vector<2x32xf32>
    %354 = vector.extract_strided_slice %352 {offsets = [0, 32], sizes = [2, 32], strides = [1, 1]} : vector<2x64xf32> to vector<2x32xf32>
    %355 = vector.extract_strided_slice %346 {offsets = [0, 64], sizes = [2, 32], strides = [1, 1]} : vector<2x128xf32> to vector<2x32xf32>
    %356 = vector.extract_strided_slice %346 {offsets = [0, 96], sizes = [2, 32], strides = [1, 1]} : vector<2x128xf32> to vector<2x32xf32>
    %357 = arith.mulf %353, %356 : vector<2x32xf32>
    %358 = arith.addf %355, %357 : vector<2x32xf32>
    %359 = math.tanh %358 : vector<2x32xf32>
    %360 = arith.subf %323, %359 : vector<2x32xf32>
    %361 = arith.mulf %354, %360 : vector<2x32xf32>
    %362 = arith.addf %359, %361 : vector<2x32xf32>
    %363 = vector.extract_strided_slice %26 {offsets = [18, 0], sizes = [2, 128], strides = [1, 1]} : vector<32x128xf32> to vector<2x128xf32>
    %364 = tpu.concatenate %362, %344 in 1 : vector<2x32xf32>, vector<2x32xf32> -> vector<2x64xf32>
    %cst_50 = arith.constant dense<0.000000e+00> : vector<2x128xf32>
    %365 = tpu.matmul %364, %28, %cst_50 {dimension_numbers = #tpu.dot_dimension_numbers<[1], [0], [0], [1], [0, 0, 1, 1], [], []>} : vector<2x64xf32>, vector<64x128xf32>, vector<2x128xf32> -> vector<2x128xf32>
    %366 = vector.broadcast %29 : vector<1x128xf32> to vector<2x128xf32>
    %367 = arith.addf %365, %366 : vector<2x128xf32>
    %368 = vector.extract_strided_slice %367 {offsets = [0, 0], sizes = [2, 64], strides = [1, 1]} : vector<2x128xf32> to vector<2x64xf32>
    %369 = arith.negf %368 : vector<2x64xf32>
    %370 = math.exp %369 : vector<2x64xf32>
    %cst_51 = arith.constant 1.000000e+00 : f32
    %371 = vector.broadcast %cst_51 : f32 to vector<2x64xf32>
    %372 = arith.addf %371, %370 : vector<2x64xf32>
    %373 = arith.divf %371, %372 : vector<2x64xf32>
    %374 = vector.extract_strided_slice %373 {offsets = [0, 0], sizes = [2, 32], strides = [1, 1]} : vector<2x64xf32> to vector<2x32xf32>
    %375 = vector.extract_strided_slice %373 {offsets = [0, 32], sizes = [2, 32], strides = [1, 1]} : vector<2x64xf32> to vector<2x32xf32>
    %376 = vector.extract_strided_slice %367 {offsets = [0, 64], sizes = [2, 32], strides = [1, 1]} : vector<2x128xf32> to vector<2x32xf32>
    %377 = vector.extract_strided_slice %367 {offsets = [0, 96], sizes = [2, 32], strides = [1, 1]} : vector<2x128xf32> to vector<2x32xf32>
    %378 = arith.mulf %374, %377 : vector<2x32xf32>
    %379 = arith.addf %376, %378 : vector<2x32xf32>
    %380 = math.tanh %379 : vector<2x32xf32>
    %381 = arith.subf %344, %380 : vector<2x32xf32>
    %382 = arith.mulf %375, %381 : vector<2x32xf32>
    %383 = arith.addf %380, %382 : vector<2x32xf32>
    %cst_52 = arith.constant dense<0.000000e+00> : vector<2x128xf32>
    %384 = tpu.matmul %362, %27, %cst_52 {dimension_numbers = #tpu.dot_dimension_numbers<[1], [0], [0], [1], [0, 0, 1, 1], [], []>} : vector<2x32xf32>, vector<32x128xf32>, vector<2x128xf32> -> vector<2x128xf32>
    %385 = arith.addf %363, %384 : vector<2x128xf32>
    %386 = vector.extract_strided_slice %385 {offsets = [0, 0], sizes = [2, 64], strides = [1, 1]} : vector<2x128xf32> to vector<2x64xf32>
    %387 = arith.negf %386 : vector<2x64xf32>
    %388 = math.exp %387 : vector<2x64xf32>
    %cst_53 = arith.constant 1.000000e+00 : f32
    %389 = vector.broadcast %cst_53 : f32 to vector<2x64xf32>
    %390 = arith.addf %389, %388 : vector<2x64xf32>
    %391 = arith.divf %389, %390 : vector<2x64xf32>
    %392 = vector.extract_strided_slice %391 {offsets = [0, 0], sizes = [2, 32], strides = [1, 1]} : vector<2x64xf32> to vector<2x32xf32>
    %393 = vector.extract_strided_slice %391 {offsets = [0, 32], sizes = [2, 32], strides = [1, 1]} : vector<2x64xf32> to vector<2x32xf32>
    %394 = vector.extract_strided_slice %385 {offsets = [0, 64], sizes = [2, 32], strides = [1, 1]} : vector<2x128xf32> to vector<2x32xf32>
    %395 = vector.extract_strided_slice %385 {offsets = [0, 96], sizes = [2, 32], strides = [1, 1]} : vector<2x128xf32> to vector<2x32xf32>
    %396 = arith.mulf %392, %395 : vector<2x32xf32>
    %397 = arith.addf %394, %396 : vector<2x32xf32>
    %398 = math.tanh %397 : vector<2x32xf32>
    %399 = arith.subf %362, %398 : vector<2x32xf32>
    %400 = arith.mulf %393, %399 : vector<2x32xf32>
    %401 = arith.addf %398, %400 : vector<2x32xf32>
    %402 = vector.extract_strided_slice %26 {offsets = [20, 0], sizes = [2, 128], strides = [1, 1]} : vector<32x128xf32> to vector<2x128xf32>
    %403 = tpu.concatenate %401, %383 in 1 : vector<2x32xf32>, vector<2x32xf32> -> vector<2x64xf32>
    %cst_54 = arith.constant dense<0.000000e+00> : vector<2x128xf32>
    %404 = tpu.matmul %403, %28, %cst_54 {dimension_numbers = #tpu.dot_dimension_numbers<[1], [0], [0], [1], [0, 0, 1, 1], [], []>} : vector<2x64xf32>, vector<64x128xf32>, vector<2x128xf32> -> vector<2x128xf32>
    %405 = vector.broadcast %29 : vector<1x128xf32> to vector<2x128xf32>
    %406 = arith.addf %404, %405 : vector<2x128xf32>
    %407 = vector.extract_strided_slice %406 {offsets = [0, 0], sizes = [2, 64], strides = [1, 1]} : vector<2x128xf32> to vector<2x64xf32>
    %408 = arith.negf %407 : vector<2x64xf32>
    %409 = math.exp %408 : vector<2x64xf32>
    %cst_55 = arith.constant 1.000000e+00 : f32
    %410 = vector.broadcast %cst_55 : f32 to vector<2x64xf32>
    %411 = arith.addf %410, %409 : vector<2x64xf32>
    %412 = arith.divf %410, %411 : vector<2x64xf32>
    %413 = vector.extract_strided_slice %412 {offsets = [0, 0], sizes = [2, 32], strides = [1, 1]} : vector<2x64xf32> to vector<2x32xf32>
    %414 = vector.extract_strided_slice %412 {offsets = [0, 32], sizes = [2, 32], strides = [1, 1]} : vector<2x64xf32> to vector<2x32xf32>
    %415 = vector.extract_strided_slice %406 {offsets = [0, 64], sizes = [2, 32], strides = [1, 1]} : vector<2x128xf32> to vector<2x32xf32>
    %416 = vector.extract_strided_slice %406 {offsets = [0, 96], sizes = [2, 32], strides = [1, 1]} : vector<2x128xf32> to vector<2x32xf32>
    %417 = arith.mulf %413, %416 : vector<2x32xf32>
    %418 = arith.addf %415, %417 : vector<2x32xf32>
    %419 = math.tanh %418 : vector<2x32xf32>
    %420 = arith.subf %383, %419 : vector<2x32xf32>
    %421 = arith.mulf %414, %420 : vector<2x32xf32>
    %422 = arith.addf %419, %421 : vector<2x32xf32>
    %cst_56 = arith.constant dense<0.000000e+00> : vector<2x128xf32>
    %423 = tpu.matmul %401, %27, %cst_56 {dimension_numbers = #tpu.dot_dimension_numbers<[1], [0], [0], [1], [0, 0, 1, 1], [], []>} : vector<2x32xf32>, vector<32x128xf32>, vector<2x128xf32> -> vector<2x128xf32>
    %424 = arith.addf %402, %423 : vector<2x128xf32>
    %425 = vector.extract_strided_slice %424 {offsets = [0, 0], sizes = [2, 64], strides = [1, 1]} : vector<2x128xf32> to vector<2x64xf32>
    %426 = arith.negf %425 : vector<2x64xf32>
    %427 = math.exp %426 : vector<2x64xf32>
    %cst_57 = arith.constant 1.000000e+00 : f32
    %428 = vector.broadcast %cst_57 : f32 to vector<2x64xf32>
    %429 = arith.addf %428, %427 : vector<2x64xf32>
    %430 = arith.divf %428, %429 : vector<2x64xf32>
    %431 = vector.extract_strided_slice %430 {offsets = [0, 0], sizes = [2, 32], strides = [1, 1]} : vector<2x64xf32> to vector<2x32xf32>
    %432 = vector.extract_strided_slice %430 {offsets = [0, 32], sizes = [2, 32], strides = [1, 1]} : vector<2x64xf32> to vector<2x32xf32>
    %433 = vector.extract_strided_slice %424 {offsets = [0, 64], sizes = [2, 32], strides = [1, 1]} : vector<2x128xf32> to vector<2x32xf32>
    %434 = vector.extract_strided_slice %424 {offsets = [0, 96], sizes = [2, 32], strides = [1, 1]} : vector<2x128xf32> to vector<2x32xf32>
    %435 = arith.mulf %431, %434 : vector<2x32xf32>
    %436 = arith.addf %433, %435 : vector<2x32xf32>
    %437 = math.tanh %436 : vector<2x32xf32>
    %438 = arith.subf %401, %437 : vector<2x32xf32>
    %439 = arith.mulf %432, %438 : vector<2x32xf32>
    %440 = arith.addf %437, %439 : vector<2x32xf32>
    %441 = vector.extract_strided_slice %26 {offsets = [22, 0], sizes = [2, 128], strides = [1, 1]} : vector<32x128xf32> to vector<2x128xf32>
    %442 = tpu.concatenate %440, %422 in 1 : vector<2x32xf32>, vector<2x32xf32> -> vector<2x64xf32>
    %cst_58 = arith.constant dense<0.000000e+00> : vector<2x128xf32>
    %443 = tpu.matmul %442, %28, %cst_58 {dimension_numbers = #tpu.dot_dimension_numbers<[1], [0], [0], [1], [0, 0, 1, 1], [], []>} : vector<2x64xf32>, vector<64x128xf32>, vector<2x128xf32> -> vector<2x128xf32>
    %444 = vector.broadcast %29 : vector<1x128xf32> to vector<2x128xf32>
    %445 = arith.addf %443, %444 : vector<2x128xf32>
    %446 = vector.extract_strided_slice %445 {offsets = [0, 0], sizes = [2, 64], strides = [1, 1]} : vector<2x128xf32> to vector<2x64xf32>
    %447 = arith.negf %446 : vector<2x64xf32>
    %448 = math.exp %447 : vector<2x64xf32>
    %cst_59 = arith.constant 1.000000e+00 : f32
    %449 = vector.broadcast %cst_59 : f32 to vector<2x64xf32>
    %450 = arith.addf %449, %448 : vector<2x64xf32>
    %451 = arith.divf %449, %450 : vector<2x64xf32>
    %452 = vector.extract_strided_slice %451 {offsets = [0, 0], sizes = [2, 32], strides = [1, 1]} : vector<2x64xf32> to vector<2x32xf32>
    %453 = vector.extract_strided_slice %451 {offsets = [0, 32], sizes = [2, 32], strides = [1, 1]} : vector<2x64xf32> to vector<2x32xf32>
    %454 = vector.extract_strided_slice %445 {offsets = [0, 64], sizes = [2, 32], strides = [1, 1]} : vector<2x128xf32> to vector<2x32xf32>
    %455 = vector.extract_strided_slice %445 {offsets = [0, 96], sizes = [2, 32], strides = [1, 1]} : vector<2x128xf32> to vector<2x32xf32>
    %456 = arith.mulf %452, %455 : vector<2x32xf32>
    %457 = arith.addf %454, %456 : vector<2x32xf32>
    %458 = math.tanh %457 : vector<2x32xf32>
    %459 = arith.subf %422, %458 : vector<2x32xf32>
    %460 = arith.mulf %453, %459 : vector<2x32xf32>
    %461 = arith.addf %458, %460 : vector<2x32xf32>
    %cst_60 = arith.constant dense<0.000000e+00> : vector<2x128xf32>
    %462 = tpu.matmul %440, %27, %cst_60 {dimension_numbers = #tpu.dot_dimension_numbers<[1], [0], [0], [1], [0, 0, 1, 1], [], []>} : vector<2x32xf32>, vector<32x128xf32>, vector<2x128xf32> -> vector<2x128xf32>
    %463 = arith.addf %441, %462 : vector<2x128xf32>
    %464 = vector.extract_strided_slice %463 {offsets = [0, 0], sizes = [2, 64], strides = [1, 1]} : vector<2x128xf32> to vector<2x64xf32>
    %465 = arith.negf %464 : vector<2x64xf32>
    %466 = math.exp %465 : vector<2x64xf32>
    %cst_61 = arith.constant 1.000000e+00 : f32
    %467 = vector.broadcast %cst_61 : f32 to vector<2x64xf32>
    %468 = arith.addf %467, %466 : vector<2x64xf32>
    %469 = arith.divf %467, %468 : vector<2x64xf32>
    %470 = vector.extract_strided_slice %469 {offsets = [0, 0], sizes = [2, 32], strides = [1, 1]} : vector<2x64xf32> to vector<2x32xf32>
    %471 = vector.extract_strided_slice %469 {offsets = [0, 32], sizes = [2, 32], strides = [1, 1]} : vector<2x64xf32> to vector<2x32xf32>
    %472 = vector.extract_strided_slice %463 {offsets = [0, 64], sizes = [2, 32], strides = [1, 1]} : vector<2x128xf32> to vector<2x32xf32>
    %473 = vector.extract_strided_slice %463 {offsets = [0, 96], sizes = [2, 32], strides = [1, 1]} : vector<2x128xf32> to vector<2x32xf32>
    %474 = arith.mulf %470, %473 : vector<2x32xf32>
    %475 = arith.addf %472, %474 : vector<2x32xf32>
    %476 = math.tanh %475 : vector<2x32xf32>
    %477 = arith.subf %440, %476 : vector<2x32xf32>
    %478 = arith.mulf %471, %477 : vector<2x32xf32>
    %479 = arith.addf %476, %478 : vector<2x32xf32>
    %480 = vector.extract_strided_slice %26 {offsets = [24, 0], sizes = [2, 128], strides = [1, 1]} : vector<32x128xf32> to vector<2x128xf32>
    %481 = tpu.concatenate %479, %461 in 1 : vector<2x32xf32>, vector<2x32xf32> -> vector<2x64xf32>
    %cst_62 = arith.constant dense<0.000000e+00> : vector<2x128xf32>
    %482 = tpu.matmul %481, %28, %cst_62 {dimension_numbers = #tpu.dot_dimension_numbers<[1], [0], [0], [1], [0, 0, 1, 1], [], []>} : vector<2x64xf32>, vector<64x128xf32>, vector<2x128xf32> -> vector<2x128xf32>
    %483 = vector.broadcast %29 : vector<1x128xf32> to vector<2x128xf32>
    %484 = arith.addf %482, %483 : vector<2x128xf32>
    %485 = vector.extract_strided_slice %484 {offsets = [0, 0], sizes = [2, 64], strides = [1, 1]} : vector<2x128xf32> to vector<2x64xf32>
    %486 = arith.negf %485 : vector<2x64xf32>
    %487 = math.exp %486 : vector<2x64xf32>
    %cst_63 = arith.constant 1.000000e+00 : f32
    %488 = vector.broadcast %cst_63 : f32 to vector<2x64xf32>
    %489 = arith.addf %488, %487 : vector<2x64xf32>
    %490 = arith.divf %488, %489 : vector<2x64xf32>
    %491 = vector.extract_strided_slice %490 {offsets = [0, 0], sizes = [2, 32], strides = [1, 1]} : vector<2x64xf32> to vector<2x32xf32>
    %492 = vector.extract_strided_slice %490 {offsets = [0, 32], sizes = [2, 32], strides = [1, 1]} : vector<2x64xf32> to vector<2x32xf32>
    %493 = vector.extract_strided_slice %484 {offsets = [0, 64], sizes = [2, 32], strides = [1, 1]} : vector<2x128xf32> to vector<2x32xf32>
    %494 = vector.extract_strided_slice %484 {offsets = [0, 96], sizes = [2, 32], strides = [1, 1]} : vector<2x128xf32> to vector<2x32xf32>
    %495 = arith.mulf %491, %494 : vector<2x32xf32>
    %496 = arith.addf %493, %495 : vector<2x32xf32>
    %497 = math.tanh %496 : vector<2x32xf32>
    %498 = arith.subf %461, %497 : vector<2x32xf32>
    %499 = arith.mulf %492, %498 : vector<2x32xf32>
    %500 = arith.addf %497, %499 : vector<2x32xf32>
    %cst_64 = arith.constant dense<0.000000e+00> : vector<2x128xf32>
    %501 = tpu.matmul %479, %27, %cst_64 {dimension_numbers = #tpu.dot_dimension_numbers<[1], [0], [0], [1], [0, 0, 1, 1], [], []>} : vector<2x32xf32>, vector<32x128xf32>, vector<2x128xf32> -> vector<2x128xf32>
    %502 = arith.addf %480, %501 : vector<2x128xf32>
    %503 = vector.extract_strided_slice %502 {offsets = [0, 0], sizes = [2, 64], strides = [1, 1]} : vector<2x128xf32> to vector<2x64xf32>
    %504 = arith.negf %503 : vector<2x64xf32>
    %505 = math.exp %504 : vector<2x64xf32>
    %cst_65 = arith.constant 1.000000e+00 : f32
    %506 = vector.broadcast %cst_65 : f32 to vector<2x64xf32>
    %507 = arith.addf %506, %505 : vector<2x64xf32>
    %508 = arith.divf %506, %507 : vector<2x64xf32>
    %509 = vector.extract_strided_slice %508 {offsets = [0, 0], sizes = [2, 32], strides = [1, 1]} : vector<2x64xf32> to vector<2x32xf32>
    %510 = vector.extract_strided_slice %508 {offsets = [0, 32], sizes = [2, 32], strides = [1, 1]} : vector<2x64xf32> to vector<2x32xf32>
    %511 = vector.extract_strided_slice %502 {offsets = [0, 64], sizes = [2, 32], strides = [1, 1]} : vector<2x128xf32> to vector<2x32xf32>
    %512 = vector.extract_strided_slice %502 {offsets = [0, 96], sizes = [2, 32], strides = [1, 1]} : vector<2x128xf32> to vector<2x32xf32>
    %513 = arith.mulf %509, %512 : vector<2x32xf32>
    %514 = arith.addf %511, %513 : vector<2x32xf32>
    %515 = math.tanh %514 : vector<2x32xf32>
    %516 = arith.subf %479, %515 : vector<2x32xf32>
    %517 = arith.mulf %510, %516 : vector<2x32xf32>
    %518 = arith.addf %515, %517 : vector<2x32xf32>
    %519 = vector.extract_strided_slice %26 {offsets = [26, 0], sizes = [2, 128], strides = [1, 1]} : vector<32x128xf32> to vector<2x128xf32>
    %520 = tpu.concatenate %518, %500 in 1 : vector<2x32xf32>, vector<2x32xf32> -> vector<2x64xf32>
    %cst_66 = arith.constant dense<0.000000e+00> : vector<2x128xf32>
    %521 = tpu.matmul %520, %28, %cst_66 {dimension_numbers = #tpu.dot_dimension_numbers<[1], [0], [0], [1], [0, 0, 1, 1], [], []>} : vector<2x64xf32>, vector<64x128xf32>, vector<2x128xf32> -> vector<2x128xf32>
    %522 = vector.broadcast %29 : vector<1x128xf32> to vector<2x128xf32>
    %523 = arith.addf %521, %522 : vector<2x128xf32>
    %524 = vector.extract_strided_slice %523 {offsets = [0, 0], sizes = [2, 64], strides = [1, 1]} : vector<2x128xf32> to vector<2x64xf32>
    %525 = arith.negf %524 : vector<2x64xf32>
    %526 = math.exp %525 : vector<2x64xf32>
    %cst_67 = arith.constant 1.000000e+00 : f32
    %527 = vector.broadcast %cst_67 : f32 to vector<2x64xf32>
    %528 = arith.addf %527, %526 : vector<2x64xf32>
    %529 = arith.divf %527, %528 : vector<2x64xf32>
    %530 = vector.extract_strided_slice %529 {offsets = [0, 0], sizes = [2, 32], strides = [1, 1]} : vector<2x64xf32> to vector<2x32xf32>
    %531 = vector.extract_strided_slice %529 {offsets = [0, 32], sizes = [2, 32], strides = [1, 1]} : vector<2x64xf32> to vector<2x32xf32>
    %532 = vector.extract_strided_slice %523 {offsets = [0, 64], sizes = [2, 32], strides = [1, 1]} : vector<2x128xf32> to vector<2x32xf32>
    %533 = vector.extract_strided_slice %523 {offsets = [0, 96], sizes = [2, 32], strides = [1, 1]} : vector<2x128xf32> to vector<2x32xf32>
    %534 = arith.mulf %530, %533 : vector<2x32xf32>
    %535 = arith.addf %532, %534 : vector<2x32xf32>
    %536 = math.tanh %535 : vector<2x32xf32>
    %537 = arith.subf %500, %536 : vector<2x32xf32>
    %538 = arith.mulf %531, %537 : vector<2x32xf32>
    %539 = arith.addf %536, %538 : vector<2x32xf32>
    %cst_68 = arith.constant dense<0.000000e+00> : vector<2x128xf32>
    %540 = tpu.matmul %518, %27, %cst_68 {dimension_numbers = #tpu.dot_dimension_numbers<[1], [0], [0], [1], [0, 0, 1, 1], [], []>} : vector<2x32xf32>, vector<32x128xf32>, vector<2x128xf32> -> vector<2x128xf32>
    %541 = arith.addf %519, %540 : vector<2x128xf32>
    %542 = vector.extract_strided_slice %541 {offsets = [0, 0], sizes = [2, 64], strides = [1, 1]} : vector<2x128xf32> to vector<2x64xf32>
    %543 = arith.negf %542 : vector<2x64xf32>
    %544 = math.exp %543 : vector<2x64xf32>
    %cst_69 = arith.constant 1.000000e+00 : f32
    %545 = vector.broadcast %cst_69 : f32 to vector<2x64xf32>
    %546 = arith.addf %545, %544 : vector<2x64xf32>
    %547 = arith.divf %545, %546 : vector<2x64xf32>
    %548 = vector.extract_strided_slice %547 {offsets = [0, 0], sizes = [2, 32], strides = [1, 1]} : vector<2x64xf32> to vector<2x32xf32>
    %549 = vector.extract_strided_slice %547 {offsets = [0, 32], sizes = [2, 32], strides = [1, 1]} : vector<2x64xf32> to vector<2x32xf32>
    %550 = vector.extract_strided_slice %541 {offsets = [0, 64], sizes = [2, 32], strides = [1, 1]} : vector<2x128xf32> to vector<2x32xf32>
    %551 = vector.extract_strided_slice %541 {offsets = [0, 96], sizes = [2, 32], strides = [1, 1]} : vector<2x128xf32> to vector<2x32xf32>
    %552 = arith.mulf %548, %551 : vector<2x32xf32>
    %553 = arith.addf %550, %552 : vector<2x32xf32>
    %554 = math.tanh %553 : vector<2x32xf32>
    %555 = arith.subf %518, %554 : vector<2x32xf32>
    %556 = arith.mulf %549, %555 : vector<2x32xf32>
    %557 = arith.addf %554, %556 : vector<2x32xf32>
    %558 = vector.extract_strided_slice %26 {offsets = [28, 0], sizes = [2, 128], strides = [1, 1]} : vector<32x128xf32> to vector<2x128xf32>
    %559 = tpu.concatenate %557, %539 in 1 : vector<2x32xf32>, vector<2x32xf32> -> vector<2x64xf32>
    %cst_70 = arith.constant dense<0.000000e+00> : vector<2x128xf32>
    %560 = tpu.matmul %559, %28, %cst_70 {dimension_numbers = #tpu.dot_dimension_numbers<[1], [0], [0], [1], [0, 0, 1, 1], [], []>} : vector<2x64xf32>, vector<64x128xf32>, vector<2x128xf32> -> vector<2x128xf32>
    %561 = vector.broadcast %29 : vector<1x128xf32> to vector<2x128xf32>
    %562 = arith.addf %560, %561 : vector<2x128xf32>
    %563 = vector.extract_strided_slice %562 {offsets = [0, 0], sizes = [2, 64], strides = [1, 1]} : vector<2x128xf32> to vector<2x64xf32>
    %564 = arith.negf %563 : vector<2x64xf32>
    %565 = math.exp %564 : vector<2x64xf32>
    %cst_71 = arith.constant 1.000000e+00 : f32
    %566 = vector.broadcast %cst_71 : f32 to vector<2x64xf32>
    %567 = arith.addf %566, %565 : vector<2x64xf32>
    %568 = arith.divf %566, %567 : vector<2x64xf32>
    %569 = vector.extract_strided_slice %568 {offsets = [0, 0], sizes = [2, 32], strides = [1, 1]} : vector<2x64xf32> to vector<2x32xf32>
    %570 = vector.extract_strided_slice %568 {offsets = [0, 32], sizes = [2, 32], strides = [1, 1]} : vector<2x64xf32> to vector<2x32xf32>
    %571 = vector.extract_strided_slice %562 {offsets = [0, 64], sizes = [2, 32], strides = [1, 1]} : vector<2x128xf32> to vector<2x32xf32>
    %572 = vector.extract_strided_slice %562 {offsets = [0, 96], sizes = [2, 32], strides = [1, 1]} : vector<2x128xf32> to vector<2x32xf32>
    %573 = arith.mulf %569, %572 : vector<2x32xf32>
    %574 = arith.addf %571, %573 : vector<2x32xf32>
    %575 = math.tanh %574 : vector<2x32xf32>
    %576 = arith.subf %539, %575 : vector<2x32xf32>
    %577 = arith.mulf %570, %576 : vector<2x32xf32>
    %578 = arith.addf %575, %577 : vector<2x32xf32>
    %cst_72 = arith.constant dense<0.000000e+00> : vector<2x128xf32>
    %579 = tpu.matmul %557, %27, %cst_72 {dimension_numbers = #tpu.dot_dimension_numbers<[1], [0], [0], [1], [0, 0, 1, 1], [], []>} : vector<2x32xf32>, vector<32x128xf32>, vector<2x128xf32> -> vector<2x128xf32>
    %580 = arith.addf %558, %579 : vector<2x128xf32>
    %581 = vector.extract_strided_slice %580 {offsets = [0, 0], sizes = [2, 64], strides = [1, 1]} : vector<2x128xf32> to vector<2x64xf32>
    %582 = arith.negf %581 : vector<2x64xf32>
    %583 = math.exp %582 : vector<2x64xf32>
    %cst_73 = arith.constant 1.000000e+00 : f32
    %584 = vector.broadcast %cst_73 : f32 to vector<2x64xf32>
    %585 = arith.addf %584, %583 : vector<2x64xf32>
    %586 = arith.divf %584, %585 : vector<2x64xf32>
    %587 = vector.extract_strided_slice %586 {offsets = [0, 0], sizes = [2, 32], strides = [1, 1]} : vector<2x64xf32> to vector<2x32xf32>
    %588 = vector.extract_strided_slice %586 {offsets = [0, 32], sizes = [2, 32], strides = [1, 1]} : vector<2x64xf32> to vector<2x32xf32>
    %589 = vector.extract_strided_slice %580 {offsets = [0, 64], sizes = [2, 32], strides = [1, 1]} : vector<2x128xf32> to vector<2x32xf32>
    %590 = vector.extract_strided_slice %580 {offsets = [0, 96], sizes = [2, 32], strides = [1, 1]} : vector<2x128xf32> to vector<2x32xf32>
    %591 = arith.mulf %587, %590 : vector<2x32xf32>
    %592 = arith.addf %589, %591 : vector<2x32xf32>
    %593 = math.tanh %592 : vector<2x32xf32>
    %594 = arith.subf %557, %593 : vector<2x32xf32>
    %595 = arith.mulf %588, %594 : vector<2x32xf32>
    %596 = arith.addf %593, %595 : vector<2x32xf32>
    %597 = vector.extract_strided_slice %26 {offsets = [30, 0], sizes = [2, 128], strides = [1, 1]} : vector<32x128xf32> to vector<2x128xf32>
    %598 = tpu.concatenate %596, %578 in 1 : vector<2x32xf32>, vector<2x32xf32> -> vector<2x64xf32>
    %cst_74 = arith.constant dense<0.000000e+00> : vector<2x128xf32>
    %599 = tpu.matmul %598, %28, %cst_74 {dimension_numbers = #tpu.dot_dimension_numbers<[1], [0], [0], [1], [0, 0, 1, 1], [], []>} : vector<2x64xf32>, vector<64x128xf32>, vector<2x128xf32> -> vector<2x128xf32>
    %600 = vector.broadcast %29 : vector<1x128xf32> to vector<2x128xf32>
    %601 = arith.addf %599, %600 : vector<2x128xf32>
    %602 = vector.extract_strided_slice %601 {offsets = [0, 0], sizes = [2, 64], strides = [1, 1]} : vector<2x128xf32> to vector<2x64xf32>
    %603 = arith.negf %602 : vector<2x64xf32>
    %604 = math.exp %603 : vector<2x64xf32>
    %cst_75 = arith.constant 1.000000e+00 : f32
    %605 = vector.broadcast %cst_75 : f32 to vector<2x64xf32>
    %606 = arith.addf %605, %604 : vector<2x64xf32>
    %607 = arith.divf %605, %606 : vector<2x64xf32>
    %608 = vector.extract_strided_slice %607 {offsets = [0, 0], sizes = [2, 32], strides = [1, 1]} : vector<2x64xf32> to vector<2x32xf32>
    %609 = vector.extract_strided_slice %607 {offsets = [0, 32], sizes = [2, 32], strides = [1, 1]} : vector<2x64xf32> to vector<2x32xf32>
    %610 = vector.extract_strided_slice %601 {offsets = [0, 64], sizes = [2, 32], strides = [1, 1]} : vector<2x128xf32> to vector<2x32xf32>
    %611 = vector.extract_strided_slice %601 {offsets = [0, 96], sizes = [2, 32], strides = [1, 1]} : vector<2x128xf32> to vector<2x32xf32>
    %612 = arith.mulf %608, %611 : vector<2x32xf32>
    %613 = arith.addf %610, %612 : vector<2x32xf32>
    %614 = math.tanh %613 : vector<2x32xf32>
    %615 = arith.subf %578, %614 : vector<2x32xf32>
    %616 = arith.mulf %609, %615 : vector<2x32xf32>
    %617 = arith.addf %614, %616 : vector<2x32xf32>
    %cst_76 = arith.constant dense<0.000000e+00> : vector<2x128xf32>
    %618 = tpu.matmul %596, %27, %cst_76 {dimension_numbers = #tpu.dot_dimension_numbers<[1], [0], [0], [1], [0, 0, 1, 1], [], []>} : vector<2x32xf32>, vector<32x128xf32>, vector<2x128xf32> -> vector<2x128xf32>
    %619 = arith.addf %597, %618 : vector<2x128xf32>
    %620 = vector.extract_strided_slice %619 {offsets = [0, 0], sizes = [2, 64], strides = [1, 1]} : vector<2x128xf32> to vector<2x64xf32>
    %621 = arith.negf %620 : vector<2x64xf32>
    %622 = math.exp %621 : vector<2x64xf32>
    %cst_77 = arith.constant 1.000000e+00 : f32
    %623 = vector.broadcast %cst_77 : f32 to vector<2x64xf32>
    %624 = arith.addf %623, %622 : vector<2x64xf32>
    %625 = arith.divf %623, %624 : vector<2x64xf32>
    %626 = vector.extract_strided_slice %625 {offsets = [0, 0], sizes = [2, 32], strides = [1, 1]} : vector<2x64xf32> to vector<2x32xf32>
    %627 = vector.extract_strided_slice %625 {offsets = [0, 32], sizes = [2, 32], strides = [1, 1]} : vector<2x64xf32> to vector<2x32xf32>
    %628 = vector.extract_strided_slice %619 {offsets = [0, 64], sizes = [2, 32], strides = [1, 1]} : vector<2x128xf32> to vector<2x32xf32>
    %629 = vector.extract_strided_slice %619 {offsets = [0, 96], sizes = [2, 32], strides = [1, 1]} : vector<2x128xf32> to vector<2x32xf32>
    %630 = arith.mulf %626, %629 : vector<2x32xf32>
    %631 = arith.addf %628, %630 : vector<2x32xf32>
    %632 = math.tanh %631 : vector<2x32xf32>
    %633 = arith.subf %596, %632 : vector<2x32xf32>
    %634 = arith.mulf %627, %633 : vector<2x32xf32>
    %635 = arith.addf %632, %634 : vector<2x32xf32>
    %636 = tpu.concatenate %635, %617 in 1 : vector<2x32xf32>, vector<2x32xf32> -> vector<2x64xf32>
    %cst_78 = arith.constant dense<0.000000e+00> : vector<2x128xf32>
    %637 = tpu.matmul %636, %28, %cst_78 {dimension_numbers = #tpu.dot_dimension_numbers<[1], [0], [0], [1], [0, 0, 1, 1], [], []>} : vector<2x64xf32>, vector<64x128xf32>, vector<2x128xf32> -> vector<2x128xf32>
    %638 = vector.broadcast %29 : vector<1x128xf32> to vector<2x128xf32>
    %639 = arith.addf %637, %638 : vector<2x128xf32>
    %640 = vector.extract_strided_slice %639 {offsets = [0, 0], sizes = [2, 64], strides = [1, 1]} : vector<2x128xf32> to vector<2x64xf32>
    %641 = arith.negf %640 : vector<2x64xf32>
    %642 = math.exp %641 : vector<2x64xf32>
    %cst_79 = arith.constant 1.000000e+00 : f32
    %643 = vector.broadcast %cst_79 : f32 to vector<2x64xf32>
    %644 = arith.addf %643, %642 : vector<2x64xf32>
    %645 = arith.divf %643, %644 : vector<2x64xf32>
    %646 = vector.extract_strided_slice %645 {offsets = [0, 0], sizes = [2, 32], strides = [1, 1]} : vector<2x64xf32> to vector<2x32xf32>
    %647 = vector.extract_strided_slice %645 {offsets = [0, 32], sizes = [2, 32], strides = [1, 1]} : vector<2x64xf32> to vector<2x32xf32>
    %648 = vector.extract_strided_slice %639 {offsets = [0, 64], sizes = [2, 32], strides = [1, 1]} : vector<2x128xf32> to vector<2x32xf32>
    %649 = vector.extract_strided_slice %639 {offsets = [0, 96], sizes = [2, 32], strides = [1, 1]} : vector<2x128xf32> to vector<2x32xf32>
    %650 = arith.mulf %646, %649 : vector<2x32xf32>
    %651 = arith.addf %648, %650 : vector<2x32xf32>
    %652 = math.tanh %651 : vector<2x32xf32>
    %653 = arith.subf %617, %652 : vector<2x32xf32>
    %654 = arith.mulf %647, %653 : vector<2x32xf32>
    %655 = arith.addf %652, %654 : vector<2x32xf32>
    %c128 = arith.constant 128 : index
    %c0_80 = arith.constant 0 : index
    %656 = vector.load %arg1[%c128, %c0_80] : memref<168x128xf32, #tpu.memory_space<vmem>>, vector<32x128xf32>
    %c160 = arith.constant 160 : index
    %c0_81 = arith.constant 0 : index
    %657 = vector.load %arg1[%c160, %c0_81] : memref<168x128xf32, #tpu.memory_space<vmem>>, vector<1x128xf32>
    %cst_82 = arith.constant dense<0.000000e+00> : vector<2x128xf32>
    %658 = tpu.matmul %655, %656, %cst_82 {dimension_numbers = #tpu.dot_dimension_numbers<[1], [0], [0], [1], [0, 0, 1, 1], [], []>} : vector<2x32xf32>, vector<32x128xf32>, vector<2x128xf32> -> vector<2x128xf32>
    %659 = vector.broadcast %657 : vector<1x128xf32> to vector<2x128xf32>
    %660 = arith.addf %658, %659 : vector<2x128xf32>
    %661 = vector.extract_strided_slice %660 {offsets = [0, 0], sizes = [2, 3], strides = [1, 1]} : vector<2x128xf32> to vector<2x3xf32>
    %c0_83 = arith.constant 0 : index
    %c0_84 = arith.constant 0 : index
    %662 = vector.load %arg2[%c0_83, %c0_84] : memref<2x3xf32, #tpu.memory_space<vmem>>, vector<2x3xf32>
    tpu.vector_store %arg2[%c0_83, %c0_84], %661 {strides = array<i32>} : memref<2x3xf32, #tpu.memory_space<vmem>>, vector<2x3xf32>,
    return
  }
}

</mosaic_0001>

<bundles_post_ra>
// kernel: gru_forward.1
= control target key start
LH: loop header
LB: loop body
LE: loop exit
PB: predicated region body
PF: predicated region fallthrough
CT: control target
= control target key end

     0   :  { %7 = vsyncpa [#allocation3], 0  ;;  %s3617_s0 = inlined_call_operand.vmem [shape: f32[32,4], index: 0, kind: input, shape index: {}]   ;;  %s3618_s1 = inlined_call_operand.hbm [shape: f32[168,128], index: 1, kind: input, shape index: {}]   ;;  %s3619_s2 = inlined_call_operand.hbm [shape: f32[2,3], index: 2, kind: output, shape index: {}]  }
   0x1   :  { %8 = vsyncpa [#allocation4], 0  ;;  %s15_s11 = sshll.u32 %s3618_s1, 4  ;;  %s2903_s12 = smov [#allocation2]   ;;  %s16_s11 = int_to_ptr.hbm [resolvable:$true] %s15_s11 }
   0x2   :  { %s17_s13 = sshll.u32 %s2903_s12, 4  ;;  %s2904_s14 = smov 128   ;;  %s18_s13 = int_to_ptr.vmem [resolvable:$true] %s17_s13 }
   0x3   :  { %s2905_s15 = smov 8  }
   0x4   :  { %23 = dma.hbm_to_vmem [thread:$0]  %s16_s11, 2688, %s18_s13, [#allocation3], %s2904_s14, %s2904_s14, %s2905_s15  }
   0x5   :  { %2899 = dma.done.wait [#allocation3], 2688  }
   0x6   :  { %2900 = vsyncadd [#allocation3], 4294964608  ;;  %vm108_vm0 = vcmask 1043456   ;;  %vm32_vm1 = vcmask 31744   ;;  %v2929_v0 = vld [vmem:[#allocation2 + $0x28] sm:$0xff]  ;;  %v2931_v1 = vld [vmem:[#allocation2 + $0x20] sm:$0xff] }
   0x7   :  { %v93_v2 = vld [vmem:[#allocation2 + $0x8] sm:$0xf]  ;;  %170 = vmatpush.msra.mxu1 %v2929_v0  ;;  %v2934_v3 = vld [vmem:[#allocation2 + $0x18] sm:$0xff]  ;;  %v28_v4 = vld [vmem:[%s3617_s0] sm:$0xff]  ;;  %305 = vmatpush.msra.mxu3 %v2929_v0  ;;  %v2906_v45 = vmov 0.0   ;;  %s2908_s23 = smov 64  }
   0x8   :  { %2549 = vmatpush.msk.msra.mxu0 %vm108_vm0, %v93_v2  ;;  %v29_v5 = vld [vmem:[%s3617_s0 + $0x8] sm:$0xff]  ;;  %v30_v6 = vld [vmem:[%s3617_s0 + $0x10] sm:$0xff]  ;;  %v31_v7 = vld [vmem:[%s3617_s0 + $0x18] sm:$0xff]  ;;  %v33_v8 = vsel %vm32_vm1, %v28_v4, 0.0  ;;  %s2907_s0 = smov 32   ;;  %s2909_s24 = smov 96  }
   0x9   :  { %v34_v9 = vsel %vm32_vm1, %v29_v5, 0.0  ;;  %171 = vmatpush.msra.mxu1 %v2931_v1  ;;  %v36_v11 = vsel %vm32_vm1, %v30_v6, 0.0  ;;  %v38_v12 = vsel %vm32_vm1, %v31_v7, 0.0  ;;  %306 = vmatpush.msra.mxu3 %v2931_v1  ;;  %v2973_v43 = vld [vmem:[#allocation2 + $0x10] sm:$0xff]  ;;  %v69_v52 = vld [vmem:[#allocation2] sm:$0x1] }
   0xa   :  { %v35_v10 = vadd.f32 %v34_v9, %v33_v8  ;;  %v2983_v57 = vld [vmem:[#allocation2 + $0x1] ss:$0 sm:$0xff]  ;;  %v2988_v60 = vld [vmem:[#allocation2 + $0x30] ss:$0 sm:$0xff]  ;;  %vm154_vm9 = vcmask 261120   ;;  %vm226_vm10 = vcmask 523264  }
   0xb   :  { %172 = vmatpush.msra.mxu1 %v2934_v3  ;;  %307 = vmatpush.msra.mxu3 %v2934_v3  ;;  %s2910_s25 = smov [#allocation5]   ;;  %s2539_s29 = sshll.u32 %s3619_s2, 4  ;;  %s2540_s29 = int_to_ptr.hbm [resolvable:$true] %s2539_s29 }
   0xc   :  { %v37_v13 = vadd.f32 %v36_v11, %v35_v10  ;;  %s2537_s26 = sshll.u32 %s2910_s25, 4  ;;  %s2538_s26 = int_to_ptr.vmem [resolvable:$true] %s2537_s26 }
   0xd   :  { %173 = vmatpush.msra.mxu1 %v2973_v43  ;;  %308 = vmatpush.msra.mxu3 %v2973_v43 }
   0xe   :  { %v39_v14 = vadd.f32 %v38_v12, %v37_v13  ;;  %174 = vmatmul.f32.vlgmr.msra.gmra.mxu1 %v2906_v45 }
   0xf   :  { %454 = vmatpush.msrb.mxu3 %v2929_v0 }
  0x10   :  { %v40_v15 = vrot.slane %v39_v14, 4 }
  0x11   :  { %455 = vmatpush.msrb.mxu3 %v2931_v1 }
  0x12   :  { %v41_v16 = vadd.f32 %v40_v15, %v39_v14 }
  0x13   :  { %456 = vmatpush.msrb.mxu3 %v2934_v3 }
  0x14   :  { %v42_v17 = vrot.slane %v41_v16, 2 }
  0x15   :  { %457 = vmatpush.msrb.mxu3 %v2973_v43 }
  0x16   :  { %v43_v18 = vadd.f32 %v42_v17, %v41_v16 }
  0x18   :  { %v44_v19 = vrot.slane %v43_v18, 1 }
  0x1a   :  { %v45_v20 = vadd.f32 %v44_v19, %v43_v18 }
  0x1c   :  { %v46_v21 = vmul.f32 0.03125, %v45_v20 }
  0x1e   :  { %v47_v22 = vsub.f32 %v28_v4, %v46_v21  ;;  %v2957_v23 = vsub.f32 %v29_v5, %v46_v21  ;;  %v2959_v24 = vsub.f32 %v30_v6, %v46_v21  ;;  %v2961_v25 = vsub.f32 %v31_v7, %v46_v21 }
  0x20   :  { %v51_v26 = vmul.f32 %v47_v22, %v47_v22  ;;  %v52_v27 = vmul.f32 %v2957_v23, %v2957_v23  ;;  %v53_v28 = vmul.f32 %v2959_v24, %v2959_v24  ;;  %v54_v29 = vmul.f32 %v2961_v25, %v2961_v25 }
  0x22   :  { %v55_v30 = vsel %vm32_vm1, %v51_v26, 0.0  ;;  %v56_v31 = vsel %vm32_vm1, %v52_v27, 0.0  ;;  %v58_v32 = vsel %vm32_vm1, %v53_v28, 0.0  ;;  %v60_v34 = vsel %vm32_vm1, %v54_v29, 0.0  ;;  %v2998_v28 = vld [vmem:[#allocation2 + $0x70] sm:$0xff]  ;;  %v3000_v29 = vld [vmem:[#allocation2 + $0x68] sm:$0xff] }
  0x23   :  { %v57_v33 = vadd.f32 %v56_v31, %v55_v30  ;;  %238 = vmatpush.msra.mxu2 %v2998_v28  ;;  %384 = vmatpush.msrb.mxu1 %v2998_v28  ;;  %v3004_v30 = vld [vmem:[#allocation2 + $0x60] sm:$0xff]  ;;  %v3009_v31 = vld [vmem:[#allocation2 + $0x58] sm:$0xff] }
  0x24   :  { %682 = vmatpush.msrb.mxu0 %v2998_v28 }
  0x25   :  { %v59_v35 = vadd.f32 %v58_v32, %v57_v33  ;;  %239 = vmatpush.msra.mxu2 %v3000_v29  ;;  %385 = vmatpush.msrb.mxu1 %v3000_v29  ;;  %v3014_v32 = vld [vmem:[#allocation2 + $0x50] sm:$0xff]  ;;  %v3019_v33 = vld [vmem:[#allocation2 + $0x48] sm:$0xff] }
  0x26   :  { %683 = vmatpush.msrb.mxu0 %v3000_v29 }
  0x27   :  { %v61_v36 = vadd.f32 %v60_v34, %v59_v35  ;;  %240 = vmatpush.msra.mxu2 %v3004_v30  ;;  %386 = vmatpush.msrb.mxu1 %v3004_v30  ;;  %v3024_v34 = vld [vmem:[#allocation2 + $0x40] sm:$0xff] }
  0x28   :  { %684 = vmatpush.msrb.mxu0 %v3004_v30 }
  0x29   :  { %v62_v37 = vrot.slane %v61_v36, 4  ;;  %241 = vmatpush.msra.mxu2 %v3009_v31  ;;  %387 = vmatpush.msrb.mxu1 %v3009_v31 }
  0x2a   :  { %685 = vmatpush.msrb.mxu0 %v3009_v31 }
  0x2b   :  { %v63_v38 = vadd.f32 %v62_v37, %v61_v36  ;;  %242 = vmatpush.msra.mxu2 %v3014_v32  ;;  %388 = vmatpush.msrb.mxu1 %v3014_v32  ;;  %v3037_v37 = vld [vmem:[#allocation2 + $0x38] sm:$0xff] }
  0x2c   :  { %686 = vmatpush.msrb.mxu0 %v3014_v32 }
  0x2d   :  { %v64_v39 = vrot.slane %v63_v38, 2  ;;  %243 = vmatpush.msra.mxu2 %v3019_v33  ;;  %389 = vmatpush.msrb.mxu1 %v3019_v33 }
  0x2e   :  { %687 = vmatpush.msrb.mxu0 %v3019_v33 }
  0x2f   :  { %v65_v40 = vadd.f32 %v64_v39, %v63_v38  ;;  %244 = vmatpush.msra.mxu2 %v3024_v34  ;;  %390 = vmatpush.msrb.mxu1 %v3024_v34 }
  0x30   :  { %688 = vmatpush.msrb.mxu0 %v3024_v34 }
  0x31   :  { %v66_v41 = vrot.slane %v65_v40, 1  ;;  %245 = vmatpush.msra.mxu2 %v3037_v37  ;;  %391 = vmatpush.msrb.mxu1 %v3037_v37 }
  0x32   :  { %689 = vmatpush.msrb.mxu0 %v3037_v37 }
  0x33   :  { %v67_v42 = vadd.f32 %v66_v41, %v65_v40  ;;  %533 = vmatpush.msrb.mxu2 %v2998_v28  ;;  %752 = vmatpush.msra.mxu1 %v2929_v0  ;;  %v3077_v40 = vld [vmem:[#allocation2 + $0x78] ss:$0 sm:$0xff] }
  0x35   :  { %v68_v44 = vmul.f32 0.03125, %v67_v42  ;;  %534 = vmatpush.msrb.mxu2 %v3000_v29  ;;  %753 = vmatpush.msra.mxu1 %v2931_v1 }
  0x37   :  { %v71_v46 = vadd.f32 1e-05, %v68_v44  ;;  %535 = vmatpush.msrb.mxu2 %v3004_v30  ;;  %754 = vmatpush.msra.mxu1 %v2934_v3 }
  0x39   :  { %2630 = vrsqrt.f32 %v71_v46  ;;  %vm78_vm2 = vweird.f32 %v71_v46  ;;  %536 = vmatpush.msrb.mxu2 %v3009_v31  ;;  %755 = vmatpush.msra.mxu1 %v2973_v43 }
  0x3b   :  { %537 = vmatpush.msrb.mxu2 %v3014_v32 }
  0x3d   :  { %538 = vmatpush.msrb.mxu2 %v3019_v33 }
  0x3f   :  { %v2631_v47 = vpop.eup %2630  ;;  %539 = vmatpush.msrb.mxu2 %v3024_v34 }
  0x40   :  { %v73_v48 = vmul.f32 %v2631_v47, %v71_v46  ;;  %vm79_vm3 = vweird.f32 %v2631_v47 }
  0x41   :  { %vm80_vm4 = vmor %vm78_vm2, %vm79_vm3  ;;  %540 = vmatpush.msrb.mxu2 %v3037_v37 }
  0x42   :  { %v74_v49 = vmul.f32 %v2631_v47, %v73_v48 }
  0x44   :  { %v75_v50 = vmul.f32 0.5, %v74_v49 }
  0x46   :  { %v76_v51 = vsub.f32 1.5, %v75_v50 }
  0x48   :  { %v77_v53 = vmul.f32 %v2631_v47, %v76_v51 }
  0x4a   :  { %v81_v54 = vsel %vm80_vm4, %v2631_v47, %v77_v53 }
  0x4b   :  { %v82_v55 = vmul.f32 %v81_v54, %v69_v52 }
  0x4d   :  { %v2981_v56 = vperm.slane %v82_v55, 0 }
  0x4f   :  { %v84_v58 = vmul.f32 %v2981_v56, %v47_v22 }
  0x51   :  { %v89_v59 = vadd.f32 %v2983_v57, %v84_v58 }
  0x53   :  { %2550 = vmatmul.msk.f32.vlgmr.msra.gmra.mxu0 %vm32_vm1, %v89_v59 }
  0x54   :  { %1270 = vmatpush.msra.mxu0 %v2998_v28 }
  0x56   :  { %1271 = vmatpush.msra.mxu0 %v3000_v29 }
  0x58   :  { %1272 = vmatpush.msra.mxu0 %v3004_v30 }
  0x5a   :  { %1273 = vmatpush.msra.mxu0 %v3009_v31 }
  0x5c   :  { %1274 = vmatpush.msra.mxu0 %v3014_v32 }
  0x5e   :  { %1275 = vmatpush.msra.mxu0 %v3019_v33 }
  0x60   :  { %1276 = vmatpush.msra.mxu0 %v3024_v34 }
  0x62   :  { %1277 = vmatpush.msra.mxu0 %v3037_v37 }
  0x8b   :  { %v175_v62 = vpop.f32.mrf.mxu1 }
  0xd0   :  { %v129_v61 = vpop.f32.mrf.mxu0 }
  0xd1   :  { %v2991_v63 = vadd.f32 %v2988_v60, %v129_v61 }
  0xd3   :  { %v178_v2 = vadd.f32 %v175_v62, %v2991_v63 }
  0xd5   :  { %199 = vrot.lane.b32.xlu0 %v178_v2, %s2907_s0  ;;  %v2554_v4 = vmul.f32 -1.442695, %v178_v2 }
  0xd7   :  { %2632 = vpow2.f32 %v2554_v4 }
  0xdd   :  { %v2633_v5 = vpop.eup %2632 }
  0xde   :  { %v182_v6 = vadd.f32 1.0, %v2633_v5 }
  0xe0   :  { %2634 = vrcp.f32 %v182_v6  ;;  %v194_v12 = vand.u32 2147483648, %v182_v6  ;;  %vm188_vm6 = vweird.f32 %v182_v6  ;;  %v192_v13 = vand.u32 2147483647, %v182_v6 }
  0xe2   :  { %v195_v15 = vor.u32 1.1754944e-38, %v194_v12  ;;  %vm193_vm8 = vcmp.eq.f32.partialorder %v192_v13, 8.507059e+37 }
  0xe6   :  { %v2635_v7 = vpop.eup %2634 }
  0xe7   :  { %v184_v8 = vmul.f32 %v2635_v7, %v182_v6  ;;  %vm189_vm5 = vweird.f32 %v2635_v7 }
  0xe8   :  { %vm190_vm7 = vmor %vm188_vm6, %vm189_vm5 }
  0xe9   :  { %v185_v9 = vsub.f32 1.0, %v184_v8 }
  0xeb   :  { %v186_v10 = vmul.f32 %v2635_v7, %v185_v9 }
  0xed   :  { %v187_v11 = vadd.f32 %v2635_v7, %v186_v10 }
  0xef   :  { %v191_v14 = vsel %vm190_vm7, %v2635_v7, %v187_v11 }
  0xf0   :  { %v196_v17 = vsel %vm193_vm8, %v195_v15, %v191_v14 }
 0x147   :  { %v200_v16 = vpop.permute.xlu0 %199 }
 0x148   :  { %v202_v18 = vmul.f32 %v200_v16, %v196_v17 }
 0x14a   :  { %204 = vrot.lane.b32.xlu0 %v202_v18, %s2908_s23 }
 0x1bc   :  { %v205_v19 = vpop.permute.xlu0 %204 }
 0x1bd   :  { %v207_v20 = vadd.f32 %v205_v19, %v178_v2 }
 0x1bf   :  { %2636 = vtanh.f32 %v207_v20 }
 0x1c5   :  { %v2637_v21 = vpop.eup %2636 }
 0x1c6   :  { %v209_v22 = vsub.f32 0.0, %v2637_v21 }
 0x1c8   :  { %211 = vrot.lane.b32.xlu1 %v209_v22, %s2909_s24 }
 0x23a   :  { %v212_v26 = vpop.permute.xlu1 %211 }
 0x23b   :  { %v214_v27 = vmul.f32 %v212_v26, %v196_v17 }
 0x23d   :  { %216 = vrot.lane.b32.xlu1 %v214_v27, %s2907_s0 }
 0x2af   :  { %v217_v35 = vpop.permute.xlu1 %216 }
 0x2b0   :  { %v3033_v36 = vadd.f32 %v2637_v21, %v217_v35 }
 0x2b2   :  { %221 = vrot.lane.b32.xlu2 %v3033_v36, %s2908_s23 }
 0x30c   :  { %v222_v38 = vpop.permute.xlu2 %221 }
 0x30d   :  { %2557 = vmatmul.msk.f32.vlgmr.msra.gmra.mxu3 %vm154_vm9, %v222_v38  ;;  %v224_v39 = vsel %vm154_vm9, %v222_v38, 0.0 }
 0x30e   :  { %2555 = vmatmul.msk.f32.vlgmr.msra.gmra.mxu2 %vm226_vm10, %v224_v39  ;;  %603 = vmatpush.msra.mxu3 %v2929_v0 }
 0x30f   :  { %972 = vmatpush.msra.mxu2 %v2998_v28 }
 0x310   :  { %604 = vmatpush.msra.mxu3 %v2931_v1 }
 0x311   :  { %973 = vmatpush.msra.mxu2 %v3000_v29 }
 0x312   :  { %605 = vmatpush.msra.mxu3 %v2934_v3 }
 0x313   :  { %974 = vmatpush.msra.mxu2 %v3004_v30 }
 0x314   :  { %606 = vmatpush.msra.mxu3 %v2973_v43 }
 0x315   :  { %975 = vmatpush.msra.mxu2 %v3009_v31 }
 0x317   :  { %976 = vmatpush.msra.mxu2 %v3014_v32 }
 0x319   :  { %977 = vmatpush.msra.mxu2 %v3019_v33 }
 0x31b   :  { %978 = vmatpush.msra.mxu2 %v3024_v34 }
 0x31d   :  { %979 = vmatpush.msra.mxu2 %v3037_v37 }
 0x390   :  { %v310_v41 = vpop.f32.mrf.mxu3 }
 0x391   :  { %v314_v42 = vrot.slane %v310_v41, 6  ;;  %v247_v44 = vpop.f32.mrf.mxu2 }
 0x392   :  { %v248_v45 = vadd.f32 %v3077_v40, %v247_v44 }
 0x393   :  { %v316_v46 = vadd.f32 %v314_v42, %v2991_v63 }
 0x394   :  { %270 = vrot.lane.b32.xlu1 %v248_v45, %s2907_s0  ;;  %v2556_v51 = vmul.f32 -1.442695, %v248_v45 }
 0x395   :  { %337 = vrot.lane.b32.xlu2 %v316_v46, %s2907_s0  ;;  %v2558_v47 = vmul.f32 -1.442695, %v316_v46 }
 0x397   :  { %2638 = vpow2.f32 %v2558_v47 }
 0x39d   :  { %v2639_v48 = vpop.eup %2638 }
 0x39e   :  { %v320_v49 = vadd.f32 1.0, %v2639_v48 }
 0x3a0   :  { %2640 = vrcp.f32 %v320_v49  ;;  %v332_v61 = vand.u32 2147483648, %v320_v49  ;;  %vm326_vm12 = vweird.f32 %v320_v49  ;;  %v330_v62 = vand.u32 2147483647, %v320_v49 }
 0x3a1   :  { %2642 = vpow2.f32 %v2556_v51 }
 0x3a2   :  { %v333_v4 = vor.u32 1.1754944e-38, %v332_v61  ;;  %vm331_vm14 = vcmp.eq.f32.partialorder %v330_v62, 8.507059e+37 }
 0x3a6   :  { %v2641_v50 = vpop.eup %2640 }
 0x3a7   :  { %v322_v52 = vmul.f32 %v2641_v50, %v320_v49  ;;  %v2643_v54 = vpop.eup %2642  ;;  %vm327_vm11 = vweird.f32 %v2641_v50 }
 0x3a8   :  { %v253_v58 = vadd.f32 1.0, %v2643_v54  ;;  %vm328_vm13 = vmor %vm326_vm12, %vm327_vm11 }
 0x3a9   :  { %v323_v53 = vsub.f32 1.0, %v322_v52 }
 0x3aa   :  { %2644 = vrcp.f32 %v253_v58  ;;  %v265_v13 = vand.u32 2147483648, %v253_v58  ;;  %vm259_vm0 = vweird.f32 %v253_v58  ;;  %v263_v14 = vand.u32 2147483647, %v253_v58 }
 0x3ab   :  { %v324_v55 = vmul.f32 %v2641_v50, %v323_v53 }
 0x3ac   :  { %v266_v16 = vor.u32 1.1754944e-38, %v265_v13  ;;  %vm264_vm3 = vcmp.eq.f32.partialorder %v263_v14, 8.507059e+37 }
 0x3ad   :  { %v325_v59 = vadd.f32 %v2641_v50, %v324_v55 }
 0x3af   :  { %v329_v2 = vsel %vm328_vm13, %v2641_v50, %v325_v59 }
 0x3b0   :  { %v334_v6 = vsel %vm331_vm14, %v333_v4, %v329_v2  ;;  %v2645_v7 = vpop.eup %2644 }
 0x3b1   :  { %v255_v9 = vmul.f32 %v2645_v7, %v253_v58  ;;  %vm260_vm15 = vweird.f32 %v2645_v7 }
 0x3b2   :  { %vm261_vm2 = vmor %vm259_vm0, %vm260_vm15 }
 0x3b3   :  { %v256_v10 = vsub.f32 1.0, %v255_v9 }
 0x3b5   :  { %v257_v11 = vmul.f32 %v2645_v7, %v256_v10 }
 0x3b7   :  { %v258_v12 = vadd.f32 %v2645_v7, %v257_v11 }
 0x3b9   :  { %v262_v15 = vsel %vm261_vm2, %v2645_v7, %v258_v12 }
 0x3ba   :  { %v267_v18 = vsel %vm264_vm3, %v266_v16, %v262_v15 }
 0x3ef   :  { %v338_v5 = vpop.permute.xlu2 %337 }
 0x3f0   :  { %v340_v8 = vmul.f32 %v338_v5, %v334_v6 }
 0x3f2   :  { %342 = vrot.lane.b32.xlu0 %v340_v8, %s2908_s23 }
 0x406   :  { %v271_v17 = vpop.permute.xlu1 %270 }
 0x407   :  { %v273_v19 = vmul.f32 %v271_v17, %v267_v18 }
 0x409   :  { %275 = vrot.lane.b32.xlu2 %v273_v19, %s2908_s23 }
 0x463   :  { %v276_v20 = vpop.permute.xlu2 %275 }
 0x464   :  { %v278_v21 = vadd.f32 %v276_v20, %v248_v45  ;;  %v343_v22 = vpop.permute.xlu0 %342 }
 0x465   :  { %v345_v26 = vadd.f32 %v343_v22, %v316_v46 }
 0x466   :  { %2646 = vtanh.f32 %v278_v21 }
 0x467   :  { %2648 = vtanh.f32 %v345_v26 }
 0x46c   :  { %v2647_v27 = vpop.eup %2646 }
 0x46d   :  { %v2649_v35 = vpop.eup %2648  ;;  %v280_v38 = vsub.f32 0.0, %v2647_v27 }
 0x46e   :  { %v348_v39 = vrot.slane %v2649_v35, 2 }
 0x46f   :  { %282 = vrot.lane.b32.xlu2 %v280_v38, %s2909_s24 }
 0x470   :  { %v350_v41 = vsub.f32 %v3033_v36, %v348_v39 }
 0x472   :  { %v352_v42 = vrot.slane %v350_v41, 6 }
 0x474   :  { %353 = vrot.lane.b32.xlu0 %v352_v42, %s2909_s24 }
 0x4c9   :  { %v283_v45 = vpop.permute.xlu2 %282 }
 0x4ca   :  { %v285_v48 = vmul.f32 %v283_v45, %v267_v18 }
 0x4e6   :  { %v354_v44 = vpop.permute.xlu0 %353 }
 0x4e7   :  { %v356_v47 = vmul.f32 %v354_v44, %v334_v6 }
 0x4e9   :  { %358 = vrot.lane.b32.xlu1 %v356_v47, %s2907_s0 }
 0x4f1   :  { %287 = vrot.lane.b32.xlu1 %v285_v48, %s2907_s0 }
 0x55b   :  { %v359_v46 = vpop.permute.xlu1 %358 }
 0x55c   :  { %v3090_v49 = vadd.f32 %v2649_v35, %v359_v46 }
 0x55e   :  { %363 = vrot.lane.b32.xlu2 %v3090_v49, %s2908_s23  ;;  %v437_v50 = vrot.slane %v3090_v49, 2 }
 0x560   :  { %438 = vrot.lane.b32.xlu0 %v437_v50, %s2908_s23 }
 0x563   :  { %v288_v36 = vpop.permute.xlu1 %287 }
 0x564   :  { %v3096_v51 = vadd.f32 %v2647_v27, %v288_v36 }
 0x566   :  { %v367_v52 = vrot.slane %v3096_v51, 6 }
 0x568   :  { %368 = vrot.lane.b32.xlu0 %v367_v52, %s2909_s24 }
 0x5b8   :  { %v364_v54 = vpop.permute.xlu2 %363 }
 0x5d2   :  { %v439_v53 = vpop.permute.xlu0 %438 }
 0x5d3   :  { %2561 = vmatmul.msk.f32.vlgmr.msrb.gmra.mxu3 %vm154_vm9, %v439_v53 }
 0x5d4   :  { %826 = vmatpush.msrb.mxu3 %v2998_v28 }
 0x5d6   :  { %827 = vmatpush.msrb.mxu3 %v3000_v29 }
 0x5d8   :  { %828 = vmatpush.msrb.mxu3 %v3004_v30 }
 0x5da   :  { %v369_v55 = vpop.permute.xlu0 %368  ;;  %829 = vmatpush.msrb.mxu3 %v3009_v31 }
 0x5db   :  { %v371_v58 = vsel %vm154_vm9, %v364_v54, %v369_v55 }
 0x5dc   :  { %v373_v59 = vrot.slane %v371_v58, 2  ;;  %830 = vmatpush.msrb.mxu3 %v3014_v32 }
 0x5de   :  { %2559 = vmatmul.msk.f32.vlgmr.msrb.gmra.mxu1 %vm226_vm10, %v373_v59  ;;  %831 = vmatpush.msrb.mxu3 %v3019_v33 }
 0x5df   :  { %893 = vmatpush.msrb.mxu1 %v2929_v0 }
 0x5e0   :  { %832 = vmatpush.msrb.mxu3 %v3024_v34 }
 0x5e1   :  { %894 = vmatpush.msrb.mxu1 %v2931_v1 }
 0x5e2   :  { %833 = vmatpush.msrb.mxu3 %v3037_v37 }
 0x5e3   :  { %895 = vmatpush.msrb.mxu1 %v2934_v3 }
 0x5e5   :  { %896 = vmatpush.msrb.mxu1 %v2973_v43 }
 0x656   :  { %v459_v61 = vpop.f32.mrf.mxu3 }
 0x657   :  { %v463_v62 = vrot.slane %v459_v61, 4 }
 0x659   :  { %v465_v2 = vadd.f32 %v463_v62, %v2991_v63 }
 0x65b   :  { %486 = vrot.lane.b32.xlu1 %v465_v2, %s2907_s0  ;;  %v393_v4 = vpop.f32.mrf.mxu1  ;;  %v2562_v9 = vmul.f32 -1.442695, %v465_v2 }
 0x65c   :  { %v394_v5 = vadd.f32 %v3077_v40, %v393_v4 }
 0x65e   :  { %416 = vrot.lane.b32.xlu2 %v394_v5, %s2907_s0  ;;  %v2560_v6 = vmul.f32 -1.442695, %v394_v5 }
 0x660   :  { %2650 = vpow2.f32 %v2560_v6 }
 0x666   :  { %v2651_v7 = vpop.eup %2650 }
 0x667   :  { %v399_v8 = vadd.f32 1.0, %v2651_v7 }
 0x669   :  { %2652 = vrcp.f32 %v399_v8  ;;  %v411_v17 = vand.u32 2147483648, %v399_v8  ;;  %vm405_vm5 = vweird.f32 %v399_v8  ;;  %v409_v18 = vand.u32 2147483647, %v399_v8 }
 0x66a   :  { %2654 = vpow2.f32 %v2562_v9 }
 0x66b   :  { %v412_v20 = vor.u32 1.1754944e-38, %v411_v17  ;;  %vm410_vm7 = vcmp.eq.f32.partialorder %v409_v18, 8.507059e+37 }
 0x66f   :  { %v2653_v10 = vpop.eup %2652 }
 0x670   :  { %v401_v11 = vmul.f32 %v2653_v10, %v399_v8  ;;  %v2655_v13 = vpop.eup %2654  ;;  %vm406_vm4 = vweird.f32 %v2653_v10 }
 0x671   :  { %v469_v14 = vadd.f32 1.0, %v2655_v13  ;;  %vm407_vm6 = vmor %vm405_vm5, %vm406_vm4 }
 0x672   :  { %v402_v12 = vsub.f32 1.0, %v401_v11 }
 0x673   :  { %2656 = vrcp.f32 %v469_v14  ;;  %v481_v42 = vand.u32 2147483648, %v469_v14  ;;  %vm475_vm11 = vweird.f32 %v469_v14  ;;  %v479_v44 = vand.u32 2147483647, %v469_v14 }
 0x674   :  { %v403_v15 = vmul.f32 %v2653_v10, %v402_v12 }
 0x675   :  { %v482_v45 = vor.u32 1.1754944e-38, %v481_v42  ;;  %vm480_vm13 = vcmp.eq.f32.partialorder %v479_v44, 8.507059e+37 }
 0x676   :  { %v404_v16 = vadd.f32 %v2653_v10, %v403_v15 }
 0x678   :  { %v408_v19 = vsel %vm407_vm6, %v2653_v10, %v404_v16 }
 0x679   :  { %v2657_v21 = vpop.eup %2656  ;;  %v413_v26 = vsel %vm410_vm7, %v412_v20, %v408_v19 }
 0x67a   :  { %v471_v35 = vmul.f32 %v2657_v21, %v469_v14  ;;  %vm476_vm8 = vweird.f32 %v2657_v21 }
 0x67b   :  { %vm477_vm12 = vmor %vm475_vm11, %vm476_vm8 }
 0x67c   :  { %v472_v38 = vsub.f32 1.0, %v471_v35 }
 0x67e   :  { %v473_v39 = vmul.f32 %v2657_v21, %v472_v38 }
 0x680   :  { %v474_v41 = vadd.f32 %v2657_v21, %v473_v39 }
 0x682   :  { %v478_v47 = vsel %vm477_vm12, %v2657_v21, %v474_v41 }
 0x683   :  { %v483_v48 = vsel %vm480_vm13, %v482_v45, %v478_v47 }
 0x6b8   :  { %v417_v22 = vpop.permute.xlu2 %416 }
 0x6b9   :  { %v419_v27 = vmul.f32 %v417_v22, %v413_v26 }
 0x6bb   :  { %421 = vrot.lane.b32.xlu1 %v419_v27, %s2908_s23 }
 0x6cd   :  { %v487_v46 = vpop.permute.xlu1 %486 }
 0x6ce   :  { %v489_v50 = vmul.f32 %v487_v46, %v483_v48 }
 0x6d0   :  { %491 = vrot.lane.b32.xlu0 %v489_v50, %s2908_s23 }
 0x72d   :  { %v422_v36 = vpop.permute.xlu1 %421 }
 0x72e   :  { %v424_v52 = vadd.f32 %v422_v36, %v394_v5 }
 0x730   :  { %2658 = vtanh.f32 %v424_v52 }
 0x736   :  { %v2659_v53 = vpop.eup %2658 }
 0x737   :  { %v426_v54 = vsub.f32 %v3096_v51, %v2659_v53 }
 0x739   :  { %428 = vrot.lane.b32.xlu0 %v426_v54, %s2909_s24 }
 0x742   :  { %v492_v55 = vpop.permute.xlu0 %491 }
 0x743   :  { %v494_v58 = vadd.f32 %v492_v55, %v465_v2 }
 0x745   :  { %2660 = vtanh.f32 %v494_v58 }
 0x74b   :  { %v2661_v59 = vpop.eup %2660 }
 0x74c   :  { %v497_v61 = vrot.slane %v2661_v59, 2 }
 0x74e   :  { %v499_v62 = vsub.f32 %v3090_v49, %v497_v61 }
 0x750   :  { %v501_v4 = vrot.slane %v499_v62, 6 }
 0x752   :  { %502 = vrot.lane.b32.xlu2 %v501_v4, %s2909_s24 }
 0x7ab   :  { %v429_v6 = vpop.permute.xlu0 %428 }
 0x7ac   :  { %v431_v7 = vmul.f32 %v429_v6, %v413_v26  ;;  %v503_v8 = vpop.permute.xlu2 %502 }
 0x7ad   :  { %v505_v5 = vmul.f32 %v503_v8, %v483_v48 }
 0x7ae   :  { %433 = vrot.lane.b32.xlu2 %v431_v7, %s2907_s0 }
 0x7af   :  { %507 = vrot.lane.b32.xlu1 %v505_v5, %s2907_s0 }
 0x808   :  { %v434_v51 = vpop.permute.xlu2 %433 }
 0x809   :  { %v3127_v9 = vadd.f32 %v2659_v53, %v434_v51 }
 0x80b   :  { %v516_v2 = vrot.slane %v3127_v9, 4 }
 0x80d   :  { %517 = vrot.lane.b32.xlu2 %v516_v2, %s2909_s24 }
 0x821   :  { %v508_v10 = vpop.permute.xlu1 %507 }
 0x822   :  { %v3131_v49 = vadd.f32 %v2661_v59, %v508_v10 }
 0x824   :  { %512 = vrot.lane.b32.xlu1 %v3131_v49, %s2908_s23  ;;  %v586_v11 = vrot.slane %v3131_v49, 4 }
 0x826   :  { %587 = vrot.lane.b32.xlu0 %v586_v11, %s2908_s23 }
 0x867   :  { %v518_v12 = vpop.permute.xlu2 %517 }
 0x896   :  { %v513_v13 = vpop.permute.xlu1 %512 }
 0x897   :  { %v520_v14 = vsel %vm154_vm9, %v513_v13, %v518_v12 }
 0x898   :  { %v522_v15 = vrot.slane %v520_v14, 4  ;;  %v588_v16 = vpop.permute.xlu0 %587 }
 0x899   :  { %2565 = vmatmul.msk.f32.vlgmr.msra.gmra.mxu3 %vm154_vm9, %v588_v16 }
 0x89a   :  { %2563 = vmatmul.msk.f32.vlgmr.msrb.gmra.mxu2 %vm226_vm10, %v522_v15  ;;  %1042 = vmatpush.msra.mxu3 %v2929_v0 }
 0x89b   :  { %1340 = vmatpush.msrb.mxu2 %v2929_v0 }
 0x89c   :  { %1043 = vmatpush.msra.mxu3 %v2931_v1 }
 0x89d   :  { %1341 = vmatpush.msrb.mxu2 %v2931_v1 }
 0x89e   :  { %1044 = vmatpush.msra.mxu3 %v2934_v3 }
 0x89f   :  { %1342 = vmatpush.msrb.mxu2 %v2934_v3 }
 0x8a0   :  { %1045 = vmatpush.msra.mxu3 %v2973_v43 }
 0x8a1   :  { %1343 = vmatpush.msrb.mxu2 %v2973_v43 }
 0x91c   :  { %v608_v17 = vpop.f32.mrf.mxu3 }
 0x91d   :  { %v612_v18 = vrot.slane %v608_v17, 2  ;;  %v542_v19 = vpop.f32.mrf.mxu2 }
 0x91e   :  { %v543_v20 = vadd.f32 %v3077_v40, %v542_v19 }
 0x91f   :  { %v614_v21 = vadd.f32 %v612_v18, %v2991_v63 }
 0x920   :  { %565 = vrot.lane.b32.xlu1 %v543_v20, %s2907_s0  ;;  %v2564_v22 = vmul.f32 -1.442695, %v543_v20 }
 0x921   :  { %635 = vrot.lane.b32.xlu0 %v614_v21, %s2907_s0  ;;  %v2566_v26 = vmul.f32 -1.442695, %v614_v21 }
 0x922   :  { %2662 = vpow2.f32 %v2564_v22 }
 0x923   :  { %2664 = vpow2.f32 %v2566_v26 }
 0x928   :  { %v2663_v27 = vpop.eup %2662 }
 0x929   :  { %v2665_v35 = vpop.eup %2664  ;;  %v548_v38 = vadd.f32 1.0, %v2663_v27 }
 0x92a   :  { %v618_v39 = vadd.f32 1.0, %v2665_v35 }
 0x92b   :  { %2666 = vrcp.f32 %v548_v38  ;;  %v560_v36 = vand.u32 2147483648, %v548_v38  ;;  %vm554_vm0 = vweird.f32 %v548_v38  ;;  %v558_v53 = vand.u32 2147483647, %v548_v38 }
 0x92c   :  { %2668 = vrcp.f32 %v618_v39  ;;  %v630_v54 = vand.u32 2147483648, %v618_v39  ;;  %vm624_vm3 = vweird.f32 %v618_v39  ;;  %v628_v55 = vand.u32 2147483647, %v618_v39 }
 0x92d   :  { %v561_v59 = vor.u32 1.1754944e-38, %v560_v36  ;;  %vm559_vm5 = vcmp.eq.f32.partialorder %v558_v53, 8.507059e+37 }
 0x92e   :  { %v631_v62 = vor.u32 1.1754944e-38, %v630_v54  ;;  %vm629_vm6 = vcmp.eq.f32.partialorder %v628_v55, 8.507059e+37 }
 0x931   :  { %v2667_v41 = vpop.eup %2666 }
 0x932   :  { %v2669_v42 = vpop.eup %2668  ;;  %v550_v44 = vmul.f32 %v2667_v41, %v548_v38  ;;  %vm555_vm14 = vweird.f32 %v2667_v41 }
 0x933   :  { %v620_v47 = vmul.f32 %v2669_v42, %v618_v39  ;;  %vm625_vm15 = vweird.f32 %v2669_v42  ;;  %vm556_vm2 = vmor %vm554_vm0, %vm555_vm14 }
 0x934   :  { %v551_v45 = vsub.f32 1.0, %v550_v44  ;;  %vm626_vm4 = vmor %vm624_vm3, %vm625_vm15  ;;  %v87_v44 = vmul.f32 %v2981_v56, %v2961_v25 }
 0x935   :  { %v621_v63 = vsub.f32 1.0, %v620_v47 }
 0x936   :  { %v552_v48 = vmul.f32 %v2667_v41, %v551_v45  ;;  %v92_v47 = vadd.f32 %v2983_v57, %v87_v44 }
 0x937   :  { %v622_v46 = vmul.f32 %v2669_v42, %v621_v63 }
 0x938   :  { %v553_v50 = vadd.f32 %v2667_v41, %v552_v48 }
 0x939   :  { %v623_v52 = vadd.f32 %v2669_v42, %v622_v46 }
 0x93a   :  { %v557_v58 = vsel %vm556_vm2, %v2667_v41, %v553_v50 }
 0x93b   :  { %v627_v61 = vsel %vm626_vm4, %v2669_v42, %v623_v52  ;;  %v562_v6 = vsel %vm559_vm5, %v561_v59, %v557_v58 }
 0x93c   :  { %v632_v5 = vsel %vm629_vm6, %v631_v62, %v627_v61 }
 0x992   :  { %v566_v4 = vpop.permute.xlu1 %565 }
 0x993   :  { %v568_v7 = vmul.f32 %v566_v4, %v562_v6  ;;  %v636_v8 = vpop.permute.xlu0 %635 }
 0x994   :  { %v638_v51 = vmul.f32 %v636_v8, %v632_v5 }
 0x995   :  { %570 = vrot.lane.b32.xlu0 %v568_v7, %s2908_s23 }
 0x996   :  { %640 = vrot.lane.b32.xlu2 %v638_v51, %s2908_s23 }
 0x9f0   :  { %v641_v2 = vpop.permute.xlu2 %640 }
 0x9f1   :  { %v643_v10 = vadd.f32 %v641_v2, %v614_v21 }
 0x9f3   :  { %2670 = vtanh.f32 %v643_v10 }
 0x9f9   :  { %v2671_v11 = vpop.eup %2670 }
 0x9fa   :  { %v646_v12 = vrot.slane %v2671_v11, 2 }
 0x9fc   :  { %v648_v13 = vsub.f32 %v3131_v49, %v646_v12  ;;  %v85_v49 = vmul.f32 %v2981_v56, %v2957_v23  ;;  %v86_v23 = vmul.f32 %v2981_v56, %v2959_v24 }
 0x9fe   :  { %v650_v14 = vrot.slane %v648_v13, 6  ;;  %v90_v27 = vadd.f32 %v2983_v57, %v85_v49  ;;  %v91_v42 = vadd.f32 %v2983_v57, %v86_v23 }
 0xa00   :  { %651 = vrot.lane.b32.xlu1 %v650_v14, %s2909_s24  ;;  %2551 = vmatmul.msk.f32.gmra.mxu0 %vm32_vm1, %v90_v27 }
 0xa07   :  { %v571_v15 = vpop.permute.xlu0 %570 }
 0xa08   :  { %v573_v16 = vadd.f32 %v571_v15, %v543_v20  ;;  %2552 = vmatmul.msk.f32.gmra.mxu0 %vm32_vm1, %v91_v42 }
 0xa0a   :  { %2672 = vtanh.f32 %v573_v16 }
 0xa10   :  { %v2673_v17 = vpop.eup %2672  ;;  %2553 = vmatmul.msk.f32.gmra.mxu0 %vm32_vm1, %v92_v47  ;;  %v3225_v47 = vld [vmem:[#allocation2 + $0x28] sm:$0xff] }
 0xa11   :  { %v575_v18 = vsub.f32 %v3127_v9, %v2673_v17 }
 0xa13   :  { %577 = vrot.lane.b32.xlu2 %v575_v18, %s2909_s24 }
 0xa6d   :  { %v578_v19 = vpop.permute.xlu2 %577 }
 0xa6e   :  { %v580_v22 = vmul.f32 %v578_v19, %v562_v6 }
 0xa70   :  { %582 = vrot.lane.b32.xlu1 %v580_v22, %s2907_s0 }
 0xa72   :  { %v652_v21 = vpop.permute.xlu1 %651 }
 0xa73   :  { %v654_v26 = vmul.f32 %v652_v21, %v632_v5 }
 0xa75   :  { %656 = vrot.lane.b32.xlu0 %v654_v26, %s2907_s0 }
 0xae2   :  { %v583_v20 = vpop.permute.xlu1 %582 }
 0xae3   :  { %v3164_v35 = vadd.f32 %v2673_v17, %v583_v20 }
 0xae5   :  { %v665_v9 = vrot.slane %v3164_v35, 2 }
 0xae7   :  { %v657_v38 = vpop.permute.xlu0 %656  ;;  %666 = vrot.lane.b32.xlu1 %v665_v9, %s2909_s24 }
 0xae8   :  { %v3168_v39 = vadd.f32 %v2671_v11, %v657_v38 }
 0xaea   :  { %661 = vrot.lane.b32.xlu0 %v3168_v39, %s2908_s23  ;;  %v735_v41 = vrot.slane %v3168_v39, 6 }
 0xaec   :  { %736 = vrot.lane.b32.xlu2 %v735_v41, %s2908_s23 }
 0xb46   :  { %v737_v45 = vpop.permute.xlu2 %736 }
 0xb47   :  { %2569 = vmatmul.msk.f32.vlgmr.msra.gmra.mxu1 %vm154_vm9, %v737_v45  ;;  %v3228_v45 = vld [vmem:[#allocation2 + $0x20] sm:$0xff] }
 0xb48   :  { %1121 = vmatpush.msra.mxu1 %v2998_v28  ;;  %v132_v28 = vpop.f32.mrf.mxu0 }
 0xb4a   :  { %1122 = vmatpush.msra.mxu1 %v3000_v29  ;;  %v3198_v29 = vadd.f32 %v2988_v60, %v132_v28 }
 0xb4c   :  { %1123 = vmatpush.msra.mxu1 %v3004_v30 }
 0xb4e   :  { %1124 = vmatpush.msra.mxu1 %v3009_v31 }
 0xb50   :  { %1125 = vmatpush.msra.mxu1 %v3014_v32  ;;  %v3202_v32 = vpop.f32.mrf.mxu0 }
 0xb52   :  { %1126 = vmatpush.msra.mxu1 %v3019_v33 }
 0xb54   :  { %1127 = vmatpush.msra.mxu1 %v3024_v34 }
 0xb56   :  { %1128 = vmatpush.msra.mxu1 %v3037_v37 }
 0xb58   :  { %v3204_v33 = vpop.f32.mrf.mxu0 }
 0xb59   :  { %v667_v24 = vpop.permute.xlu1 %666 }
 0xb5c   :  { %v662_v25 = vpop.permute.xlu0 %661 }
 0xb5d   :  { %v669_v56 = vsel %vm154_vm9, %v662_v25, %v667_v24  ;;  %v3231_v24 = vld [vmem:[#allocation2 + $0x18] sm:$0xff]  ;;  %v3234_v25 = vld [vmem:[#allocation2 + $0x10] sm:$0xff] }
 0xb5e   :  { %v671_v57 = vrot.slane %v669_v56, 6 }
 0xb60   :  { %2567 = vmatmul.msk.f32.vlgmr.msrb.gmra.mxu0 %vm226_vm10, %v671_v57 }
 0xb61   :  { %1630 = vmatpush.msrb.mxu0 %v2929_v0 }
 0xb63   :  { %1631 = vmatpush.msrb.mxu0 %v2931_v1 }
 0xb65   :  { %1632 = vmatpush.msrb.mxu0 %v2934_v3 }
 0xb67   :  { %1633 = vmatpush.msrb.mxu0 %v2973_v43 }
 0xbc4   :  { %v757_v30 = vpop.f32.mrf.mxu1 }
 0xbc5   :  { %v760_v31 = vadd.f32 %v757_v30, %v3198_v29 }
 0xbc7   :  { %781 = vrot.lane.b32.xlu2 %v760_v31, %s2907_s0  ;;  %v2570_v3 = vmul.f32 -1.442695, %v760_v31 }
 0xbc9   :  { %2674 = vpow2.f32 %v2570_v3 }
 0xbcf   :  { %v2675_v43 = vpop.eup %2674 }
 0xbd0   :  { %v764_v34 = vadd.f32 1.0, %v2675_v43 }
 0xbd2   :  { %2676 = vrcp.f32 %v764_v34  ;;  %v776_v50 = vand.u32 2147483648, %v764_v34  ;;  %vm770_vm7 = vweird.f32 %v764_v34  ;;  %v774_v36 = vand.u32 2147483647, %v764_v34 }
 0xbd4   :  { %v777_v53 = vor.u32 1.1754944e-38, %v776_v50  ;;  %vm775_vm11 = vcmp.eq.f32.partialorder %v774_v36, 8.507059e+37 }
 0xbd8   :  { %v2677_v60 = vpop.eup %2676 }
 0xbd9   :  { %v766_v37 = vmul.f32 %v2677_v60, %v764_v34  ;;  %vm771_vm1 = vweird.f32 %v2677_v60 }
 0xbda   :  { %vm772_vm8 = vmor %vm770_vm7, %vm771_vm1 }
 0xbdb   :  { %v767_v63 = vsub.f32 1.0, %v766_v37 }
 0xbdd   :  { %v691_v0 = vpop.f32.mrf.mxu0  ;;  %v768_v48 = vmul.f32 %v2677_v60, %v767_v63 }
 0xbde   :  { %v692_v1 = vadd.f32 %v3077_v40, %v691_v0 }
 0xbdf   :  { %v769_v46 = vadd.f32 %v2677_v60, %v768_v48 }
 0xbe0   :  { %714 = vrot.lane.b32.xlu0 %v692_v1, %s2907_s0  ;;  %v2568_v59 = vmul.f32 -1.442695, %v692_v1 }
 0xbe1   :  { %v773_v52 = vsel %vm772_vm8, %v2677_v60, %v769_v46 }
 0xbe2   :  { %v778_v55 = vsel %vm775_vm11, %v777_v53, %v773_v52  ;;  %2678 = vpow2.f32 %v2568_v59 }
 0xbe8   :  { %v2679_v61 = vpop.eup %2678 }
 0xbe9   :  { %v697_v62 = vadd.f32 1.0, %v2679_v61 }
 0xbeb   :  { %2680 = vrcp.f32 %v697_v62  ;;  %v709_v51 = vand.u32 2147483648, %v697_v62  ;;  %vm703_vm13 = vweird.f32 %v697_v62  ;;  %v707_v2 = vand.u32 2147483647, %v697_v62 }
 0xbed   :  { %v710_v11 = vor.u32 1.1754944e-38, %v709_v51  ;;  %vm708_vm15 = vcmp.eq.f32.partialorder %v707_v2, 8.507059e+37 }
 0xbf1   :  { %v2681_v4 = vpop.eup %2680 }
 0xbf2   :  { %v699_v6 = vmul.f32 %v2681_v4, %v697_v62  ;;  %vm704_vm12 = vweird.f32 %v2681_v4 }
 0xbf3   :  { %vm705_vm14 = vmor %vm703_vm13, %vm704_vm12 }
 0xbf4   :  { %v700_v7 = vsub.f32 1.0, %v699_v6 }
 0xbf6   :  { %v701_v8 = vmul.f32 %v2681_v4, %v700_v7 }
 0xbf8   :  { %v702_v5 = vadd.f32 %v2681_v4, %v701_v8 }
 0xbfa   :  { %v706_v10 = vsel %vm705_vm14, %v2681_v4, %v702_v5 }
 0xbfb   :  { %v711_v13 = vsel %vm708_vm15, %v710_v11, %v706_v10 }
 0xc21   :  { %v782_v54 = vpop.permute.xlu2 %781 }
 0xc22   :  { %v784_v58 = vmul.f32 %v782_v54, %v778_v55 }
 0xc24   :  { %786 = vrot.lane.b32.xlu1 %v784_v58, %s2908_s23 }
 0xc52   :  { %v715_v12 = vpop.permute.xlu0 %714 }
 0xc53   :  { %v717_v14 = vmul.f32 %v715_v12, %v711_v13 }
 0xc55   :  { %719 = vrot.lane.b32.xlu2 %v717_v14, %s2908_s23 }
 0xc96   :  { %v787_v15 = vpop.permute.xlu1 %786 }
 0xc97   :  { %v789_v16 = vadd.f32 %v787_v15, %v760_v31 }
 0xc99   :  { %2682 = vtanh.f32 %v789_v16 }
 0xc9f   :  { %v2683_v17 = vpop.eup %2682 }
 0xca0   :  { %v792_v18 = vrot.slane %v2683_v17, 2 }
 0xca2   :  { %v794_v19 = vsub.f32 %v3168_v39, %v792_v18 }
 0xca4   :  { %v796_v22 = vrot.slane %v794_v19, 6 }
 0xca6   :  { %797 = vrot.lane.b32.xlu0 %v796_v22, %s2909_s24 }
 0xcaf   :  { %v720_v21 = vpop.permute.xlu2 %719 }
 0xcb0   :  { %v722_v26 = vadd.f32 %v720_v21, %v692_v1 }
 0xcb2   :  { %2684 = vtanh.f32 %v722_v26 }
 0xcb8   :  { %v2685_v49 = vpop.eup %2684 }
 0xcb9   :  { %v724_v27 = vsub.f32 %v3164_v35, %v2685_v49 }
 0xcbb   :  { %726 = vrot.lane.b32.xlu1 %v724_v27, %s2909_s24 }
 0xd18   :  { %v798_v20 = vpop.permute.xlu0 %797 }
 0xd19   :  { %v800_v9 = vmul.f32 %v798_v20, %v778_v55 }
 0xd1b   :  { %802 = vrot.lane.b32.xlu2 %v800_v9, %s2907_s0 }
 0xd2d   :  { %v727_v38 = vpop.permute.xlu1 %726 }
 0xd2e   :  { %v729_v41 = vmul.f32 %v727_v38, %v711_v13 }
 0xd30   :  { %731 = vrot.lane.b32.xlu0 %v729_v41, %s2907_s0 }
 0xd75   :  { %v803_v39 = vpop.permute.xlu2 %802 }
 0xd76   :  { %v3216_v23 = vadd.f32 %v2683_v17, %v803_v39 }
 0xd78   :  { %807 = vrot.lane.b32.xlu1 %v3216_v23, %s2908_s23 }
 0xda2   :  { %v732_v42 = vpop.permute.xlu0 %731 }
 0xda3   :  { %v3220_v44 = vadd.f32 %v2685_v49, %v732_v42 }
 0xda5   :  { %811 = vrot.lane.b32.xlu2 %v3220_v44, %s2909_s24 }
 0xdea   :  { %v808_v35 = vpop.permute.xlu1 %807 }
 0xdeb   :  { %2573 = vmatmul.msk.f32.vlgmr.msrb.gmra.mxu1 %vm154_vm9, %v808_v35 }
 0xdec   :  { %1481 = vmatpush.msrb.mxu1 %v3225_v47 }
 0xdee   :  { %1482 = vmatpush.msrb.mxu1 %v3228_v45 }
 0xdf0   :  { %1483 = vmatpush.msrb.mxu1 %v3231_v24 }
 0xdf2   :  { %1484 = vmatpush.msrb.mxu1 %v3234_v25 }
 0xdff   :  { %v812_v56 = vpop.permute.xlu2 %811 }
 0xe00   :  { %v814_v57 = vsel %vm154_vm9, %v808_v35, %v812_v56 }
 0xe01   :  { %2571 = vmatmul.msk.f32.vlgmr.msrb.gmra.mxu3 %vm226_vm10, %v814_v57 }
 0xe02   :  { %1191 = vmatpush.msrb.mxu3 %v3225_v47 }
 0xe04   :  { %1192 = vmatpush.msrb.mxu3 %v3228_v45 }
 0xe06   :  { %1193 = vmatpush.msrb.mxu3 %v3231_v24 }
 0xe08   :  { %1194 = vmatpush.msrb.mxu3 %v3234_v25 }
 0xe68   :  { %v898_v28 = vpop.f32.mrf.mxu1 }
 0xe69   :  { %v902_v30 = vrot.slane %v898_v28, 6  ;;  %v3266_v28 = vld [vmem:[#allocation2 + $0x70] sm:$0xff] }
 0xe6b   :  { %v904_v31 = vadd.f32 %v902_v30, %v3198_v29  ;;  %v3269_v30 = vld [vmem:[#allocation2 + $0x68] sm:$0xff] }
 0xe6d   :  { %925 = vrot.lane.b32.xlu0 %v904_v31, %s2907_s0  ;;  %v2574_v3 = vmul.f32 -1.442695, %v904_v31 }
 0xe6f   :  { %2686 = vpow2.f32 %v2574_v3  ;;  %v3281_v3 = vld [vmem:[#allocation2 + $0x48] sm:$0xff] }
 0xe75   :  { %v2687_v43 = vpop.eup %2686 }
 0xe76   :  { %v908_v34 = vadd.f32 1.0, %v2687_v43  ;;  %v3284_v43 = vld [vmem:[#allocation2 + $0x40] sm:$0xff] }
 0xe78   :  { %2688 = vrcp.f32 %v908_v34  ;;  %v920_v53 = vand.u32 2147483648, %v908_v34  ;;  %vm914_vm2 = vweird.f32 %v908_v34  ;;  %v918_v54 = vand.u32 2147483647, %v908_v34 }
 0xe7a   :  { %v921_v58 = vor.u32 1.1754944e-38, %v920_v53  ;;  %vm919_vm4 = vcmp.eq.f32.partialorder %v918_v54, 8.507059e+37 }
 0xe7e   :  { %v2689_v60 = vpop.eup %2688 }
 0xe7f   :  { %v910_v63 = vmul.f32 %v2689_v60, %v908_v34  ;;  %vm915_vm0 = vweird.f32 %v2689_v60  ;;  %v3287_v34 = vld [vmem:[#allocation2 + $0x38] sm:$0xff] }
 0xe80   :  { %vm916_vm3 = vmor %vm914_vm2, %vm915_vm0 }
 0xe81   :  { %v911_v48 = vsub.f32 1.0, %v910_v63 }
 0xe83   :  { %v912_v46 = vmul.f32 %v2689_v60, %v911_v48 }
 0xe84   :  { %v835_v0 = vpop.f32.mrf.mxu3 }
 0xe85   :  { %v836_v1 = vadd.f32 %v3077_v40, %v835_v0  ;;  %v913_v36 = vadd.f32 %v2689_v60, %v912_v46  ;;  %v3275_v0 = vld [vmem:[#allocation2 + $0x58] sm:$0xff] }
 0xe87   :  { %858 = vrot.lane.b32.xlu1 %v836_v1, %s2907_s0  ;;  %v2572_v37 = vmul.f32 -1.442695, %v836_v1  ;;  %v917_v55 = vsel %vm916_vm3, %v2689_v60, %v913_v36 }
 0xe88   :  { %v922_v61 = vsel %vm919_vm4, %v921_v58, %v917_v55 }
 0xe89   :  { %2690 = vpow2.f32 %v2572_v37 }
 0xe8f   :  { %v2691_v50 = vpop.eup %2690 }
 0xe90   :  { %v841_v52 = vadd.f32 1.0, %v2691_v50 }
 0xe92   :  { %2692 = vrcp.f32 %v841_v52  ;;  %v853_v51 = vand.u32 2147483648, %v841_v52  ;;  %vm847_vm6 = vweird.f32 %v841_v52  ;;  %v851_v2 = vand.u32 2147483647, %v841_v52 }
 0xe94   :  { %v854_v11 = vor.u32 1.1754944e-38, %v853_v51  ;;  %vm852_vm7 = vcmp.eq.f32.partialorder %v851_v2, 8.507059e+37 }
 0xe98   :  { %v2693_v4 = vpop.eup %2692 }
 0xe99   :  { %v843_v6 = vmul.f32 %v2693_v4, %v841_v52  ;;  %vm848_vm5 = vweird.f32 %v2693_v4 }
 0xe9a   :  { %vm849_vm1 = vmor %vm847_vm6, %vm848_vm5 }
 0xe9b   :  { %v844_v7 = vsub.f32 1.0, %v843_v6 }
 0xe9d   :  { %v845_v8 = vmul.f32 %v2693_v4, %v844_v7 }
 0xe9f   :  { %v846_v5 = vadd.f32 %v2693_v4, %v845_v8 }
 0xea1   :  { %v850_v10 = vsel %vm849_vm1, %v2693_v4, %v846_v5 }
 0xea2   :  { %v855_v13 = vsel %vm852_vm7, %v854_v11, %v850_v10 }
 0xedf   :  { %v926_v59 = vpop.permute.xlu0 %925 }
 0xee0   :  { %v928_v62 = vmul.f32 %v926_v59, %v922_v61 }
 0xee2   :  { %930 = vrot.lane.b32.xlu2 %v928_v62, %s2908_s23 }
 0xef9   :  { %v859_v12 = vpop.permute.xlu1 %858 }
 0xefa   :  { %v861_v14 = vmul.f32 %v859_v12, %v855_v13 }
 0xefc   :  { %863 = vrot.lane.b32.xlu0 %v861_v14, %s2908_s23 }
 0xf3c   :  { %v931_v15 = vpop.permute.xlu2 %930 }
 0xf3d   :  { %v933_v16 = vadd.f32 %v931_v15, %v904_v31  ;;  %v3272_v31 = vld [vmem:[#allocation2 + $0x60] sm:$0xff] }
 0xf3f   :  { %2694 = vtanh.f32 %v933_v16 }
 0xf45   :  { %v2695_v17 = vpop.eup %2694 }
 0xf46   :  { %v936_v18 = vrot.slane %v2695_v17, 2 }
 0xf48   :  { %v938_v19 = vsub.f32 %v3216_v23, %v936_v18 }
 0xf4a   :  { %v940_v22 = vrot.slane %v938_v19, 6 }
 0xf4c   :  { %941 = vrot.lane.b32.xlu1 %v940_v22, %s2909_s24 }
 0xf6e   :  { %v864_v21 = vpop.permute.xlu0 %863 }
 0xf6f   :  { %v866_v26 = vadd.f32 %v864_v21, %v836_v1  ;;  %v3278_v1 = vld [vmem:[#allocation2 + $0x50] sm:$0xff] }
 0xf71   :  { %2696 = vtanh.f32 %v866_v26 }
 0xf77   :  { %v2697_v49 = vpop.eup %2696 }
 0xf78   :  { %v868_v27 = vsub.f32 %v3220_v44, %v2697_v49 }
 0xf7a   :  { %870 = vrot.lane.b32.xlu2 %v868_v27, %s2909_s24 }
 0xfbe   :  { %v942_v20 = vpop.permute.xlu1 %941 }
 0xfbf   :  { %v944_v9 = vmul.f32 %v942_v20, %v922_v61 }
 0xfc1   :  { %946 = vrot.lane.b32.xlu0 %v944_v9, %s2907_s0 }
 0xfd4   :  { %v871_v38 = vpop.permute.xlu2 %870 }
 0xfd5   :  { %v873_v41 = vmul.f32 %v871_v38, %v855_v13 }
 0xfd7   :  { %875 = vrot.lane.b32.xlu1 %v873_v41, %s2907_s0 }
0x1033   :  { %v947_v39 = vpop.permute.xlu0 %946 }
0x1034   :  { %v3255_v23 = vadd.f32 %v2695_v17, %v947_v39 }
0x1036   :  { %951 = vrot.lane.b32.xlu0 %v3255_v23, %s2908_s23  ;;  %v1025_v42 = vrot.slane %v3255_v23, 2 }
0x1038   :  { %1026 = vrot.lane.b32.xlu2 %v1025_v42, %s2908_s23 }
0x1049   :  { %v876_v44 = vpop.permute.xlu1 %875 }
0x104a   :  { %v3261_v35 = vadd.f32 %v2697_v49, %v876_v44 }
0x104c   :  { %v955_v56 = vrot.slane %v3261_v35, 6 }
0x104e   :  { %956 = vrot.lane.b32.xlu1 %v955_v56, %s2909_s24 }
0x1092   :  { %v1027_v57 = vpop.permute.xlu2 %1026 }
0x1093   :  { %2577 = vmatmul.msk.f32.vlgmr.msra.gmra.mxu3 %vm154_vm9, %v1027_v57 }
0x1094   :  { %1414 = vmatpush.msra.mxu3 %v3266_v28 }
0x1096   :  { %1415 = vmatpush.msra.mxu3 %v3269_v30 }
0x1098   :  { %1416 = vmatpush.msra.mxu3 %v3272_v31 }
0x109a   :  { %1417 = vmatpush.msra.mxu3 %v3275_v0 }
0x109c   :  { %1418 = vmatpush.msra.mxu3 %v3278_v1 }
0x109e   :  { %1419 = vmatpush.msra.mxu3 %v3281_v3 }
0x10a0   :  { %1420 = vmatpush.msra.mxu3 %v3284_v43 }
0x10a2   :  { %1421 = vmatpush.msra.mxu3 %v3287_v34 }
0x10a8   :  { %v952_v60 = vpop.permute.xlu0 %951 }
0x10c0   :  { %v957_v37 = vpop.permute.xlu1 %956 }
0x10c1   :  { %v959_v63 = vsel %vm154_vm9, %v952_v60, %v957_v37 }
0x10c2   :  { %v961_v48 = vrot.slane %v959_v63, 2 }
0x10c4   :  { %2575 = vmatmul.msk.f32.vlgmr.msra.gmra.mxu2 %vm226_vm10, %v961_v48 }
0x10c5   :  { %1560 = vmatpush.msra.mxu2 %v3266_v28 }
0x10c7   :  { %1561 = vmatpush.msra.mxu2 %v3269_v30 }
0x10c9   :  { %1562 = vmatpush.msra.mxu2 %v3272_v31 }
0x10cb   :  { %1563 = vmatpush.msra.mxu2 %v3275_v0 }
0x10cd   :  { %1564 = vmatpush.msra.mxu2 %v3278_v1 }
0x10cf   :  { %1565 = vmatpush.msra.mxu2 %v3281_v3 }
0x10d1   :  { %1566 = vmatpush.msra.mxu2 %v3284_v43 }
0x10d3   :  { %1567 = vmatpush.msra.mxu2 %v3287_v34 }
0x1116   :  { %v1047_v46 = vpop.f32.mrf.mxu3 }
0x1117   :  { %v1051_v50 = vrot.slane %v1047_v46, 4 }
0x1119   :  { %v1053_v36 = vadd.f32 %v1051_v50, %v3198_v29 }
0x111b   :  { %1074 = vrot.lane.b32.xlu2 %v1053_v36, %s2907_s0  ;;  %v2578_v53 = vmul.f32 -1.442695, %v1053_v36 }
0x111d   :  { %2698 = vpow2.f32 %v2578_v53 }
0x1123   :  { %v2699_v55 = vpop.eup %2698 }
0x1124   :  { %v1057_v58 = vadd.f32 1.0, %v2699_v55 }
0x1126   :  { %2700 = vrcp.f32 %v1057_v58  ;;  %v1069_v7 = vand.u32 2147483648, %v1057_v58  ;;  %vm1063_vm11 = vweird.f32 %v1057_v58  ;;  %v1067_v8 = vand.u32 2147483647, %v1057_v58 }
0x1128   :  { %v1070_v51 = vor.u32 1.1754944e-38, %v1069_v7  ;;  %vm1068_vm13 = vcmp.eq.f32.partialorder %v1067_v8, 8.507059e+37 }
0x112c   :  { %v2701_v59 = vpop.eup %2700 }
0x112d   :  { %v1059_v61 = vmul.f32 %v2701_v59, %v1057_v58  ;;  %vm1064_vm8 = vweird.f32 %v2701_v59 }
0x112e   :  { %vm1065_vm12 = vmor %vm1063_vm11, %vm1064_vm8 }
0x112f   :  { %v1060_v62 = vsub.f32 1.0, %v1059_v61 }
0x1131   :  { %v1061_v4 = vmul.f32 %v2701_v59, %v1060_v62 }
0x1133   :  { %v1062_v6 = vadd.f32 %v2701_v59, %v1061_v4 }
0x1135   :  { %v1066_v5 = vsel %vm1065_vm12, %v2701_v59, %v1062_v6 }
0x1136   :  { %v1071_v2 = vsel %vm1068_vm13, %v1070_v51, %v1066_v5  ;;  %v3339_v5 = vld [vmem:[#allocation2 + $0x78] ss:$0 sm:$0xff] }
0x1147   :  { %v981_v52 = vpop.f32.mrf.mxu2 }
0x1148   :  { %v982_v54 = vadd.f32 %v3077_v40, %v981_v52 }
0x114a   :  { %1004 = vrot.lane.b32.xlu0 %v982_v54, %s2907_s0  ;;  %v2576_v11 = vmul.f32 -1.442695, %v982_v54 }
0x114c   :  { %2702 = vpow2.f32 %v2576_v11 }
0x1152   :  { %v2703_v12 = vpop.eup %2702 }
0x1153   :  { %v987_v13 = vadd.f32 1.0, %v2703_v12 }
0x1155   :  { %2704 = vrcp.f32 %v987_v13  ;;  %v999_v19 = vand.u32 2147483648, %v987_v13  ;;  %vm993_vm15 = vweird.f32 %v987_v13  ;;  %v997_v22 = vand.u32 2147483647, %v987_v13 }
0x1157   :  { %v1000_v26 = vor.u32 1.1754944e-38, %v999_v19  ;;  %vm998_vm2 = vcmp.eq.f32.partialorder %v997_v22, 8.507059e+37 }
0x115b   :  { %v2705_v14 = vpop.eup %2704 }
0x115c   :  { %v989_v15 = vmul.f32 %v2705_v14, %v987_v13  ;;  %vm994_vm14 = vweird.f32 %v2705_v14 }
0x115d   :  { %vm995_vm0 = vmor %vm993_vm15, %vm994_vm14 }
0x115e   :  { %v990_v16 = vsub.f32 1.0, %v989_v15 }
0x1160   :  { %v991_v17 = vmul.f32 %v2705_v14, %v990_v16 }
0x1162   :  { %v992_v18 = vadd.f32 %v2705_v14, %v991_v17 }
0x1164   :  { %v996_v21 = vsel %vm995_vm0, %v2705_v14, %v992_v18 }
0x1165   :  { %v1001_v27 = vsel %vm998_vm2, %v1000_v26, %v996_v21 }
0x1175   :  { %v1075_v40 = vpop.permute.xlu2 %1074 }
0x1176   :  { %v1077_v10 = vmul.f32 %v1075_v40, %v1071_v2 }
0x1178   :  { %1079 = vrot.lane.b32.xlu1 %v1077_v10, %s2908_s23 }
0x11bc   :  { %v1005_v49 = vpop.permute.xlu0 %1004 }
0x11bd   :  { %v1007_v20 = vmul.f32 %v1005_v49, %v1001_v27 }
0x11bf   :  { %1009 = vrot.lane.b32.xlu2 %v1007_v20, %s2908_s23 }
0x11ea   :  { %v1080_v9 = vpop.permute.xlu1 %1079 }
0x11eb   :  { %v1082_v38 = vadd.f32 %v1080_v9, %v1053_v36 }
0x11ed   :  { %2706 = vtanh.f32 %v1082_v38 }
0x11f3   :  { %v2707_v41 = vpop.eup %2706 }
0x11f4   :  { %v1085_v39 = vrot.slane %v2707_v41, 2 }
0x11f6   :  { %v1087_v42 = vsub.f32 %v3255_v23, %v1085_v39 }
0x11f8   :  { %v1089_v44 = vrot.slane %v1087_v42, 6 }
0x11fa   :  { %1090 = vrot.lane.b32.xlu0 %v1089_v44, %s2909_s24 }
0x1219   :  { %v1010_v56 = vpop.permute.xlu2 %1009 }
0x121a   :  { %v1012_v57 = vadd.f32 %v1010_v56, %v982_v54 }
0x121c   :  { %2708 = vtanh.f32 %v1012_v57 }
0x1222   :  { %v2709_v60 = vpop.eup %2708 }
0x1223   :  { %v1014_v37 = vsub.f32 %v3261_v35, %v2709_v60 }
0x1225   :  { %1016 = vrot.lane.b32.xlu1 %v1014_v37, %s2909_s24 }
0x126c   :  { %v1091_v63 = vpop.permute.xlu0 %1090 }
0x126d   :  { %v1093_v48 = vmul.f32 %v1091_v63, %v1071_v2 }
0x126f   :  { %1095 = vrot.lane.b32.xlu2 %v1093_v48, %s2907_s0 }
0x1297   :  { %v1017_v46 = vpop.permute.xlu1 %1016 }
0x1298   :  { %v1019_v50 = vmul.f32 %v1017_v46, %v1001_v27 }
0x129a   :  { %1021 = vrot.lane.b32.xlu0 %v1019_v50, %s2907_s0 }
0x12c9   :  { %v1096_v23 = vpop.permute.xlu2 %1095 }
0x12ca   :  { %v3312_v36 = vadd.f32 %v2707_v41, %v1096_v23 }
0x12cc   :  { %1100 = vrot.lane.b32.xlu2 %v3312_v36, %s2908_s23  ;;  %v1174_v52 = vrot.slane %v3312_v36, 4 }
0x12ce   :  { %1175 = vrot.lane.b32.xlu1 %v1174_v52, %s2908_s23 }
0x130c   :  { %v1022_v35 = vpop.permute.xlu0 %1021 }
0x130d   :  { %v3318_v53 = vadd.f32 %v2709_v60, %v1022_v35 }
0x130f   :  { %v1104_v54 = vrot.slane %v3318_v53, 4 }
0x1311   :  { %1105 = vrot.lane.b32.xlu0 %v1104_v54, %s2909_s24 }
0x1326   :  { %v1101_v58 = vpop.permute.xlu2 %1100 }
0x1340   :  { %v1176_v55 = vpop.permute.xlu1 %1175 }
0x1341   :  { %2581 = vmatmul.msk.f32.vlgmr.msrb.gmra.mxu3 %vm154_vm9, %v1176_v55 }
0x1342   :  { %1779 = vmatpush.msrb.mxu3 %v3225_v47 }
0x1344   :  { %1780 = vmatpush.msrb.mxu3 %v3228_v45 }
0x1346   :  { %1781 = vmatpush.msrb.mxu3 %v3231_v24 }
0x1348   :  { %1782 = vmatpush.msrb.mxu3 %v3234_v25 }
0x1383   :  { %v1106_v59 = vpop.permute.xlu0 %1105 }
0x1384   :  { %v1108_v61 = vsel %vm154_vm9, %v1101_v58, %v1106_v59 }
0x1385   :  { %v1110_v62 = vrot.slane %v1108_v61, 4 }
0x1387   :  { %2579 = vmatmul.msk.f32.vlgmr.msra.gmra.mxu1 %vm226_vm10, %v1110_v62 }
0x1388   :  { %1709 = vmatpush.msra.mxu1 %v3266_v28 }
0x138a   :  { %1710 = vmatpush.msra.mxu1 %v3269_v30 }
0x138c   :  { %1711 = vmatpush.msra.mxu1 %v3272_v31 }
0x138e   :  { %1712 = vmatpush.msra.mxu1 %v3275_v0 }
0x1390   :  { %1713 = vmatpush.msra.mxu1 %v3278_v1 }
0x1392   :  { %1714 = vmatpush.msra.mxu1 %v3281_v3 }
0x1394   :  { %1715 = vmatpush.msra.mxu1 %v3284_v43 }
0x1396   :  { %1716 = vmatpush.msra.mxu1 %v3287_v34 }
0x13c4   :  { %v1196_v4 = vpop.f32.mrf.mxu3 }
0x13c5   :  { %v1200_v6 = vrot.slane %v1196_v4, 2 }
0x13c7   :  { %v1202_v7 = vadd.f32 %v1200_v6, %v3198_v29 }
0x13c9   :  { %1223 = vrot.lane.b32.xlu1 %v1202_v7, %s2907_s0  ;;  %v2582_v40 = vmul.f32 -1.442695, %v1202_v7 }
0x13cb   :  { %2710 = vpow2.f32 %v2582_v40 }
0x13d1   :  { %v2711_v2 = vpop.eup %2710 }
0x13d2   :  { %v1206_v10 = vadd.f32 1.0, %v2711_v2 }
0x13d4   :  { %2712 = vrcp.f32 %v1206_v10  ;;  %v1218_v16 = vand.u32 2147483648, %v1206_v10  ;;  %vm1212_vm4 = vweird.f32 %v1206_v10  ;;  %v1216_v17 = vand.u32 2147483647, %v1206_v10 }
0x13d6   :  { %v1219_v19 = vor.u32 1.1754944e-38, %v1218_v16  ;;  %vm1217_vm6 = vcmp.eq.f32.partialorder %v1216_v17, 8.507059e+37 }
0x13da   :  { %v2713_v11 = vpop.eup %2712 }
0x13db   :  { %v1208_v12 = vmul.f32 %v2713_v11, %v1206_v10  ;;  %vm1213_vm3 = vweird.f32 %v2713_v11 }
0x13dc   :  { %vm1214_vm5 = vmor %vm1212_vm4, %vm1213_vm3 }
0x13dd   :  { %v1209_v13 = vsub.f32 1.0, %v1208_v12 }
0x13df   :  { %v1210_v14 = vmul.f32 %v2713_v11, %v1209_v13 }
0x13e1   :  { %v1211_v29 = vadd.f32 %v2713_v11, %v1210_v14  ;;  %v3376_v14 = vld [vmem:[#allocation2 + $0x30] ss:$0 sm:$0xff] }
0x13e3   :  { %v1215_v18 = vsel %vm1214_vm5, %v2713_v11, %v1211_v29 }
0x13e4   :  { %v1220_v21 = vsel %vm1217_vm6, %v1219_v19, %v1215_v18 }
0x1404   :  { %v1130_v8 = vpop.f32.mrf.mxu1 }
0x1405   :  { %v1131_v51 = vadd.f32 %v3339_v5, %v1130_v8 }
0x1407   :  { %1153 = vrot.lane.b32.xlu2 %v1131_v51, %s2907_s0  ;;  %v2580_v15 = vmul.f32 -1.442695, %v1131_v51 }
0x1409   :  { %2714 = vpow2.f32 %v2580_v15  ;;  %v3380_v15 = vadd.f32 %v3376_v14, %v3202_v32 }
0x140f   :  { %v2715_v49 = vpop.eup %2714 }
0x1410   :  { %v1136_v27 = vadd.f32 1.0, %v2715_v49 }
0x1412   :  { %2716 = vrcp.f32 %v1136_v27  ;;  %v1148_v42 = vand.u32 2147483648, %v1136_v27  ;;  %vm1142_vm7 = vweird.f32 %v1136_v27  ;;  %v1146_v44 = vand.u32 2147483647, %v1136_v27 }
0x1414   :  { %v1149_v57 = vor.u32 1.1754944e-38, %v1148_v42  ;;  %vm1147_vm11 = vcmp.eq.f32.partialorder %v1146_v44, 8.507059e+37 }
0x1418   :  { %v2717_v20 = vpop.eup %2716 }
0x1419   :  { %v1138_v9 = vmul.f32 %v2717_v20, %v1136_v27  ;;  %vm1143_vm1 = vweird.f32 %v2717_v20 }
0x141a   :  { %vm1144_vm8 = vmor %vm1142_vm7, %vm1143_vm1 }
0x141b   :  { %v1139_v38 = vsub.f32 1.0, %v1138_v9 }
0x141d   :  { %v1140_v41 = vmul.f32 %v2717_v20, %v1139_v38 }
0x141f   :  { %v1141_v39 = vadd.f32 %v2717_v20, %v1140_v41 }
0x1421   :  { %v1145_v56 = vsel %vm1144_vm8, %v2717_v20, %v1141_v39 }
0x1422   :  { %v1150_v37 = vsel %vm1147_vm11, %v1149_v57, %v1145_v56 }
0x143b   :  { %v1224_v22 = vpop.permute.xlu1 %1223 }
0x143c   :  { %v1226_v26 = vmul.f32 %v1224_v22, %v1220_v21 }
0x143e   :  { %1228 = vrot.lane.b32.xlu0 %v1226_v26, %s2908_s23 }
0x1461   :  { %v1154_v60 = vpop.permute.xlu2 %1153 }
0x1462   :  { %v1156_v63 = vmul.f32 %v1154_v60, %v1150_v37 }
0x1464   :  { %1158 = vrot.lane.b32.xlu1 %v1156_v63, %s2908_s23 }
0x14b0   :  { %v1229_v48 = vpop.permute.xlu0 %1228 }
0x14b1   :  { %v1231_v46 = vadd.f32 %v1229_v48, %v1202_v7 }
0x14b3   :  { %2718 = vtanh.f32 %v1231_v46 }
0x14b9   :  { %v2719_v50 = vpop.eup %2718 }
0x14ba   :  { %v1234_v23 = vrot.slane %v2719_v50, 2 }
0x14bc   :  { %v1236_v52 = vsub.f32 %v3312_v36, %v1234_v23 }
0x14be   :  { %v1238_v35 = vrot.slane %v1236_v52, 6 }
0x14c0   :  { %1239 = vrot.lane.b32.xlu2 %v1238_v35, %s2909_s24 }
0x14d6   :  { %v1159_v54 = vpop.permute.xlu1 %1158 }
0x14d7   :  { %v1161_v55 = vadd.f32 %v1159_v54, %v1131_v51 }
0x14d9   :  { %2720 = vtanh.f32 %v1161_v55 }
0x14df   :  { %v2721_v58 = vpop.eup %2720 }
0x14e0   :  { %v1163_v59 = vsub.f32 %v3318_v53, %v2721_v58 }
0x14e2   :  { %1165 = vrot.lane.b32.xlu0 %v1163_v59, %s2909_s24 }
0x151a   :  { %v1240_v61 = vpop.permute.xlu2 %1239 }
0x151b   :  { %v1242_v62 = vmul.f32 %v1240_v61, %v1220_v21 }
0x151d   :  { %1244 = vrot.lane.b32.xlu1 %v1242_v62, %s2907_s0 }
0x1554   :  { %v1166_v4 = vpop.permute.xlu0 %1165 }
0x1555   :  { %v1168_v6 = vmul.f32 %v1166_v4, %v1150_v37 }
0x1557   :  { %1170 = vrot.lane.b32.xlu2 %v1168_v6, %s2907_s0 }
0x158f   :  { %v1245_v36 = vpop.permute.xlu1 %1244 }
0x1590   :  { %v3351_v7 = vadd.f32 %v2719_v50, %v1245_v36 }
0x1592   :  { %1249 = vrot.lane.b32.xlu1 %v3351_v7, %s2908_s23  ;;  %v1323_v8 = vrot.slane %v3351_v7, 6 }
0x1594   :  { %1324 = vrot.lane.b32.xlu0 %v1323_v8, %s2908_s23 }
0x15b1   :  { %v1171_v53 = vpop.permute.xlu2 %1170 }
0x15b2   :  { %v3357_v51 = vadd.f32 %v2721_v58, %v1171_v53 }
0x15b4   :  { %v1253_v40 = vrot.slane %v3357_v51, 2 }
0x15b6   :  { %1254 = vrot.lane.b32.xlu2 %v1253_v40, %s2909_s24 }
0x1604   :  { %v1250_v10 = vpop.permute.xlu1 %1249 }
0x1606   :  { %v1325_v2 = vpop.permute.xlu0 %1324 }
0x1607   :  { %2585 = vmatmul.msk.f32.vlgmr.msrb.gmra.mxu2 %vm154_vm9, %v1325_v2 }
0x1608   :  { %1928 = vmatpush.msrb.mxu2 %v3225_v47 }
0x160a   :  { %1929 = vmatpush.msrb.mxu2 %v3228_v45 }
0x160c   :  { %1930 = vmatpush.msrb.mxu2 %v3231_v24 }
0x160e   :  { %1931 = vmatpush.msrb.mxu2 %v3234_v25 }
0x1610   :  { %v1255_v11 = vpop.permute.xlu2 %1254 }
0x1611   :  { %v1257_v12 = vsel %vm154_vm9, %v1250_v10, %v1255_v11 }
0x1612   :  { %v1259_v13 = vrot.slane %v1257_v12, 6 }
0x1614   :  { %2583 = vmatmul.msk.f32.vlgmr.msra.gmra.mxu0 %vm226_vm10, %v1259_v13 }
0x1615   :  { %1858 = vmatpush.msra.mxu0 %v3266_v28 }
0x1617   :  { %1859 = vmatpush.msra.mxu0 %v3269_v30 }
0x1619   :  { %1860 = vmatpush.msra.mxu0 %v3272_v31 }
0x161b   :  { %1861 = vmatpush.msra.mxu0 %v3275_v0 }
0x161d   :  { %1862 = vmatpush.msra.mxu0 %v3278_v1 }
0x161f   :  { %1863 = vmatpush.msra.mxu0 %v3281_v3 }
0x1621   :  { %1864 = vmatpush.msra.mxu0 %v3284_v43 }
0x1623   :  { %1865 = vmatpush.msra.mxu0 %v3287_v34 }
0x168a   :  { %v1345_v29 = vpop.f32.mrf.mxu2 }
0x168b   :  { %v1348_v16 = vadd.f32 %v1345_v29, %v3380_v15 }
0x168d   :  { %1369 = vrot.lane.b32.xlu0 %v1348_v16, %s2907_s0  ;;  %v2586_v19 = vmul.f32 -1.442695, %v1348_v16 }
0x168f   :  { %2722 = vpow2.f32 %v2586_v19 }
0x1691   :  { %v1279_v17 = vpop.f32.mrf.mxu0 }
0x1692   :  { %v1280_v18 = vadd.f32 %v3339_v5, %v1279_v17 }
0x1694   :  { %1302 = vrot.lane.b32.xlu1 %v1280_v18, %s2907_s0  ;;  %v2584_v22 = vmul.f32 -1.442695, %v1280_v18 }
0x1695   :  { %v2723_v21 = vpop.eup %2722 }
0x1696   :  { %2724 = vpow2.f32 %v2584_v22  ;;  %v1352_v26 = vadd.f32 1.0, %v2723_v21 }
0x1698   :  { %2726 = vrcp.f32 %v1352_v26  ;;  %v1364_v56 = vand.u32 2147483648, %v1352_v26  ;;  %vm1358_vm13 = vweird.f32 %v1352_v26  ;;  %v1362_v57 = vand.u32 2147483647, %v1352_v26 }
0x169a   :  { %v1365_v63 = vor.u32 1.1754944e-38, %v1364_v56  ;;  %vm1363_vm15 = vcmp.eq.f32.partialorder %v1362_v57, 8.507059e+37 }
0x169c   :  { %v2725_v49 = vpop.eup %2724 }
0x169d   :  { %v1285_v32 = vadd.f32 1.0, %v2725_v49 }
0x169e   :  { %v2727_v27 = vpop.eup %2726 }
0x169f   :  { %2728 = vrcp.f32 %v1285_v32  ;;  %v1354_v20 = vmul.f32 %v2727_v27, %v1352_v26  ;;  %vm1359_vm12 = vweird.f32 %v2727_v27  ;;  %v1297_v52 = vand.u32 2147483648, %v1285_v32 }
0x16a0   :  { %vm1360_vm14 = vmor %vm1358_vm13, %vm1359_vm12  ;;  %vm1291_vm2 = vweird.f32 %v1285_v32  ;;  %v1295_v35 = vand.u32 2147483647, %v1285_v32 }
0x16a1   :  { %v1355_v38 = vsub.f32 1.0, %v1354_v20  ;;  %v1298_v55 = vor.u32 1.1754944e-38, %v1297_v52 }
0x16a2   :  { %vm1296_vm4 = vcmp.eq.f32.partialorder %v1295_v35, 8.507059e+37 }
0x16a3   :  { %v1356_v39 = vmul.f32 %v2727_v27, %v1355_v38 }
0x16a5   :  { %v2729_v9 = vpop.eup %2728  ;;  %v1357_v44 = vadd.f32 %v2727_v27, %v1356_v39 }
0x16a6   :  { %v1287_v41 = vmul.f32 %v2729_v9, %v1285_v32  ;;  %vm1292_vm0 = vweird.f32 %v2729_v9 }
0x16a7   :  { %v1361_v37 = vsel %vm1360_vm14, %v2727_v27, %v1357_v44  ;;  %vm1293_vm3 = vmor %vm1291_vm2, %vm1292_vm0 }
0x16a8   :  { %v1288_v42 = vsub.f32 1.0, %v1287_v41  ;;  %v1366_v46 = vsel %vm1363_vm15, %v1365_v63, %v1361_v37 }
0x16aa   :  { %v1289_v60 = vmul.f32 %v2729_v9, %v1288_v42 }
0x16ac   :  { %v1290_v50 = vadd.f32 %v2729_v9, %v1289_v60 }
0x16ae   :  { %v1294_v54 = vsel %vm1293_vm3, %v2729_v9, %v1290_v50 }
0x16af   :  { %v1299_v59 = vsel %vm1296_vm4, %v1298_v55, %v1294_v54 }
0x16ff   :  { %v1370_v48 = vpop.permute.xlu0 %1369 }
0x1700   :  { %v1372_v23 = vmul.f32 %v1370_v48, %v1366_v46 }
0x1702   :  { %1374 = vrot.lane.b32.xlu2 %v1372_v23, %s2908_s23 }
0x1706   :  { %v1303_v58 = vpop.permute.xlu1 %1302 }
0x1707   :  { %v1305_v61 = vmul.f32 %v1303_v58, %v1299_v59 }
0x1709   :  { %1307 = vrot.lane.b32.xlu0 %v1305_v61, %s2908_s23 }
0x175c   :  { %v1375_v62 = vpop.permute.xlu2 %1374 }
0x175d   :  { %v1377_v4 = vadd.f32 %v1375_v62, %v1348_v16 }
0x175f   :  { %2730 = vtanh.f32 %v1377_v4 }
0x1765   :  { %v2731_v6 = vpop.eup %2730 }
0x1766   :  { %v1380_v36 = vrot.slane %v2731_v6, 2 }
0x1768   :  { %v1382_v8 = vsub.f32 %v3351_v7, %v1380_v36 }
0x176a   :  { %v1384_v53 = vrot.slane %v1382_v8, 6 }
0x176c   :  { %1385 = vrot.lane.b32.xlu1 %v1384_v53, %s2909_s24 }
0x177b   :  { %v1308_v40 = vpop.permute.xlu0 %1307 }
0x177c   :  { %v1310_v2 = vadd.f32 %v1308_v40, %v1280_v18 }
0x177e   :  { %2732 = vtanh.f32 %v1310_v2 }
0x1784   :  { %v2733_v10 = vpop.eup %2732 }
0x1785   :  { %v1312_v11 = vsub.f32 %v3357_v51, %v2733_v10 }
0x1787   :  { %1314 = vrot.lane.b32.xlu2 %v1312_v11, %s2909_s24 }
0x17de   :  { %v1386_v12 = vpop.permute.xlu1 %1385 }
0x17df   :  { %v1388_v13 = vmul.f32 %v1386_v12, %v1366_v46 }
0x17e1   :  { %1390 = vrot.lane.b32.xlu0 %v1388_v13, %s2907_s0  ;;  %v1315_v29 = vpop.permute.xlu2 %1314 }
0x17e2   :  { %v1317_v16 = vmul.f32 %v1315_v29, %v1299_v59 }
0x17e4   :  { %1319 = vrot.lane.b32.xlu1 %v1317_v16, %s2907_s0 }
0x1853   :  { %v1391_v7 = vpop.permute.xlu0 %1390 }
0x1854   :  { %v3394_v17 = vadd.f32 %v2731_v6, %v1391_v7 }
0x1856   :  { %1395 = vrot.lane.b32.xlu2 %v3394_v17, %s2908_s23  ;;  %v1320_v18 = vpop.permute.xlu1 %1319 }
0x1857   :  { %v3398_v19 = vadd.f32 %v2733_v10, %v1320_v18 }
0x1859   :  { %1399 = vrot.lane.b32.xlu0 %v3398_v19, %s2909_s24 }
0x18b0   :  { %v1396_v51 = vpop.permute.xlu2 %1395 }
0x18b1   :  { %2589 = vmatmul.msk.f32.vlgmr.msrb.gmra.mxu1 %vm154_vm9, %v1396_v51 }
0x18b2   :  { %2069 = vmatpush.msrb.mxu1 %v3225_v47 }
0x18b4   :  { %2070 = vmatpush.msrb.mxu1 %v3228_v45 }
0x18b6   :  { %2071 = vmatpush.msrb.mxu1 %v3231_v24 }
0x18b8   :  { %2072 = vmatpush.msrb.mxu1 %v3234_v25 }
0x18cb   :  { %v1400_v22 = vpop.permute.xlu0 %1399 }
0x18cc   :  { %v1402_v21 = vsel %vm154_vm9, %v1396_v51, %v1400_v22 }
0x18cd   :  { %2587 = vmatmul.msk.f32.vlgmr.msra.gmra.mxu3 %vm226_vm10, %v1402_v21 }
0x18ce   :  { %2002 = vmatpush.msra.mxu3 %v3266_v28 }
0x18d0   :  { %2003 = vmatpush.msra.mxu3 %v3269_v30 }
0x18d2   :  { %2004 = vmatpush.msra.mxu3 %v3272_v31 }
0x18d4   :  { %2005 = vmatpush.msra.mxu3 %v3275_v0 }
0x18d6   :  { %2006 = vmatpush.msra.mxu3 %v3278_v1 }
0x18d8   :  { %2007 = vmatpush.msra.mxu3 %v3281_v3 }
0x18da   :  { %2008 = vmatpush.msra.mxu3 %v3284_v43 }
0x18dc   :  { %2009 = vmatpush.msra.mxu3 %v3287_v34 }
0x192e   :  { %v1486_v26 = vpop.f32.mrf.mxu1 }
0x192f   :  { %v1490_v49 = vrot.slane %v1486_v26, 6 }
0x1931   :  { %v1492_v32 = vadd.f32 %v1490_v49, %v3380_v15 }
0x1933   :  { %1513 = vrot.lane.b32.xlu1 %v1492_v32, %s2907_s0  ;;  %v2590_v9 = vmul.f32 -1.442695, %v1492_v32 }
0x1935   :  { %2734 = vpow2.f32 %v2590_v9 }
0x193b   :  { %v2735_v41 = vpop.eup %2734 }
0x193c   :  { %v1496_v39 = vadd.f32 1.0, %v2735_v41 }
0x193e   :  { %v1508_v23 = vand.u32 2147483648, %v1496_v39  ;;  %vm1502_vm6 = vweird.f32 %v1496_v39  ;;  %v1506_v52 = vand.u32 2147483647, %v1496_v39 }
0x1940   :  { %v1509_v55 = vor.u32 1.1754944e-38, %v1508_v23  ;;  %vm1507_vm7 = vcmp.eq.f32.partialorder %v1506_v52, 8.507059e+37 }
0x1950   :  { %v1423_v27 = vpop.f32.mrf.mxu3 }
0x1951   :  { %v1424_v20 = vadd.f32 %v3339_v5, %v1423_v27 }
0x1953   :  { %1446 = vrot.lane.b32.xlu2 %v1424_v20, %s2907_s0  ;;  %v2588_v38 = vmul.f32 -1.442695, %v1424_v20 }
0x1955   :  { %2736 = vpow2.f32 %v2588_v38 }
0x1956   :  { %2738 = vrcp.f32 %v1496_v39 }
0x195b   :  { %v2737_v42 = vpop.eup %2736 }
0x195c   :  { %v1429_v44 = vadd.f32 1.0, %v2737_v42  ;;  %v2739_v56 = vpop.eup %2738 }
0x195d   :  { %v1498_v57 = vmul.f32 %v2739_v56, %v1496_v39  ;;  %vm1503_vm5 = vweird.f32 %v2739_v56 }
0x195e   :  { %2740 = vrcp.f32 %v1429_v44  ;;  %vm1504_vm1 = vmor %vm1502_vm6, %vm1503_vm5  ;;  %v1441_v4 = vand.u32 2147483648, %v1429_v44  ;;  %vm1435_vm11 = vweird.f32 %v1429_v44  ;;  %v1439_v6 = vand.u32 2147483647, %v1429_v44 }
0x195f   :  { %v1499_v60 = vsub.f32 1.0, %v1498_v57 }
0x1960   :  { %v1442_v8 = vor.u32 1.1754944e-38, %v1441_v4  ;;  %vm1440_vm13 = vcmp.eq.f32.partialorder %v1439_v6, 8.507059e+37 }
0x1961   :  { %v1500_v63 = vmul.f32 %v2739_v56, %v1499_v60 }
0x1963   :  { %v1501_v46 = vadd.f32 %v2739_v56, %v1500_v63 }
0x1964   :  { %v2741_v37 = vpop.eup %2740 }
0x1965   :  { %v1431_v48 = vmul.f32 %v2741_v37, %v1429_v44  ;;  %v1505_v35 = vsel %vm1504_vm1, %v2739_v56, %v1501_v46  ;;  %vm1436_vm8 = vweird.f32 %v2741_v37 }
0x1966   :  { %v1510_v59 = vsel %vm1507_vm7, %v1509_v55, %v1505_v35  ;;  %vm1437_vm12 = vmor %vm1435_vm11, %vm1436_vm8 }
0x1967   :  { %v1432_v50 = vsub.f32 1.0, %v1431_v48 }
0x1969   :  { %v1433_v54 = vmul.f32 %v2741_v37, %v1432_v50 }
0x196b   :  { %v1434_v62 = vadd.f32 %v2741_v37, %v1433_v54 }
0x196d   :  { %v1438_v36 = vsel %vm1437_vm12, %v2741_v37, %v1434_v62 }
0x196e   :  { %v1443_v40 = vsel %vm1440_vm13, %v1442_v8, %v1438_v36 }
0x19a5   :  { %v1514_v58 = vpop.permute.xlu1 %1513 }
0x19a6   :  { %v1516_v61 = vmul.f32 %v1514_v58, %v1510_v59 }
0x19a8   :  { %1518 = vrot.lane.b32.xlu0 %v1516_v61, %s2908_s23 }
0x19ad   :  { %v1447_v53 = vpop.permute.xlu2 %1446 }
0x19ae   :  { %v1449_v2 = vmul.f32 %v1447_v53, %v1443_v40 }
0x19b0   :  { %1451 = vrot.lane.b32.xlu1 %v1449_v2, %s2908_s23 }
0x1a1a   :  { %v1519_v10 = vpop.permute.xlu0 %1518 }
0x1a1b   :  { %v1521_v11 = vadd.f32 %v1519_v10, %v1492_v32 }
0x1a1d   :  { %2742 = vtanh.f32 %v1521_v11 }
0x1a22   :  { %v1452_v12 = vpop.permute.xlu1 %1451 }
0x1a23   :  { %v2743_v13 = vpop.eup %2742  ;;  %v1454_v29 = vadd.f32 %v1452_v12, %v1424_v20 }
0x1a24   :  { %v1524_v16 = vrot.slane %v2743_v13, 2 }
0x1a25   :  { %2744 = vtanh.f32 %v1454_v29 }
0x1a26   :  { %v1526_v7 = vsub.f32 %v3394_v17, %v1524_v16 }
0x1a28   :  { %v1528_v18 = vrot.slane %v1526_v7, 6 }
0x1a2a   :  { %1529 = vrot.lane.b32.xlu2 %v1528_v18, %s2909_s24 }
0x1a2b   :  { %v2745_v51 = vpop.eup %2744 }
0x1a2c   :  { %v1456_v22 = vsub.f32 %v3398_v19, %v2745_v51 }
0x1a2e   :  { %1458 = vrot.lane.b32.xlu0 %v1456_v22, %s2909_s24 }
0x1a84   :  { %v1530_v21 = vpop.permute.xlu2 %1529 }
0x1a85   :  { %v1532_v26 = vmul.f32 %v1530_v21, %v1510_v59 }
0x1a87   :  { %1534 = vrot.lane.b32.xlu1 %v1532_v26, %s2907_s0 }
0x1aa0   :  { %v1459_v49 = vpop.permute.xlu0 %1458 }
0x1aa1   :  { %v1461_v32 = vmul.f32 %v1459_v49, %v1443_v40 }
0x1aa3   :  { %1463 = vrot.lane.b32.xlu2 %v1461_v32, %s2907_s0 }
0x1af9   :  { %v1535_v27 = vpop.permute.xlu1 %1534 }
0x1afa   :  { %v3429_v20 = vadd.f32 %v2743_v13, %v1535_v27 }
0x1afc   :  { %1539 = vrot.lane.b32.xlu1 %v3429_v20, %s2908_s23  ;;  %v1613_v17 = vrot.slane %v3429_v20, 2 }
0x1afd   :  { %v1464_v9 = vpop.permute.xlu2 %1463 }
0x1afe   :  { %v3434_v19 = vadd.f32 %v2745_v51, %v1464_v9  ;;  %1614 = vrot.lane.b32.xlu0 %v1613_v17, %s2908_s23 }
0x1b00   :  { %v1543_v38 = vrot.slane %v3434_v19, 6 }
0x1b02   :  { %1544 = vrot.lane.b32.xlu2 %v1543_v38, %s2909_s24 }
0x1b5c   :  { %v1545_v41 = vpop.permute.xlu2 %1544 }
0x1b6e   :  { %v1540_v39 = vpop.permute.xlu1 %1539 }
0x1b6f   :  { %v1547_v42 = vsel %vm154_vm9, %v1540_v39, %v1545_v41 }
0x1b70   :  { %v1549_v44 = vrot.slane %v1547_v42, 2  ;;  %v1615_v56 = vpop.permute.xlu0 %1614 }
0x1b71   :  { %2593 = vmatmul.msk.f32.vlgmr.msrb.gmra.mxu0 %vm154_vm9, %v1615_v56 }
0x1b72   :  { %2591 = vmatmul.msk.f32.vlgmr.msra.gmra.mxu2 %vm226_vm10, %v1549_v44  ;;  %2218 = vmatpush.msrb.mxu0 %v3225_v47 }
0x1b73   :  { %2148 = vmatpush.msra.mxu2 %v3266_v28 }
0x1b74   :  { %2219 = vmatpush.msrb.mxu0 %v3228_v45 }
0x1b75   :  { %2149 = vmatpush.msra.mxu2 %v3269_v30 }
0x1b76   :  { %2220 = vmatpush.msrb.mxu0 %v3231_v24 }
0x1b77   :  { %2150 = vmatpush.msra.mxu2 %v3272_v31 }
0x1b78   :  { %2221 = vmatpush.msrb.mxu0 %v3234_v25 }
0x1b79   :  { %2151 = vmatpush.msra.mxu2 %v3275_v0 }
0x1b7b   :  { %2152 = vmatpush.msra.mxu2 %v3278_v1 }
0x1b7d   :  { %2153 = vmatpush.msra.mxu2 %v3281_v3 }
0x1b7f   :  { %2154 = vmatpush.msra.mxu2 %v3284_v43 }
0x1b81   :  { %2155 = vmatpush.msra.mxu2 %v3287_v34 }
0x1bee   :  { %v1635_v47 = vpop.f32.mrf.mxu0 }
0x1bef   :  { %v1639_v45 = vrot.slane %v1635_v47, 4 }
0x1bf1   :  { %v1641_v57 = vadd.f32 %v1639_v45, %v3380_v15 }
0x1bf3   :  { %1662 = vrot.lane.b32.xlu0 %v1641_v57, %s2907_s0  ;;  %v2594_v25 = vmul.f32 -1.442695, %v1641_v57 }
0x1bf5   :  { %v1569_v24 = vpop.f32.mrf.mxu2  ;;  %2746 = vpow2.f32 %v2594_v25  ;;  %v2839_v25 = vld [vmem:[#allocation2 + $0x20] sm:$0xff] }
0x1bf6   :  { %v1570_v60 = vadd.f32 %v3339_v5, %v1569_v24 }
0x1bf8   :  { %1592 = vrot.lane.b32.xlu1 %v1570_v60, %s2907_s0  ;;  %v2592_v37 = vmul.f32 -1.442695, %v1570_v60 }
0x1bfa   :  { %2748 = vpow2.f32 %v2592_v37  ;;  %v2840_v37 = vld [vmem:[#allocation2 + $0x18] sm:$0xff] }
0x1bfb   :  { %v2747_v63 = vpop.eup %2746 }
0x1bfc   :  { %v1645_v48 = vadd.f32 1.0, %v2747_v63  ;;  %v2841_v63 = vld [vmem:[#allocation2 + $0x10] sm:$0xff] }
0x1bfe   :  { %2750 = vrcp.f32 %v1645_v48  ;;  %v1657_v62 = vand.u32 2147483648, %v1645_v48  ;;  %vm1651_vm15 = vweird.f32 %v1645_v48  ;;  %v1655_v6 = vand.u32 2147483647, %v1645_v48 }
0x1c00   :  { %v2749_v46 = vpop.eup %2748  ;;  %v1658_v8 = vor.u32 1.1754944e-38, %v1657_v62  ;;  %vm1656_vm3 = vcmp.eq.f32.partialorder %v1655_v6, 8.507059e+37 }
0x1c01   :  { %v1575_v50 = vadd.f32 1.0, %v2749_v46 }
0x1c03   :  { %2752 = vrcp.f32 %v1575_v50  ;;  %v1587_v40 = vand.u32 2147483648, %v1575_v50  ;;  %vm1581_vm4 = vweird.f32 %v1575_v50  ;;  %v1585_v11 = vand.u32 2147483647, %v1575_v50 }
0x1c04   :  { %v2751_v23 = vpop.eup %2750 }
0x1c05   :  { %v1647_v52 = vmul.f32 %v2751_v23, %v1645_v48  ;;  %vm1652_vm14 = vweird.f32 %v2751_v23  ;;  %v1588_v29 = vor.u32 1.1754944e-38, %v1587_v40  ;;  %vm1586_vm6 = vcmp.eq.f32.partialorder %v1585_v11, 8.507059e+37 }
0x1c06   :  { %vm1653_vm0 = vmor %vm1651_vm15, %vm1652_vm14 }
0x1c07   :  { %v1648_v54 = vsub.f32 1.0, %v1647_v52 }
0x1c09   :  { %v2753_v35 = vpop.eup %2752  ;;  %v1649_v58 = vmul.f32 %v2751_v23, %v1648_v54 }
0x1c0a   :  { %v1577_v55 = vmul.f32 %v2753_v35, %v1575_v50  ;;  %vm1582_vm2 = vweird.f32 %v2753_v35 }
0x1c0b   :  { %v1650_v61 = vadd.f32 %v2751_v23, %v1649_v58  ;;  %vm1583_vm5 = vmor %vm1581_vm4, %vm1582_vm2 }
0x1c0c   :  { %v1578_v59 = vsub.f32 1.0, %v1577_v55 }
0x1c0d   :  { %v1654_v36 = vsel %vm1653_vm0, %v2751_v23, %v1650_v61 }
0x1c0e   :  { %v1579_v4 = vmul.f32 %v2753_v35, %v1578_v59  ;;  %v1659_v10 = vsel %vm1656_vm3, %v1658_v8, %v1654_v36 }
0x1c10   :  { %v1580_v53 = vadd.f32 %v2753_v35, %v1579_v4 }
0x1c12   :  { %v1584_v13 = vsel %vm1583_vm5, %v2753_v35, %v1580_v53 }
0x1c13   :  { %v1589_v7 = vsel %vm1586_vm6, %v1588_v29, %v1584_v13 }
0x1c65   :  { %v1663_v2 = vpop.permute.xlu0 %1662 }
0x1c66   :  { %v1665_v12 = vmul.f32 %v1663_v2, %v1659_v10 }
0x1c68   :  { %1667 = vrot.lane.b32.xlu2 %v1665_v12, %s2908_s23 }
0x1c6a   :  { %v1593_v16 = vpop.permute.xlu1 %1592 }
0x1c6b   :  { %v1595_v18 = vmul.f32 %v1593_v16, %v1589_v7 }
0x1c6d   :  { %1597 = vrot.lane.b32.xlu0 %v1595_v18, %s2908_s23 }
0x1cc2   :  { %v1668_v51 = vpop.permute.xlu2 %1667 }
0x1cc3   :  { %v1670_v22 = vadd.f32 %v1668_v51, %v1641_v57 }
0x1cc5   :  { %2754 = vtanh.f32 %v1670_v22 }
0x1ccb   :  { %v2755_v21 = vpop.eup %2754 }
0x1ccc   :  { %v1673_v26 = vrot.slane %v2755_v21, 2 }
0x1cce   :  { %v1675_v49 = vsub.f32 %v3429_v20, %v1673_v26 }
0x1cd0   :  { %v1677_v32 = vrot.slane %v1675_v49, 6 }
0x1cd2   :  { %1678 = vrot.lane.b32.xlu1 %v1677_v32, %s2909_s24 }
0x1cdf   :  { %v1598_v27 = vpop.permute.xlu0 %1597 }
0x1ce0   :  { %v1600_v17 = vadd.f32 %v1598_v27, %v1570_v60  ;;  %v2838_v60 = vld [vmem:[#allocation2 + $0x28] sm:$0xff] }
0x1ce2   :  { %2756 = vtanh.f32 %v1600_v17 }
0x1ce8   :  { %v2757_v9 = vpop.eup %2756 }
0x1ce9   :  { %v1602_v38 = vsub.f32 %v3434_v19, %v2757_v9 }
0x1ceb   :  { %1604 = vrot.lane.b32.xlu2 %v1602_v38, %s2909_s24 }
0x1d44   :  { %v1679_v41 = vpop.permute.xlu1 %1678 }
0x1d45   :  { %v1681_v39 = vmul.f32 %v1679_v41, %v1659_v10  ;;  %v1605_v42 = vpop.permute.xlu2 %1604 }
0x1d46   :  { %v1607_v44 = vmul.f32 %v1605_v42, %v1589_v7 }
0x1d47   :  { %1683 = vrot.lane.b32.xlu0 %v1681_v39, %s2907_s0 }
0x1d48   :  { %1609 = vrot.lane.b32.xlu1 %v1607_v44, %s2907_s0 }
0x1db9   :  { %v1684_v20 = vpop.permute.xlu0 %1683 }
0x1dba   :  { %v3466_v56 = vadd.f32 %v2755_v21, %v1684_v20  ;;  %v1610_v47 = vpop.permute.xlu1 %1609 }
0x1dbb   :  { %v3468_v45 = vadd.f32 %v2757_v9, %v1610_v47 }
0x1dbc   :  { %1688 = vrot.lane.b32.xlu0 %v3466_v56, %s2908_s23  ;;  %v1762_v19 = vrot.slane %v3466_v56, 4 }
0x1dbd   :  { %v1692_v57 = vrot.slane %v3468_v45, 4 }
0x1dbe   :  { %1763 = vrot.lane.b32.xlu2 %v1762_v19, %s2908_s23 }
0x1dbf   :  { %1693 = vrot.lane.b32.xlu1 %v1692_v57, %s2909_s24 }
0x1e18   :  { %v1764_v24 = vpop.permute.xlu2 %1763 }
0x1e19   :  { %2597 = vmatmul.msk.f32.vlgmr.msrb.gmra.mxu3 %vm154_vm9, %v1764_v24 }
0x1e1a   :  { %2367 = vmatpush.msrb.mxu3 %v2838_v60 }
0x1e1c   :  { %2368 = vmatpush.msrb.mxu3 %v2839_v25 }
0x1e1e   :  { %2369 = vmatpush.msrb.mxu3 %v2840_v37 }
0x1e20   :  { %2370 = vmatpush.msrb.mxu3 %v2841_v63 }
0x1e2e   :  { %v1689_v48 = vpop.permute.xlu0 %1688 }
0x1e31   :  { %v1694_v46 = vpop.permute.xlu1 %1693 }
0x1e32   :  { %v1696_v50 = vsel %vm154_vm9, %v1689_v48, %v1694_v46 }
0x1e33   :  { %v1698_v23 = vrot.slane %v1696_v50, 4 }
0x1e35   :  { %2595 = vmatmul.msk.f32.vlgmr.msra.gmra.mxu1 %vm226_vm10, %v1698_v23  ;;  %v2842_v23 = vld [vmem:[#allocation2 + $0x70] sm:$0xff] }
0x1e36   :  { %2297 = vmatpush.msra.mxu1 %v3266_v28 }
0x1e38   :  { %2298 = vmatpush.msra.mxu1 %v3269_v30 }
0x1e3a   :  { %2299 = vmatpush.msra.mxu1 %v3272_v31 }
0x1e3c   :  { %2300 = vmatpush.msra.mxu1 %v3275_v0 }
0x1e3e   :  { %2301 = vmatpush.msra.mxu1 %v3278_v1 }
0x1e40   :  { %2302 = vmatpush.msra.mxu1 %v3281_v3 }
0x1e42   :  { %2303 = vmatpush.msra.mxu1 %v3284_v43 }
0x1e44   :  { %2304 = vmatpush.msra.mxu1 %v3287_v34 }
0x1e9c   :  { %v1784_v52 = vpop.f32.mrf.mxu3 }
0x1e9d   :  { %v1788_v35 = vrot.slane %v1784_v52, 2  ;;  %v2843_v52 = vld [vmem:[#allocation2 + $0x68] sm:$0xff] }
0x1e9f   :  { %v1790_v54 = vadd.f32 %v1788_v35, %v3380_v15  ;;  %v2844_v35 = vld [vmem:[#allocation2 + $0x60] sm:$0xff] }
0x1ea1   :  { %1811 = vrot.lane.b32.xlu2 %v1790_v54, %s2907_s0  ;;  %v2598_v31 = vmul.f32 -1.442695, %v1790_v54 }
0x1ea3   :  { %2758 = vpow2.f32 %v2598_v31  ;;  %v2848_v31 = vld [vmem:[#allocation2 + $0x40] sm:$0xff] }
0x1ea9   :  { %v2759_v0 = vpop.eup %2758 }
0x1eaa   :  { %v1794_v1 = vadd.f32 1.0, %v2759_v0  ;;  %v2849_v0 = vld [vmem:[#allocation2 + $0x38] sm:$0xff] }
0x1eac   :  { %2760 = vrcp.f32 %v1794_v1  ;;  %v1806_v59 = vand.u32 2147483648, %v1794_v1  ;;  %vm1800_vm7 = vweird.f32 %v1794_v1  ;;  %v1804_v15 = vand.u32 2147483647, %v1794_v1 }
0x1eae   :  { %v1807_v62 = vor.u32 1.1754944e-38, %v1806_v59  ;;  %vm1805_vm11 = vcmp.eq.f32.partialorder %v1804_v15, 8.507059e+37 }
0x1eb2   :  { %v1718_v28 = vpop.f32.mrf.mxu1  ;;  %v2761_v3 = vpop.eup %2760 }
0x1eb3   :  { %v1719_v30 = vadd.f32 %v3339_v5, %v1718_v28  ;;  %v1796_v43 = vmul.f32 %v2761_v3, %v1794_v1  ;;  %vm1801_vm1 = vweird.f32 %v2761_v3  ;;  %v2846_v28 = vld [vmem:[#allocation2 + $0x50] sm:$0xff]  ;;  %v3514_v1 = vadd.f32 %v3376_v14, %v3204_v33 }
0x1eb4   :  { %vm1802_vm8 = vmor %vm1800_vm7, %vm1801_vm1 }
0x1eb5   :  { %1741 = vrot.lane.b32.xlu0 %v1719_v30, %s2907_s0  ;;  %v1797_v55 = vsub.f32 1.0, %v1796_v43  ;;  %v2596_v4 = vmul.f32 -1.442695, %v1719_v30 }
0x1eb7   :  { %v1798_v34 = vmul.f32 %v2761_v3, %v1797_v55  ;;  %2762 = vpow2.f32 %v2596_v4 }
0x1eb9   :  { %v1799_v58 = vadd.f32 %v2761_v3, %v1798_v34 }
0x1ebb   :  { %v1803_v61 = vsel %vm1802_vm8, %v2761_v3, %v1799_v58 }
0x1ebc   :  { %v1808_v36 = vsel %vm1805_vm11, %v1807_v62, %v1803_v61 }
0x1ebd   :  { %v2763_v53 = vpop.eup %2762 }
0x1ebe   :  { %v1724_v40 = vadd.f32 1.0, %v2763_v53 }
0x1ec0   :  { %2764 = vrcp.f32 %v1724_v40  ;;  %v1736_v29 = vand.u32 2147483648, %v1724_v40  ;;  %vm1730_vm13 = vweird.f32 %v1724_v40  ;;  %v1734_v16 = vand.u32 2147483647, %v1724_v40 }
0x1ec2   :  { %v1737_v18 = vor.u32 1.1754944e-38, %v1736_v29  ;;  %vm1735_vm15 = vcmp.eq.f32.partialorder %v1734_v16, 8.507059e+37 }
0x1ec6   :  { %v2765_v2 = vpop.eup %2764 }
0x1ec7   :  { %v1726_v10 = vmul.f32 %v2765_v2, %v1724_v40  ;;  %vm1731_vm12 = vweird.f32 %v2765_v2 }
0x1ec8   :  { %vm1732_vm14 = vmor %vm1730_vm13, %vm1731_vm12 }
0x1ec9   :  { %v1727_v11 = vsub.f32 1.0, %v1726_v10 }
0x1ecb   :  { %v1728_v12 = vmul.f32 %v2765_v2, %v1727_v11 }
0x1ecd   :  { %v1729_v13 = vadd.f32 %v2765_v2, %v1728_v12 }
0x1ecf   :  { %v1733_v7 = vsel %vm1732_vm14, %v2765_v2, %v1729_v13 }
0x1ed0   :  { %v1738_v22 = vsel %vm1735_vm15, %v1737_v18, %v1733_v7 }
0x1efb   :  { %v1812_v6 = vpop.permute.xlu2 %1811 }
0x1efc   :  { %v1814_v8 = vmul.f32 %v1812_v6, %v1808_v36 }
0x1efe   :  { %1816 = vrot.lane.b32.xlu1 %v1814_v8, %s2908_s23 }
0x1f27   :  { %v1742_v51 = vpop.permute.xlu0 %1741 }
0x1f28   :  { %v1744_v21 = vmul.f32 %v1742_v51, %v1738_v22 }
0x1f2a   :  { %1746 = vrot.lane.b32.xlu2 %v1744_v21, %s2908_s23 }
0x1f70   :  { %v1817_v26 = vpop.permute.xlu1 %1816 }
0x1f71   :  { %v1819_v49 = vadd.f32 %v1817_v26, %v1790_v54  ;;  %v2845_v54 = vld [vmem:[#allocation2 + $0x58] sm:$0xff] }
0x1f73   :  { %2766 = vtanh.f32 %v1819_v49 }
0x1f79   :  { %v2767_v32 = vpop.eup %2766 }
0x1f7a   :  { %v1822_v27 = vrot.slane %v2767_v32, 2 }
0x1f7c   :  { %v1824_v17 = vsub.f32 %v3466_v56, %v1822_v27 }
0x1f7e   :  { %v1826_v9 = vrot.slane %v1824_v17, 6 }
0x1f80   :  { %1827 = vrot.lane.b32.xlu0 %v1826_v9, %s2909_s24 }
0x1f84   :  { %v1747_v38 = vpop.permute.xlu2 %1746 }
0x1f85   :  { %v1749_v41 = vadd.f32 %v1747_v38, %v1719_v30  ;;  %v2847_v30 = vld [vmem:[#allocation2 + $0x48] sm:$0xff] }
0x1f87   :  { %2768 = vtanh.f32 %v1749_v41 }
0x1f8d   :  { %v2769_v39 = vpop.eup %2768 }
0x1f8e   :  { %v1751_v42 = vsub.f32 %v3468_v45, %v2769_v39 }
0x1f90   :  { %1753 = vrot.lane.b32.xlu1 %v1751_v42, %s2909_s24 }
0x1ff2   :  { %v1828_v44 = vpop.permute.xlu0 %1827 }
0x1ff3   :  { %v1830_v20 = vmul.f32 %v1828_v44, %v1808_v36 }
0x1ff5   :  { %1832 = vrot.lane.b32.xlu2 %v1830_v20, %s2907_s0 }
0x2002   :  { %v1754_v47 = vpop.permute.xlu1 %1753 }
0x2003   :  { %v1756_v19 = vmul.f32 %v1754_v47, %v1738_v22 }
0x2005   :  { %1758 = vrot.lane.b32.xlu0 %v1756_v19, %s2907_s0 }
0x204f   :  { %v1833_v56 = vpop.permute.xlu2 %1832 }
0x2050   :  { %v3499_v57 = vadd.f32 %v2767_v32, %v1833_v56 }
0x2052   :  { %1837 = vrot.lane.b32.xlu2 %v3499_v57, %s2908_s23  ;;  %v1911_v24 = vrot.slane %v3499_v57, 6 }
0x2054   :  { %1912 = vrot.lane.b32.xlu1 %v1911_v24, %s2908_s23 }
0x2077   :  { %v1759_v45 = vpop.permute.xlu0 %1758 }
0x2078   :  { %v3505_v60 = vadd.f32 %v2769_v39, %v1759_v45 }
0x207a   :  { %v1841_v25 = vrot.slane %v3505_v60, 2 }
0x207c   :  { %1842 = vrot.lane.b32.xlu0 %v1841_v25, %s2909_s24 }
0x20ac   :  { %v1838_v63 = vpop.permute.xlu2 %1837 }
0x20c6   :  { %v1913_v37 = vpop.permute.xlu1 %1912 }
0x20c7   :  { %2601 = vmatmul.msk.f32.vlgmr.msrb.gmra.mxu2 %vm154_vm9, %v1913_v37 }
0x20ee   :  { %v1843_v48 = vpop.permute.xlu0 %1842 }
0x20ef   :  { %v1845_v46 = vsel %vm154_vm9, %v1838_v63, %v1843_v48 }
0x20f0   :  { %v1847_v50 = vrot.slane %v1845_v46, 6 }
0x20f2   :  { %2599 = vmatmul.msk.f32.vlgmr.msra.gmra.mxu0 %vm226_vm10, %v1847_v50 }
0x20f3   :  { %2446 = vmatpush.msra.mxu0 %v2842_v23 }
0x20f5   :  { %2447 = vmatpush.msra.mxu0 %v2843_v52 }
0x20f7   :  { %2448 = vmatpush.msra.mxu0 %v2844_v35 }
0x20f9   :  { %2449 = vmatpush.msra.mxu0 %v2845_v54 }
0x20fb   :  { %2450 = vmatpush.msra.mxu0 %v2846_v28  ;;  %v3541_v28 = vld [vmem:[#allocation2 + $0x78] ss:$0 sm:$0xff] }
0x20fd   :  { %2451 = vmatpush.msra.mxu0 %v2847_v30 }
0x20ff   :  { %2452 = vmatpush.msra.mxu0 %v2848_v31 }
0x2101   :  { %2453 = vmatpush.msra.mxu0 %v2849_v0 }
0x214a   :  { %v1933_v3 = vpop.f32.mrf.mxu2 }
0x214b   :  { %v1936_v43 = vadd.f32 %v1933_v3, %v3514_v1 }
0x214d   :  { %1957 = vrot.lane.b32.xlu1 %v1936_v43, %s2907_s0  ;;  %v2602_v58 = vmul.f32 -1.442695, %v1936_v43 }
0x214f   :  { %2770 = vpow2.f32 %v2602_v58 }
0x2155   :  { %v2771_v59 = vpop.eup %2770 }
0x2156   :  { %v1940_v15 = vadd.f32 1.0, %v2771_v59 }
0x2158   :  { %2772 = vrcp.f32 %v1940_v15  ;;  %vm1946_vm2 = vweird.f32 %v1940_v15  ;;  %v1950_v2 = vand.u32 2147483647, %v1940_v15 }
0x215a   :  { %vm1951_vm4 = vcmp.eq.f32.partialorder %v1950_v2, 8.507059e+37 }
0x215e   :  { %v2773_v62 = vpop.eup %2772 }
0x215f   :  { %v1942_v4 = vmul.f32 %v2773_v62, %v1940_v15  ;;  %vm1947_vm0 = vweird.f32 %v2773_v62 }
0x2160   :  { %vm1948_vm3 = vmor %vm1946_vm2, %vm1947_vm0 }
0x2161   :  { %v1943_v6 = vsub.f32 1.0, %v1942_v4 }
0x2163   :  { %v1944_v36 = vmul.f32 %v2773_v62, %v1943_v6 }
0x2165   :  { %v1945_v53 = vadd.f32 %v2773_v62, %v1944_v36 }
0x2167   :  { %v1949_v10 = vsel %vm1948_vm3, %v2773_v62, %v1945_v53 }
0x216f   :  { %v1867_v55 = vpop.f32.mrf.mxu0 }
0x2170   :  { %v1868_v34 = vadd.f32 %v3339_v5, %v1867_v55  ;;  %v1952_v5 = vand.u32 2147483648, %v1940_v15 }
0x2172   :  { %1890 = vrot.lane.b32.xlu2 %v1868_v34, %s2907_s0  ;;  %v2600_v61 = vmul.f32 -1.442695, %v1868_v34  ;;  %v1953_v11 = vor.u32 1.1754944e-38, %v1952_v5 }
0x2174   :  { %2774 = vpow2.f32 %v2600_v61  ;;  %v1954_v29 = vsel %vm1951_vm4, %v1953_v11, %v1949_v10 }
0x217a   :  { %v2775_v33 = vpop.eup %2774 }
0x217b   :  { %v1873_v14 = vadd.f32 1.0, %v2775_v33 }
0x217d   :  { %2776 = vrcp.f32 %v1873_v14  ;;  %v1885_v51 = vand.u32 2147483648, %v1873_v14  ;;  %vm1879_vm6 = vweird.f32 %v1873_v14  ;;  %v1883_v22 = vand.u32 2147483647, %v1873_v14 }
0x217f   :  { %v1886_v26 = vor.u32 1.1754944e-38, %v1885_v51  ;;  %vm1884_vm7 = vcmp.eq.f32.partialorder %v1883_v22, 8.507059e+37 }
0x2183   :  { %v2777_v8 = vpop.eup %2776 }
0x2184   :  { %v1875_v40 = vmul.f32 %v2777_v8, %v1873_v14  ;;  %vm1880_vm5 = vweird.f32 %v2777_v8 }
0x2185   :  { %vm1881_vm1 = vmor %vm1879_vm6, %vm1880_vm5 }
0x2186   :  { %v1876_v12 = vsub.f32 1.0, %v1875_v40 }
0x2188   :  { %v1877_v7 = vmul.f32 %v2777_v8, %v1876_v12 }
0x218a   :  { %v1878_v18 = vadd.f32 %v2777_v8, %v1877_v7 }
0x218c   :  { %v1882_v21 = vsel %vm1881_vm1, %v2777_v8, %v1878_v18 }
0x218d   :  { %v1887_v32 = vsel %vm1884_vm7, %v1886_v26, %v1882_v21 }
0x21bf   :  { %v1958_v13 = vpop.permute.xlu1 %1957 }
0x21c0   :  { %v1960_v16 = vmul.f32 %v1958_v13, %v1954_v29 }
0x21c2   :  { %1962 = vrot.lane.b32.xlu0 %v1960_v16, %s2908_s23 }
0x21cc   :  { %v1891_v49 = vpop.permute.xlu2 %1890 }
0x21cd   :  { %v1893_v27 = vmul.f32 %v1891_v49, %v1887_v32 }
0x21cf   :  { %1895 = vrot.lane.b32.xlu1 %v1893_v27, %s2908_s23 }
0x2234   :  { %v1963_v17 = vpop.permute.xlu0 %1962 }
0x2235   :  { %v1965_v9 = vadd.f32 %v1963_v17, %v1936_v43 }
0x2237   :  { %2778 = vtanh.f32 %v1965_v9 }
0x223d   :  { %v2779_v38 = vpop.eup %2778 }
0x223e   :  { %v1968_v41 = vrot.slane %v2779_v38, 2 }
0x2240   :  { %v1970_v39 = vsub.f32 %v3499_v57, %v1968_v41 }
0x2241   :  { %v1896_v42 = vpop.permute.xlu1 %1895 }
0x2242   :  { %v1898_v44 = vadd.f32 %v1896_v42, %v1868_v34  ;;  %v1972_v20 = vrot.slane %v1970_v39, 6 }
0x2244   :  { %2780 = vtanh.f32 %v1898_v44  ;;  %1973 = vrot.lane.b32.xlu2 %v1972_v20, %s2909_s24 }
0x224a   :  { %v2781_v47 = vpop.eup %2780 }
0x224b   :  { %v1900_v19 = vsub.f32 %v3505_v60, %v2781_v47 }
0x224d   :  { %1902 = vrot.lane.b32.xlu0 %v1900_v19, %s2909_s24 }
0x229e   :  { %v1974_v56 = vpop.permute.xlu2 %1973 }
0x229f   :  { %v1976_v24 = vmul.f32 %v1974_v56, %v1954_v29 }
0x22a1   :  { %1978 = vrot.lane.b32.xlu1 %v1976_v24, %s2907_s0 }
0x22bf   :  { %v1903_v45 = vpop.permute.xlu0 %1902 }
0x22c0   :  { %v1905_v25 = vmul.f32 %v1903_v45, %v1887_v32 }
0x22c2   :  { %1907 = vrot.lane.b32.xlu2 %v1905_v25, %s2907_s0 }
0x2313   :  { %v1979_v57 = vpop.permute.xlu1 %1978 }
0x2314   :  { %v3528_v37 = vadd.f32 %v2779_v38, %v1979_v57 }
0x2316   :  { %1983 = vrot.lane.b32.xlu0 %v3528_v37, %s2908_s23 }
0x231c   :  { %v1908_v63 = vpop.permute.xlu2 %1907 }
0x231d   :  { %v3532_v48 = vadd.f32 %v2781_v47, %v1908_v63 }
0x231f   :  { %1987 = vrot.lane.b32.xlu1 %v3532_v48, %s2909_s24 }
0x2388   :  { %v1984_v60 = vpop.permute.xlu0 %1983 }
0x2389   :  { %2605 = vmatmul.msk.f32.vlgmr.msrb.gmra.mxu1 %vm154_vm9, %v1984_v60 }
0x2391   :  { %v1988_v46 = vpop.permute.xlu1 %1987 }
0x2392   :  { %v1990_v50 = vsel %vm154_vm9, %v1984_v60, %v1988_v46 }
0x2393   :  { %2603 = vmatmul.msk.f32.vlgmr.msra.gmra.mxu3 %vm226_vm10, %v1990_v50 }
0x2406   :  { %v2074_v23 = vpop.f32.mrf.mxu1 }
0x2407   :  { %v2078_v52 = vrot.slane %v2074_v23, 6 }
0x2409   :  { %v2080_v35 = vadd.f32 %v2078_v52, %v3514_v1 }
0x240b   :  { %2101 = vrot.lane.b32.xlu2 %v2080_v35, %s2907_s0  ;;  %v2606_v31 = vmul.f32 -1.442695, %v2080_v35 }
0x240d   :  { %2782 = vpow2.f32 %v2606_v31 }
0x2413   :  { %v2783_v0 = vpop.eup %2782 }
0x2414   :  { %v2084_v3 = vadd.f32 1.0, %v2783_v0 }
0x2416   :  { %v2011_v54 = vpop.f32.mrf.mxu3  ;;  %2784 = vrcp.f32 %v2084_v3  ;;  %v2096_v61 = vand.u32 2147483648, %v2084_v3  ;;  %vm2090_vm11 = vweird.f32 %v2084_v3  ;;  %v2094_v62 = vand.u32 2147483647, %v2084_v3 }
0x2417   :  { %v2012_v30 = vadd.f32 %v3541_v28, %v2011_v54 }
0x2418   :  { %v2097_v14 = vor.u32 1.1754944e-38, %v2096_v61  ;;  %vm2095_vm13 = vcmp.eq.f32.partialorder %v2094_v62, 8.507059e+37 }
0x2419   :  { %2034 = vrot.lane.b32.xlu0 %v2012_v30, %s2907_s0  ;;  %v2604_v59 = vmul.f32 -1.442695, %v2012_v30 }
0x241b   :  { %2786 = vpow2.f32 %v2604_v59 }
0x241c   :  { %v2785_v43 = vpop.eup %2784 }
0x241d   :  { %v2086_v55 = vmul.f32 %v2785_v43, %v2084_v3  ;;  %vm2091_vm8 = vweird.f32 %v2785_v43 }
0x241e   :  { %vm2092_vm12 = vmor %vm2090_vm11, %vm2091_vm8 }
0x241f   :  { %v2087_v34 = vsub.f32 1.0, %v2086_v55 }
0x2421   :  { %v2088_v58 = vmul.f32 %v2785_v43, %v2087_v34  ;;  %v2787_v8 = vpop.eup %2786 }
0x2422   :  { %v2017_v53 = vadd.f32 1.0, %v2787_v8 }
0x2423   :  { %v2089_v15 = vadd.f32 %v2785_v43, %v2088_v58 }
0x2424   :  { %2788 = vrcp.f32 %v2017_v53  ;;  %v2029_v12 = vand.u32 2147483648, %v2017_v53  ;;  %vm2023_vm15 = vweird.f32 %v2017_v53  ;;  %v2027_v13 = vand.u32 2147483647, %v2017_v53 }
0x2425   :  { %v2093_v33 = vsel %vm2092_vm12, %v2785_v43, %v2089_v15 }
0x2426   :  { %v2098_v6 = vsel %vm2095_vm13, %v2097_v14, %v2093_v33  ;;  %v2030_v16 = vor.u32 1.1754944e-38, %v2029_v12  ;;  %vm2028_vm2 = vcmp.eq.f32.partialorder %v2027_v13, 8.507059e+37 }
0x242a   :  { %v2789_v5 = vpop.eup %2788 }
0x242b   :  { %v2019_v40 = vmul.f32 %v2789_v5, %v2017_v53  ;;  %vm2024_vm14 = vweird.f32 %v2789_v5 }
0x242c   :  { %vm2025_vm0 = vmor %vm2023_vm15, %vm2024_vm14 }
0x242d   :  { %v2020_v2 = vsub.f32 1.0, %v2019_v40 }
0x242f   :  { %v2021_v10 = vmul.f32 %v2789_v5, %v2020_v2 }
0x2431   :  { %v2022_v11 = vadd.f32 %v2789_v5, %v2021_v10 }
0x2433   :  { %v2026_v29 = vsel %vm2025_vm0, %v2789_v5, %v2022_v11 }
0x2434   :  { %v2031_v18 = vsel %vm2028_vm2, %v2030_v16, %v2026_v29 }
0x2465   :  { %v2102_v4 = vpop.permute.xlu2 %2101 }
0x2466   :  { %v2104_v36 = vmul.f32 %v2102_v4, %v2098_v6 }
0x2468   :  { %2106 = vrot.lane.b32.xlu1 %v2104_v36, %s2908_s23 }
0x248b   :  { %v2035_v7 = vpop.permute.xlu0 %2034 }
0x248c   :  { %v2037_v51 = vmul.f32 %v2035_v7, %v2031_v18 }
0x248e   :  { %2039 = vrot.lane.b32.xlu2 %v2037_v51, %s2908_s23 }
0x24da   :  { %v2107_v22 = vpop.permute.xlu1 %2106 }
0x24db   :  { %v2109_v21 = vadd.f32 %v2107_v22, %v2080_v35 }
0x24dd   :  { %2790 = vtanh.f32 %v2109_v21 }
0x24e3   :  { %v2791_v26 = vpop.eup %2790 }
0x24e4   :  { %v2112_v49 = vrot.slane %v2791_v26, 2 }
0x24e6   :  { %v2114_v32 = vsub.f32 %v3528_v37, %v2112_v49 }
0x24e8   :  { %v2040_v27 = vpop.permute.xlu2 %2039  ;;  %v2116_v17 = vrot.slane %v2114_v32, 6 }
0x24e9   :  { %v2042_v9 = vadd.f32 %v2040_v27, %v2012_v30 }
0x24ea   :  { %2117 = vrot.lane.b32.xlu0 %v2116_v17, %s2909_s24 }
0x24eb   :  { %2792 = vtanh.f32 %v2042_v9 }
0x24f1   :  { %v2793_v38 = vpop.eup %2792 }
0x24f2   :  { %v2044_v41 = vsub.f32 %v3532_v48, %v2793_v38 }
0x24f4   :  { %2046 = vrot.lane.b32.xlu1 %v2044_v41, %s2909_s24 }
0x255c   :  { %v2118_v39 = vpop.permute.xlu0 %2117 }
0x255d   :  { %v2120_v42 = vmul.f32 %v2118_v39, %v2098_v6 }
0x255f   :  { %2122 = vrot.lane.b32.xlu2 %v2120_v42, %s2907_s0 }
0x2566   :  { %v2047_v44 = vpop.permute.xlu1 %2046 }
0x2567   :  { %v2049_v20 = vmul.f32 %v2047_v44, %v2031_v18 }
0x2569   :  { %2051 = vrot.lane.b32.xlu0 %v2049_v20, %s2907_s0 }
0x25b9   :  { %v2123_v47 = vpop.permute.xlu2 %2122 }
0x25ba   :  { %v3553_v19 = vadd.f32 %v2791_v26, %v2123_v47 }
0x25bc   :  { %2127 = vrot.lane.b32.xlu2 %v3553_v19, %s2908_s23  ;;  %v2201_v56 = vrot.slane %v3553_v19, 2 }
0x25be   :  { %2202 = vrot.lane.b32.xlu1 %v2201_v56, %s2908_s23 }
0x25db   :  { %v2052_v24 = vpop.permute.xlu0 %2051 }
0x25dc   :  { %v3559_v45 = vadd.f32 %v2793_v38, %v2052_v24 }
0x25de   :  { %v2131_v25 = vrot.slane %v3559_v45, 6 }
0x25e0   :  { %2132 = vrot.lane.b32.xlu0 %v2131_v25, %s2909_s24 }
0x2616   :  { %v2128_v37 = vpop.permute.xlu2 %2127 }
0x2630   :  { %v2203_v57 = vpop.permute.xlu1 %2202 }
0x2631   :  { %2609 = vmatmul.msk.f32.vlgmr.msrb.gmra.mxu0 %vm154_vm9, %v2203_v57 }
0x2652   :  { %v2133_v63 = vpop.permute.xlu0 %2132 }
0x2653   :  { %v2135_v48 = vsel %vm154_vm9, %v2128_v37, %v2133_v63 }
0x2654   :  { %v2137_v60 = vrot.slane %v2135_v48, 2 }
0x2656   :  { %2607 = vmatmul.msk.f32.vlgmr.msra.gmra.mxu2 %vm226_vm10, %v2137_v60 }
0x26ae   :  { %v2223_v46 = vpop.f32.mrf.mxu0 }
0x26af   :  { %v2227_v50 = vrot.slane %v2223_v46, 4 }
0x26b1   :  { %v2229_v23 = vadd.f32 %v2227_v50, %v3514_v1 }
0x26b3   :  { %2250 = vrot.lane.b32.xlu1 %v2229_v23, %s2907_s0  ;;  %v2610_v54 = vmul.f32 -1.442695, %v2229_v23 }
0x26b5   :  { %2794 = vpow2.f32 %v2610_v54 }
0x26bb   :  { %v2795_v30 = vpop.eup %2794 }
0x26bc   :  { %v2233_v31 = vadd.f32 1.0, %v2795_v30 }
0x26be   :  { %2796 = vrcp.f32 %v2233_v31  ;;  %v2245_v61 = vand.u32 2147483648, %v2233_v31  ;;  %vm2239_vm4 = vweird.f32 %v2233_v31  ;;  %v2243_v33 = vand.u32 2147483647, %v2233_v31 }
0x26c0   :  { %v2246_v4 = vor.u32 1.1754944e-38, %v2245_v61  ;;  %vm2244_vm6 = vcmp.eq.f32.partialorder %v2243_v33, 8.507059e+37 }
0x26c4   :  { %v2797_v3 = vpop.eup %2796 }
0x26c5   :  { %v2235_v43 = vmul.f32 %v2797_v3, %v2233_v31  ;;  %vm2240_vm3 = vweird.f32 %v2797_v3 }
0x26c6   :  { %vm2241_vm5 = vmor %vm2239_vm4, %vm2240_vm3 }
0x26c7   :  { %v2236_v58 = vsub.f32 1.0, %v2235_v43 }
0x26c9   :  { %v2237_v59 = vmul.f32 %v2797_v3, %v2236_v58 }
0x26cb   :  { %v2238_v15 = vadd.f32 %v2797_v3, %v2237_v59 }
0x26cd   :  { %v2242_v14 = vsel %vm2241_vm5, %v2797_v3, %v2238_v15 }
0x26ce   :  { %v2247_v8 = vsel %vm2244_vm6, %v2246_v4, %v2242_v14 }
0x26d9   :  { %v2157_v52 = vpop.f32.mrf.mxu2 }
0x26da   :  { %v2158_v35 = vadd.f32 %v3541_v28, %v2157_v52 }
0x26dc   :  { %2180 = vrot.lane.b32.xlu2 %v2158_v35, %s2907_s0  ;;  %v2608_v0 = vmul.f32 -1.442695, %v2158_v35 }
0x26de   :  { %2798 = vpow2.f32 %v2608_v0 }
0x26e4   :  { %v2799_v55 = vpop.eup %2798 }
0x26e5   :  { %v2163_v34 = vadd.f32 1.0, %v2799_v55 }
0x26e7   :  { %2800 = vrcp.f32 %v2163_v34  ;;  %v2175_v10 = vand.u32 2147483648, %v2163_v34  ;;  %vm2169_vm7 = vweird.f32 %v2163_v34  ;;  %v2173_v11 = vand.u32 2147483647, %v2163_v34 }
0x26e9   :  { %v2176_v13 = vor.u32 1.1754944e-38, %v2175_v10  ;;  %vm2174_vm11 = vcmp.eq.f32.partialorder %v2173_v11, 8.507059e+37 }
0x26ed   :  { %v2801_v62 = vpop.eup %2800 }
0x26ee   :  { %v2165_v6 = vmul.f32 %v2801_v62, %v2163_v34  ;;  %vm2170_vm1 = vweird.f32 %v2801_v62 }
0x26ef   :  { %vm2171_vm8 = vmor %vm2169_vm7, %vm2170_vm1  ;;  %vm2530_vm7 = vcmask 17408  }
0x26f0   :  { %v2166_v5 = vsub.f32 1.0, %v2165_v6 }
0x26f2   :  { %v2167_v40 = vmul.f32 %v2801_v62, %v2166_v5 }
0x26f4   :  { %v2168_v2 = vadd.f32 %v2801_v62, %v2167_v40 }
0x26f6   :  { %v2172_v12 = vsel %vm2171_vm8, %v2801_v62, %v2168_v2 }
0x26f7   :  { %v2177_v16 = vsel %vm2174_vm11, %v2176_v13, %v2172_v12 }
0x2725   :  { %v2251_v36 = vpop.permute.xlu1 %2250 }
0x2726   :  { %v2253_v53 = vmul.f32 %v2251_v36, %v2247_v8 }
0x2728   :  { %2255 = vrot.lane.b32.xlu0 %v2253_v53, %s2908_s23 }
0x2736   :  { %v2181_v29 = vpop.permute.xlu2 %2180 }
0x2737   :  { %v2183_v7 = vmul.f32 %v2181_v29, %v2177_v16 }
0x2739   :  { %2185 = vrot.lane.b32.xlu1 %v2183_v7, %s2908_s23 }
0x279a   :  { %v2256_v18 = vpop.permute.xlu0 %2255 }
0x279b   :  { %v2258_v51 = vadd.f32 %v2256_v18, %v2229_v23 }
0x279d   :  { %2802 = vtanh.f32 %v2258_v51 }
0x27a3   :  { %v2803_v22 = vpop.eup %2802 }
0x27a4   :  { %v2261_v21 = vrot.slane %v2803_v22, 2 }
0x27a6   :  { %v2263_v26 = vsub.f32 %v3553_v19, %v2261_v21 }
0x27a8   :  { %v2265_v49 = vrot.slane %v2263_v26, 6 }
0x27aa   :  { %2266 = vrot.lane.b32.xlu2 %v2265_v49, %s2909_s24 }
0x27ab   :  { %v2186_v32 = vpop.permute.xlu1 %2185 }
0x27ac   :  { %v2188_v27 = vadd.f32 %v2186_v32, %v2158_v35 }
0x27ae   :  { %2804 = vtanh.f32 %v2188_v27 }
0x27b4   :  { %v2805_v17 = vpop.eup %2804 }
0x27b5   :  { %v2190_v9 = vsub.f32 %v3559_v45, %v2805_v17 }
0x27b7   :  { %2192 = vrot.lane.b32.xlu0 %v2190_v9, %s2909_s24 }
0x2804   :  { %v2267_v38 = vpop.permute.xlu2 %2266 }
0x2805   :  { %v2269_v41 = vmul.f32 %v2267_v38, %v2247_v8 }
0x2807   :  { %2271 = vrot.lane.b32.xlu1 %v2269_v41, %s2907_s0 }
0x2829   :  { %v2193_v39 = vpop.permute.xlu0 %2192 }
0x282a   :  { %v2195_v42 = vmul.f32 %v2193_v39, %v2177_v16 }
0x282c   :  { %2197 = vrot.lane.b32.xlu2 %v2195_v42, %s2907_s0 }
0x2879   :  { %v2272_v44 = vpop.permute.xlu1 %2271 }
0x287a   :  { %v3578_v20 = vadd.f32 %v2803_v22, %v2272_v44 }
0x287c   :  { %v2350_v47 = vrot.slane %v3578_v20, 4  ;;  %2276 = vrot.lane.b32.xlu1 %v3578_v20, %s2908_s23 }
0x287e   :  { %2351 = vrot.lane.b32.xlu0 %v2350_v47, %s2908_s23 }
0x2886   :  { %v2198_v19 = vpop.permute.xlu2 %2197 }
0x2887   :  { %v3584_v56 = vadd.f32 %v2805_v17, %v2198_v19 }
0x2889   :  { %v2280_v24 = vrot.slane %v3584_v56, 4 }
0x288b   :  { %2281 = vrot.lane.b32.xlu2 %v2280_v24, %s2909_s24 }
0x28e5   :  { %v2282_v45 = vpop.permute.xlu2 %2281 }
0x28ee   :  { %v2277_v25 = vpop.permute.xlu1 %2276 }
0x28ef   :  { %v2284_v57 = vsel %vm154_vm9, %v2277_v25, %v2282_v45 }
0x28f0   :  { %v2286_v37 = vrot.slane %v2284_v57, 4  ;;  %v2352_v63 = vpop.permute.xlu0 %2351 }
0x28f1   :  { %2613 = vmatmul.msk.f32.vlgmr.msrb.gmra.mxu3 %vm154_vm9, %v2352_v63 }
0x28f2   :  { %2611 = vmatmul.msk.f32.vlgmr.msra.gmra.mxu1 %vm226_vm10, %v2286_v37 }
0x296f   :  { %v2306_v48 = vpop.f32.mrf.mxu1 }
0x2970   :  { %v2307_v60 = vadd.f32 %v3541_v28, %v2306_v48 }
0x2972   :  { %2329 = vrot.lane.b32.xlu1 %v2307_v60, %s2907_s0  ;;  %v2612_v52 = vmul.f32 -1.442695, %v2307_v60 }
0x2974   :  { %v2372_v46 = vpop.f32.mrf.mxu3  ;;  %2806 = vpow2.f32 %v2612_v52 }
0x2975   :  { %v2376_v50 = vrot.slane %v2372_v46, 2 }
0x2977   :  { %v2378_v23 = vadd.f32 %v2376_v50, %v3514_v1 }
0x2979   :  { %2399 = vrot.lane.b32.xlu0 %v2378_v23, %s2907_s0  ;;  %v2614_v35 = vmul.f32 -1.442695, %v2378_v23 }
0x297a   :  { %v2807_v54 = vpop.eup %2806 }
0x297b   :  { %2808 = vpow2.f32 %v2614_v35  ;;  %v2312_v30 = vadd.f32 1.0, %v2807_v54 }
0x297d   :  { %2810 = vrcp.f32 %v2312_v30  ;;  %v2324_v61 = vand.u32 2147483648, %v2312_v30  ;;  %vm2318_vm13 = vweird.f32 %v2312_v30  ;;  %v2322_v62 = vand.u32 2147483647, %v2312_v30 }
0x297f   :  { %v2325_v4 = vor.u32 1.1754944e-38, %v2324_v61  ;;  %vm2323_vm15 = vcmp.eq.f32.partialorder %v2322_v62, 8.507059e+37  ;;  %v2500_v61 = vld [vmem:[#allocation2 + $0x88] sm:$0xff]  ;;  %v2499_v62 = vld [vmem:[#allocation2 + $0x80] sm:$0xff] }
0x2981   :  { %v2809_v31 = vpop.eup %2808 }
0x2982   :  { %v2382_v0 = vadd.f32 1.0, %v2809_v31 }
0x2983   :  { %v2811_v3 = vpop.eup %2810 }
0x2984   :  { %2812 = vrcp.f32 %v2382_v0  ;;  %v2314_v43 = vmul.f32 %v2811_v3, %v2312_v30  ;;  %vm2319_vm12 = vweird.f32 %v2811_v3  ;;  %v2394_v5 = vand.u32 2147483648, %v2382_v0 }
0x2985   :  { %vm2320_vm14 = vmor %vm2318_vm13, %vm2319_vm12  ;;  %vm2388_vm2 = vweird.f32 %v2382_v0  ;;  %v2392_v40 = vand.u32 2147483647, %v2382_v0 }
0x2986   :  { %v2315_v34 = vsub.f32 1.0, %v2314_v43  ;;  %v2395_v10 = vor.u32 1.1754944e-38, %v2394_v5 }
0x2987   :  { %vm2393_vm4 = vcmp.eq.f32.partialorder %v2392_v40, 8.507059e+37 }
0x2988   :  { %v2316_v59 = vmul.f32 %v2811_v3, %v2315_v34 }
0x298a   :  { %v2813_v55 = vpop.eup %2812  ;;  %v2317_v1 = vadd.f32 %v2811_v3, %v2316_v59 }
0x298b   :  { %v2384_v58 = vmul.f32 %v2813_v55, %v2382_v0  ;;  %vm2389_vm0 = vweird.f32 %v2813_v55 }
0x298c   :  { %v2321_v14 = vsel %vm2320_vm14, %v2811_v3, %v2317_v1  ;;  %vm2390_vm3 = vmor %vm2388_vm2, %vm2389_vm0  ;;  %v2501_v1 = vld [vmem:[#allocation2 + $0x90] sm:$0xff] }
0x298d   :  { %v2385_v15 = vsub.f32 1.0, %v2384_v58  ;;  %v2326_v36 = vsel %vm2323_vm15, %v2325_v4, %v2321_v14 }
0x298f   :  { %v2386_v33 = vmul.f32 %v2813_v55, %v2385_v15  ;;  %v2502_v15 = vld [vmem:[#allocation2 + $0x98] sm:$0xff] }
0x2990   :  { %2522 = vmatpush.msrb.mxu2 %v2502_v15 }
0x2991   :  { %v2387_v8 = vadd.f32 %v2813_v55, %v2386_v33 }
0x2992   :  { %2523 = vmatpush.msrb.mxu2 %v2501_v1 }
0x2993   :  { %v2391_v2 = vsel %vm2390_vm3, %v2813_v55, %v2387_v8 }
0x2994   :  { %v2396_v12 = vsel %vm2393_vm4, %v2395_v10, %v2391_v2  ;;  %2524 = vmatpush.msrb.mxu2 %v2500_v61 }
0x2996   :  { %2525 = vmatpush.msrb.mxu2 %v2499_v62 }
0x29e4   :  { %v2330_v6 = vpop.permute.xlu1 %2329 }
0x29e5   :  { %v2332_v53 = vmul.f32 %v2330_v6, %v2326_v36  ;;  %v2629_v6 = vld [vmem:[#allocation2 + $0xa0] ss:$0 sm:$0xff] }
0x29e7   :  { %2334 = vrot.lane.b32.xlu0 %v2332_v53, %s2908_s23 }
0x29eb   :  { %v2400_v11 = vpop.permute.xlu0 %2399 }
0x29ec   :  { %v2402_v13 = vmul.f32 %v2400_v11, %v2396_v12 }
0x29ee   :  { %2404 = vrot.lane.b32.xlu2 %v2402_v13, %s2908_s23 }
0x2a48   :  { %v2405_v29 = vpop.permute.xlu2 %2404 }
0x2a49   :  { %v2407_v16 = vadd.f32 %v2405_v29, %v2378_v23 }
0x2a4b   :  { %2814 = vtanh.f32 %v2407_v16 }
0x2a51   :  { %v2815_v7 = vpop.eup %2814 }
0x2a52   :  { %v2410_v18 = vrot.slane %v2815_v7, 2 }
0x2a54   :  { %v2412_v51 = vsub.f32 %v3578_v20, %v2410_v18 }
0x2a56   :  { %v2414_v22 = vrot.slane %v2412_v51, 6 }
0x2a58   :  { %2415 = vrot.lane.b32.xlu2 %v2414_v22, %s2909_s24 }
0x2a59   :  { %v2335_v21 = vpop.permute.xlu0 %2334 }
0x2a5a   :  { %v2337_v26 = vadd.f32 %v2335_v21, %v2307_v60 }
0x2a5c   :  { %2816 = vtanh.f32 %v2337_v26 }
0x2a62   :  { %v2817_v49 = vpop.eup %2816 }
0x2a63   :  { %v2339_v32 = vsub.f32 %v3584_v56, %v2817_v49 }
0x2a65   :  { %2341 = vrot.lane.b32.xlu1 %v2339_v32, %s2909_s24 }
0x2ab2   :  { %v2416_v27 = vpop.permute.xlu2 %2415 }
0x2ab3   :  { %v2418_v17 = vmul.f32 %v2416_v27, %v2396_v12 }
0x2ab5   :  { %2420 = vrot.lane.b32.xlu1 %v2418_v17, %s2907_s0 }
0x2ad7   :  { %v2342_v9 = vpop.permute.xlu1 %2341 }
0x2ad8   :  { %v2344_v38 = vmul.f32 %v2342_v9, %v2326_v36 }
0x2ada   :  { %2346 = vrot.lane.b32.xlu0 %v2344_v38, %s2907_s0 }
0x2b27   :  { %v2421_v41 = vpop.permute.xlu1 %2420 }
0x2b28   :  { %v2423_v39 = vadd.f32 %v2815_v7, %v2421_v41 }
0x2b2a   :  { %2425 = vrot.lane.b32.xlu2 %v2423_v39, %s2908_s23 }
0x2b4c   :  { %v2347_v42 = vpop.permute.xlu0 %2346 }
0x2b4d   :  { %v2349_v44 = vadd.f32 %v2817_v49, %v2347_v42 }
0x2b4f   :  { %v2429_v20 = vrot.slane %v2349_v44, 2 }
0x2b51   :  { %2430 = vrot.lane.b32.xlu0 %v2429_v20, %s2909_s24 }
0x2b84   :  { %v2426_v47 = vpop.permute.xlu2 %2425 }
0x2bc3   :  { %v2431_v19 = vpop.permute.xlu0 %2430 }
0x2bc4   :  { %v2433_v56 = vsel %vm154_vm9, %v2426_v47, %v2431_v19 }
0x2bc5   :  { %v2435_v24 = vrot.slane %v2433_v56, 6 }
0x2bc7   :  { %2615 = vmatmul.msk.f32.vlgmr.msra.gmra.mxu0 %vm226_vm10, %v2435_v24 }
0x2c44   :  { %v2455_v45 = vpop.f32.mrf.mxu0 }
0x2c45   :  { %v2456_v25 = vadd.f32 %v3541_v28, %v2455_v45 }
0x2c47   :  { %2478 = vrot.lane.b32.xlu1 %v2456_v25, %s2907_s0  ;;  %v2616_v57 = vmul.f32 -1.442695, %v2456_v25 }
0x2c49   :  { %2818 = vpow2.f32 %v2616_v57 }
0x2c4f   :  { %v2819_v37 = vpop.eup %2818 }
0x2c50   :  { %v2461_v63 = vadd.f32 1.0, %v2819_v37 }
0x2c52   :  { %2820 = vrcp.f32 %v2461_v63  ;;  %v2473_v52 = vand.u32 2147483648, %v2461_v63  ;;  %vm2467_vm6 = vweird.f32 %v2461_v63  ;;  %v2471_v35 = vand.u32 2147483647, %v2461_v63 }
0x2c54   :  { %v2474_v30 = vor.u32 1.1754944e-38, %v2473_v52  ;;  %vm2472_vm1 = vcmp.eq.f32.partialorder %v2471_v35, 8.507059e+37 }
0x2c58   :  { %v2821_v48 = vpop.eup %2820 }
0x2c59   :  { %v2463_v60 = vmul.f32 %v2821_v48, %v2461_v63  ;;  %vm2468_vm5 = vweird.f32 %v2821_v48 }
0x2c5a   :  { %vm2469_vm10 = vmor %vm2467_vm6, %vm2468_vm5 }
0x2c5b   :  { %v2464_v46 = vsub.f32 1.0, %v2463_v60 }
0x2c5d   :  { %v2465_v50 = vmul.f32 %v2821_v48, %v2464_v46 }
0x2c5f   :  { %v2466_v23 = vadd.f32 %v2821_v48, %v2465_v50 }
0x2c61   :  { %v2470_v54 = vsel %vm2469_vm10, %v2821_v48, %v2466_v23 }
0x2c62   :  { %v2475_v31 = vsel %vm2472_vm1, %v2474_v30, %v2470_v54 }
0x2cb9   :  { %v2479_v28 = vpop.permute.xlu1 %2478 }
0x2cba   :  { %v2481_v0 = vmul.f32 %v2479_v28, %v2475_v31 }
0x2cbc   :  { %2483 = vrot.lane.b32.xlu2 %v2481_v0, %s2908_s23 }
0x2d16   :  { %v2484_v3 = vpop.permute.xlu2 %2483 }
0x2d17   :  { %v2486_v43 = vadd.f32 %v2484_v3, %v2456_v25 }
0x2d19   :  { %2822 = vtanh.f32 %v2486_v43 }
0x2d1f   :  { %v2823_v55 = vpop.eup %2822 }
0x2d20   :  { %v2488_v34 = vsub.f32 %v2349_v44, %v2823_v55 }
0x2d22   :  { %2490 = vrot.lane.b32.xlu0 %v2488_v34, %s2909_s24 }
0x2d94   :  { %v2491_v58 = vpop.permute.xlu0 %2490 }
0x2d95   :  { %v2493_v59 = vmul.f32 %v2491_v58, %v2475_v31 }
0x2d97   :  { %2495 = vrot.lane.b32.xlu1 %v2493_v59, %s2907_s0 }
0x2e09   :  { %v2496_v33 = vpop.permute.xlu1 %2495 }
0x2e0a   :  { %v2498_v14 = vadd.f32 %v2823_v55, %v2496_v33 }
0x2e0c   :  { %2506 = vrot.lane.b32.xlu2 %v2498_v14, %s2908_s23 }
0x2e66   :  { %v2507_v4 = vpop.permute.xlu2 %2506 }
0x2e67   :  { %2617 = vmatmul.msk.f32.vlgmr.msrb.gmra.mxu2 %vm154_vm9, %v2507_v4 }
0x2eea   :  { %v2527_v36 = vpop.f32.mrf.mxu2 }
0x2eeb   :  { %v2528_v8 = vadd.f32 %v2629_v6, %v2527_v36 }
0x2eed   :  { %2531 = vst.msk [vmem:[#allocation5] sm:$0x3] %vm2530_vm7, %v2528_v8 }
0x2eee   :  { %2542 = dma.vmem_to_hbm [thread:$0]  %s2538_s26, 32, %s2540_s29, [#allocation4]  }
0x2eef   :  { %2901 = dma.done.wait [#allocation4], 32  }
0x2ef0   :  { %2902 = vsyncadd [#allocation4], 4294967264 }
0x2ef1   :  { %2547 = vsyncpa [#allocation3], 1 }
0x2ef2   :  { %2548 = vsyncpa [#allocation4], 1 }

</bundles_post_ra>
